<compile_context>
chip_gen: v7x
topology: tpu7x:2x2x1
jax: 0.10.0
libtpu: 0.0.40
codegen_flags: <defaults>
</compile_context>

<pallas_src>
import functools

import jax
import jax.numpy as jnp
from jax.experimental import pallas as pl
from jax.experimental.pallas import tpu as pltpu

_EPS = 1e-5                        # torch.nn.InstanceNorm2d default eps
_VMEM_LIMIT = 32 * 1024 * 1024     # safe on v5e (128 MiB), v6e (128 MiB), v7x (64 MiB)


# ----------------------------------------------------------------------------
# Pallas tiled matmul kernel with fused epilogue (bias / residual / activation)
# ----------------------------------------------------------------------------
def _gemm_kernel(has_bias, has_skip, act):
    def kernel(*refs):
        a_ref, b_ref = refs[0], refs[1]
        idx = 2
        bias_ref = refs[idx] if has_bias else None
        idx += 1 if has_bias else 0
        skip_ref = refs[idx] if has_skip else None
        idx += 1 if has_skip else 0
        o_ref, acc_ref = refs[idx], refs[idx + 1]

        @pl.when(pl.program_id(2) == 0)
        def _():
            acc_ref[...] = jnp.zeros_like(acc_ref)

        acc_ref[...] += jnp.dot(a_ref[...], b_ref[...],
                                preferred_element_type=jnp.float32)

        @pl.when(pl.program_id(2) == pl.num_programs(2) - 1)
        def _():
            v = acc_ref[...]
            if has_bias:
                v = v + bias_ref[...]
            if has_skip:
                v = v + skip_ref[...]
            if act == "leaky":
                v = jnp.where(v >= 0.0, v, 0.2 * v)
            elif act == "tanh":
                v = jnp.tanh(v)
            elif act == "sigmoid":
                v = 0.5 * (jnp.tanh(0.5 * v) + 1.0)   # numerically stable sigmoid
            o_ref[...] = v.astype(o_ref.dtype)

    return kernel


def _dot_1x1_kernel(act):
    # (1, K) . (1, K) -> (1, 1): discriminator head (M = N = 1), where a tiled
    # MXU GEMM would run at <1% utilization.
    def kernel(a_ref, b_ref, bias_ref, o_ref):
        v = jnp.sum(a_ref[...].astype(jnp.float32) * b_ref[...].astype(jnp.float32),
                    axis=1, keepdims=True)
        v = v + bias_ref[...]
        if act == "leaky":
            v = jnp.where(v >= 0.0, v, 0.2 * v)
        elif act == "tanh":
            v = jnp.tanh(v)
        elif act == "sigmoid":
            v = 0.5 * (jnp.tanh(0.5 * v) + 1.0)
        o_ref[...] = v.astype(o_ref.dtype)

    return kernel


def _gemm(a, b, bias=None, skip=None, act="none"):
    """(M, K) @ (K, N) with f32 accumulation and a fused epilogue.

    Operands are cast to bf16 (MXU-native); bias is f32 (N,), skip is f32
    (M, N).  Only K is zero-padded; ragged trailing M blocks are masked by
    Pallas, so there are no M/N padding passes.
    """
    M, K = a.shape
    _, N = b.shape
    a = a.astype(jnp.bfloat16)
    b = b.astype(jnp.bfloat16)

    if M == 1 and N == 1:
        bias2 = bias if bias is not None else jnp.zeros((1,), jnp.float32)
        bias2 = bias2.reshape(1, 1).astype(jnp.float32)
        out = pl.pallas_call(
            _dot_1x1_kernel(act),
            out_shape=jax.ShapeDtypeStruct((1, 1), jnp.float32),
            compiler_params=pltpu.CompilerParams(vmem_limit_bytes=_VMEM_LIMIT),
        )(a, b.reshape(1, K), bias2)
        if skip is not None:
            out = out + skip
        return out

    # K must be zero-padded (exact) to keep the contraction lane-aligned.
    if K % 128 != 0:
        Kp = pl.cdiv(K, 128) * 128
        a = jnp.pad(a, ((0, 0), (0, Kp - K)))
        b = jnp.pad(b, ((0, Kp - K), (0, 0)))
        K = Kp

    # ---- tile selection: large tiles => few grid steps, near HBM roofline ----
    if M >= 8192:
        TM = 2048 if K <= 2048 else 1024
    elif M >= 512:
        TM = 512            # keeps >= 2 parallel M blocks for megacore chips
    else:
        TM = M
    TN = N if N <= 512 else 512
    if K <= 4096:
        TK = K              # single K step
    else:
        TK = 4096 if K % 4096 == 0 else 2048
        Kp = pl.cdiv(K, TK) * TK
        if Kp != K:
            a = jnp.pad(a, ((0, 0), (0, Kp - K)))
            b = jnp.pad(b, ((0, Kp - K), (0, 0)))
            K = Kp
    grid = (pl.cdiv(M, TM), pl.cdiv(N, TN), K // TK)

    in_specs = [pl.BlockSpec((TM, TK), lambda i, j, k: (i, k)),
                pl.BlockSpec((TK, TN), lambda i, j, k: (k, j))]
    args = [a, b]
    if bias is not None:
        in_specs.append(pl.BlockSpec((1, TN), lambda i, j, k: (0, j)))
        args.append(bias.reshape(1, N).astype(jnp.float32))
    if skip is not None:
        in_specs.append(pl.BlockSpec((TM, TN), lambda i, j, k: (i, j)))
        args.append(skip.astype(jnp.float32))

    return pl.pallas_call(
        _gemm_kernel(bias is not None, skip is not None, act),
        out_shape=jax.ShapeDtypeStruct((M, N), jnp.float32),
        grid=grid,
        in_specs=in_specs,
        out_specs=pl.BlockSpec((TM, TN), lambda i, j, k: (i, j)),
        scratch_shapes=[pltpu.VMEM((TM, TN), jnp.float32)],
        compiler_params=pltpu.CompilerParams(
            dimension_semantics=("parallel", "parallel", "arbitrary"),
            vmem_limit_bytes=_VMEM_LIMIT),
    )(*args)


# ----------------------------------------------------------------------------
# InstanceNorm2d(affine=False) + LeakyReLU(0.2), and standalone LeakyReLU
# ----------------------------------------------------------------------------
def _in_leaky_kernel(x_ref, o_ref):
    v = x_ref[...]
    m = jnp.mean(v, axis=0, keepdims=True)          # per-channel (sublane reduce)
    c = v - m
    var = jnp.mean(c * c, axis=0, keepdims=True)    # biased var (torch default)
    y = c * jax.lax.rsqrt(var + _EPS)
    o_ref[...] = jnp.where(y >= 0.0, y, 0.2 * y)


@jax.jit
def instance_norm_leaky(x):
    """x: (N, H, W, C) f32 -> per-(n, c) normalization over H*W + LeakyReLU(0.2)."""
    N, H, W, C = x.shape
    call = pl.pallas_call(
        _in_leaky_kernel,
        out_shape=jax.ShapeDtypeStruct((H * W, C), jnp.float32),
        compiler_params=pltpu.CompilerParams(vmem_limit_bytes=_VMEM_LIMIT),
    )
    ys = [call(x[n].reshape(H * W, C)) for n in range(N)]
    return jnp.stack(ys, axis=0).reshape(N, H, W, C)


@functools.partial(jax.jit, static_argnames=("slope",))
def leaky_relu(x, slope):
    def kernel(x_ref, o_ref):
        v = x_ref[...]
        o_ref[...] = jnp.where(v >= 0.0, v, slope * v)

    rows = x.size // x.shape[-1]
    y = pl.pallas_call(
        kernel,
        out_shape=jax.ShapeDtypeStruct((rows, x.shape[-1]), x.dtype),
        compiler_params=pltpu.CompilerParams(vmem_limit_bytes=_VMEM_LIMIT),
    )(x.reshape(rows, x.shape[-1]))
    return y.reshape(x.shape)


# ----------------------------------------------------------------------------
# Conv2d / ConvTranspose2d (NHWC activations, PyTorch weight layouts)
# ----------------------------------------------------------------------------
def _conv2d_impl(x, w, b, skip, *, stride, padding, act):
    """x: (N, H, W, C); w: (OC, C, KH, KW) (torch Conv2d layout)."""
    N, H, W, C = x.shape
    OC, _, KH, KW = w.shape
    if padding:
        x = jnp.pad(x, ((0, 0), (padding, padding), (padding, padding), (0, 0)))
    Hp, Wp = H + 2 * padding, W + 2 * padding
    OH = (Hp - KH) // stride + 1
    OW = (Wp - KW) // stride + 1
    # im2col with channels innermost -> lane-dense GEMM LHS, no transposes.
    cols = [x[:, i:i + (OH - 1) * stride + 1:stride,
                 j:j + (OW - 1) * stride + 1:stride, :]
            for i in range(KH) for j in range(KW)]
    patches = jnp.concatenate(cols, axis=-1).reshape(N * OH * OW, KH * KW * C)
    wmat = jnp.transpose(w, (2, 3, 1, 0)).reshape(KH * KW * C, OC)
    skip2 = skip.reshape(N * OH * OW, OC) if skip is not None else None
    out = _gemm(patches, wmat, bias=b, skip=skip2, act=act)
    return out.reshape(N, OH, OW, OC)


@functools.partial(jax.jit, static_argnames=("stride", "padding", "act"))
def _conv2d_jit(x, w, b, skip, *, stride, padding, act):
    return _conv2d_impl(x, w, b, skip, stride=stride, padding=padding, act=act)


def conv2d(x, w, b=None, *, stride=1, padding=0, skip=None, act="none"):
    return _conv2d_jit(x, w, b, skip, stride=stride, padding=padding, act=act)


@functools.partial(jax.jit, static_argnames=("stride", "padding", "act"))
def _conv_transpose2d_jit(x, w, b, *, stride, padding, act):
    """x: (N, H, W, C); w: (IC, OC, KH, KW) (torch ConvTranspose2d, out_pad=0)."""
    N, H, W, C = x.shape
    IC, OC, KH, KW = w.shape
    if stride > 1:
        # TODO(synk): use the 4-sub-conv (subpixel) decomposition to skip the
        # ~75% zero MACs introduced by the dilated input.
        Hd, Wd = (H - 1) * stride + 1, (W - 1) * stride + 1
        xd = jnp.zeros((N, Hd, Wd, C), x.dtype).at[:, ::stride, ::stride, :].set(x)
    else:
        xd = x
    w_eq = jnp.transpose(jnp.flip(w, axis=(2, 3)), (1, 0, 2, 3))   # (OC, IC, KH, KW)
    return _conv2d_impl(xd, w_eq, b, None,
                        stride=1, padding=KH - 1 - padding, act=act)


def conv_transpose2d(x, w, b=None, *, stride=1, padding=0, act="none"):
    return _conv_transpose2d_jit(x, w, b, stride=stride, padding=padding, act=act)


# ----------------------------------------------------------------------------
# Parameter init (deterministic, synthetic, torch layouts)
# ----------------------------------------------------------------------------
class KeyGen:
    def __init__(self, key):
        self.key = key

    def __call__(self):
        self.key, sub = jax.random.split(self.key)
        return sub


def _p(kg, shape, scale=0.05):
    return scale * jax.random.normal(kg(), shape, jnp.float32)


def init_generator(kg):
    return {
        "c1_w": _p(kg, (64, 3, 7, 7)), "c1_b": _p(kg, (64,)),
        "c2_w": _p(kg, (128, 64, 3, 3)), "c2_b": _p(kg, (128,)),
        "c3_w": _p(kg, (256, 128, 3, 3)), "c3_b": _p(kg, (256,)),
        "blocks": [
            {"t_w": _p(kg, (256, 256, 3, 3)),   # ConvTranspose2d(256,256,3,1,1,bias=False)
             "c_w": _p(kg, (256, 256, 3, 3))}   # Conv2d(256,256,3,1,1,bias=False)
            for _ in range(9)
        ],
        "u1_w": _p(kg, (256, 128, 3, 3)), "u1_b": _p(kg, (128,)),
        "u2_w": _p(kg, (128, 64, 3, 3)), "u2_b": _p(kg, (64,)),
        "c4_w": _p(kg, (3, 64, 7, 7)), "c4_b": _p(kg, (3,)),
    }


def init_discriminator(kg):
    shapes = [(64, 3, 4, 4), (128, 64, 4, 4), (256, 128, 4, 4),
              (512, 256, 4, 4), (512, 512, 4, 4), (1, 512, 8, 8)]
    return [{"w": _p(kg, s), "b": _p(kg, (s[0],))} for s in shapes]


# ----------------------------------------------------------------------------
# Model forward passes (NHWC internally)
# ----------------------------------------------------------------------------
def generator_forward(p, x, inverted):
    h = conv2d(x, p["c1_w"], p["c1_b"], stride=1, padding=3)
    h = instance_norm_leaky(h)
    h = conv2d(h, p["c2_w"], p["c2_b"], stride=2, padding=0)
    h = instance_norm_leaky(h)
    h = conv2d(h, p["c3_w"], p["c3_b"], stride=2, padding=0)
    h = instance_norm_leaky(h)
    for blk in p["blocks"]:
        if inverted:  # InvResBlock: block(LeakyReLU(5)(x)) + LeakyReLU(5)(x)
            z = leaky_relu(h, slope=5.0)
            t = conv_transpose2d(z, blk["t_w"], None, stride=1, padding=1)
            h = conv2d(t, blk["c_w"], None, stride=1, padding=1, skip=z, act="none")
        else:         # ResBlock: LeakyReLU(0.2)(block(x) + x)
            t = conv_transpose2d(h, blk["t_w"], None, stride=1, padding=1)
            h = conv2d(t, blk["c_w"], None, stride=1, padding=1, skip=h, act="leaky")
    h = conv_transpose2d(h, p["u1_w"], p["u1_b"], stride=2, padding=0)
    h = instance_norm_leaky(h)
    h = conv_transpose2d(h, p["u2_w"], p["u2_b"], stride=2, padding=0)
    h = instance_norm_leaky(h)
    return conv2d(h, p["c4_w"], p["c4_b"], stride=1, padding=3, act="tanh")


def discriminator_forward(p, x):
    strides = [2, 2, 2, 1, 1, 1]
    h = x
    for li, (layer, s) in enumerate(zip(p, strides)):
        last = li == len(p) - 1
        h = conv2d(h, layer["w"], layer["b"], stride=s, padding=0,
                   act="sigmoid" if last else "none")
        if not last:
            h = instance_norm_leaky(h)
    return h


def transformer_forward(params, x_a, x_b):
    """x_a, x_b in NCHW (PyTorch convention); internally NHWC."""
    xa = jnp.transpose(x_a, (0, 2, 3, 1))
    xb = jnp.transpose(x_b, (0, 2, 3, 1))
    y_a = generator_forward(params["genA"], xb, inverted=True)
    y_b = generator_forward(params["genB"], xa, inverted=False)
    a = discriminator_forward(params["discA"], xa)
    b = discriminator_forward(params["discA"], y_a)
    c = discriminator_forward(params["discB"], xb)
    d = discriminator_forward(params["discB"], y_b)
    e = generator_forward(params["genA"], y_b, inverted=True)
    f = generator_forward(params["genB"], y_a, inverted=False)

    def nchw(t):
        return jnp.transpose(t, (0, 3, 1, 2))

    return (nchw(a), nchw(b), nchw(c), nchw(d), nchw(e), nchw(f))


# ----------------------------------------------------------------------------
if __name__ == "__main__":
    root = jax.random.PRNGKey(0)
    kparam, kdata = jax.random.split(root)
    kg = KeyGen(kparam)
    params = {
        "genA": init_generator(kg),
        "genB": init_generator(kg),
        "discA": init_discriminator(kg),
        "discB": init_discriminator(kg),
    }
    k1, k2 = jax.random.split(kdata)
    # 128 is the smallest spatial size the unpadded discriminator stack admits
    # for both the real inputs and the 127x127 generator outputs; the channel
    # widths / layer counts are fixed by the architecture.
    x_a = jax.random.normal(k1, (1, 3, 128, 128), jnp.float32)
    x_b = jax.random.normal(k2, (1, 3, 128, 128), jnp.float32)

    outs = transformer_forward(params, x_a, x_b)
    outs = jax.block_until_ready(outs)

    # sanity: (a, b, c, d) are (1,1,1,1) sigmoid maps, (e, f) are (1,3,127,127) tanh images
    assert outs[0].shape == (1, 1, 1, 1) and outs[3].shape == (1, 1, 1, 1)
    assert outs[4].shape == (1, 3, 127, 127) and outs[5].shape == (1, 3, 127, 127)
    print("KERNEL_OK")
</pallas_src>

<mosaic_0001>
module attributes {stable_mosaic.version = 11 : i64} {
  func.func @kernel(%arg0: i32, %arg1: i32, %arg2: i32, %arg3: memref<2048x256xbf16, #tpu.memory_space<vmem>>, %arg4: memref<256x64xbf16, #tpu.memory_space<vmem>>, %arg5: memref<1x64xf32, #tpu.memory_space<vmem>>, %arg6: memref<2048x64xf32, #tpu.memory_space<vmem>>, %arg7: memref<2048x64xf32, #tpu.memory_space<vmem>>) attributes {dimension_semantics = [#tpu.dimension_semantics<parallel>, #tpu.dimension_semantics<parallel>, #tpu.dimension_semantics<arbitrary>], iteration_bounds = array<i64: 8, 1, 1>, scalar_prefetch = 0 : i64, scratch_operands = 1 : i64, tpu.core_type = #tpu.core_type<tc>, window_params = [{transform_indices = @transform_0, window_bounds = array<i64: 2048, 256>}, {transform_indices = @transform_1, window_bounds = array<i64: 256, 64>}, {transform_indices = @transform_2, window_bounds = array<i64: 1, 64>}, {transform_indices = @transform_3, window_bounds = array<i64: 2048, 64>}]} {
    %c0_i32 = arith.constant 0 : i32
    %0 = arith.cmpi eq, %arg2, %c0_i32 : i32
    %1 = arith.extui %0 : i1 to i32
    %c0_i32_0 = arith.constant 0 : i32
    %2 = arith.cmpi ne, %1, %c0_i32_0 : i32
    scf.if %2 {
      %cst_10 = arith.constant 0.000000e+00 : f32
      %12 = vector.broadcast %cst_10 : f32 to vector<2048x64xf32>
      %c0_11 = arith.constant 0 : index
      %c0_12 = arith.constant 0 : index
      %13 = vector.load %arg7[%c0_11, %c0_12] : memref<2048x64xf32, #tpu.memory_space<vmem>>, vector<2048x64xf32>
      tpu.vector_store %arg7[%c0_11, %c0_12], %12 {strides = array<i32>} : memref<2048x64xf32, #tpu.memory_space<vmem>>, vector<2048x64xf32>,
    } else {
    }
    %c0 = arith.constant 0 : index
    %c0_1 = arith.constant 0 : index
    %3 = vector.load %arg7[%c0, %c0_1] : memref<2048x64xf32, #tpu.memory_space<vmem>>, vector<2048x64xf32>
    %c0_2 = arith.constant 0 : index
    %c0_3 = arith.constant 0 : index
    %4 = vector.load %arg3[%c0_2, %c0_3] : memref<2048x256xbf16, #tpu.memory_space<vmem>>, vector<2048x256xbf16>
    %c0_4 = arith.constant 0 : index
    %c0_5 = arith.constant 0 : index
    %5 = vector.load %arg4[%c0_4, %c0_5] : memref<256x64xbf16, #tpu.memory_space<vmem>>, vector<256x64xbf16>
    %cst = arith.constant dense<0.000000e+00> : vector<2048x64xf32>
    %6 = tpu.matmul %4, %5, %cst {dimension_numbers = #tpu.dot_dimension_numbers<[1], [0], [0], [1], [0, 0, 1, 1], [], []>} : vector<2048x256xbf16>, vector<256x64xbf16>, vector<2048x64xf32> -> vector<2048x64xf32>
    %7 = arith.addf %3, %6 : vector<2048x64xf32>
    %c0_6 = arith.constant 0 : index
    %c0_7 = arith.constant 0 : index
    %8 = vector.load %arg7[%c0_6, %c0_7] : memref<2048x64xf32, #tpu.memory_space<vmem>>, vector<2048x64xf32>
    tpu.vector_store %arg7[%c0_6, %c0_7], %7 {strides = array<i32>} : memref<2048x64xf32, #tpu.memory_space<vmem>>, vector<2048x64xf32>,
    %c0_i32_8 = arith.constant 0 : i32
    %9 = arith.cmpi eq, %arg2, %c0_i32_8 : i32
    %10 = arith.extui %9 : i1 to i32
    %c0_i32_9 = arith.constant 0 : i32
    %11 = arith.cmpi ne, %10, %c0_i32_9 : i32
    scf.if %11 {
      %c0_10 = arith.constant 0 : index
      %c0_11 = arith.constant 0 : index
      %12 = vector.load %arg7[%c0_10, %c0_11] : memref<2048x64xf32, #tpu.memory_space<vmem>>, vector<2048x64xf32>
      %c0_12 = arith.constant 0 : index
      %c0_13 = arith.constant 0 : index
      %13 = vector.load %arg5[%c0_12, %c0_13] : memref<1x64xf32, #tpu.memory_space<vmem>>, vector<1x64xf32>
      %14 = vector.broadcast %13 : vector<1x64xf32> to vector<2048x64xf32>
      %15 = arith.addf %12, %14 : vector<2048x64xf32>
      %c0_14 = arith.constant 0 : index
      %c0_15 = arith.constant 0 : index
      %16 = vector.load %arg6[%c0_14, %c0_15] : memref<2048x64xf32, #tpu.memory_space<vmem>>, vector<2048x64xf32>
      tpu.vector_store %arg6[%c0_14, %c0_15], %15 {strides = array<i32>} : memref<2048x64xf32, #tpu.memory_space<vmem>>, vector<2048x64xf32>,
    } else {
    }
    return
  }
  func.func @transform_0(%arg0: i32, %arg1: i32, %arg2: i32) -> (i32, i32) {
    %c0_i32 = arith.constant 0 : i32
    return %arg0, %arg2 : i32, i32
  }
  func.func @transform_1(%arg0: i32, %arg1: i32, %arg2: i32) -> (i32, i32) {
    %c0_i32 = arith.constant 0 : i32
    return %arg2, %arg1 : i32, i32
  }
  func.func @transform_2(%arg0: i32, %arg1: i32, %arg2: i32) -> (i32, i32) {
    %c0_i32 = arith.constant 0 : i32
    %c0_i32_0 = arith.constant 0 : i32
    return %c0_i32, %arg1 : i32, i32
  }
  func.func @transform_3(%arg0: i32, %arg1: i32, %arg2: i32) -> (i32, i32) {
    %c0_i32 = arith.constant 0 : i32
    return %arg0, %arg1 : i32, i32
  }
}

</mosaic_0001>

<bundles_post_ra>
// kernel: _conv2d_jit.1
= control target key start
LH: loop header
LB: loop body
LE: loop exit
PB: predicated region body
PF: predicated region fallthrough
CT: control target
= control target key end

     0   :  { %s5707_s12 = smov 0   ;;  %s5709_s13 = smov 0   ;;  %s7654_s0 = inlined_call_operand.vmem [shape: bf16[16384,256], index: 0, kind: input, shape index: {}]   ;;  %s7655_s1 = inlined_call_operand.vmem [shape: bf16[256,64], index: 1, kind: input, shape index: {}]   ;;  %s7656_s2 = inlined_call_operand.vmem [shape: f32[1,64], index: 2, kind: input, shape index: {}]   ;;  %s7657_s3 = inlined_call_operand.vmem [shape: f32[16384,64], index: 3, kind: output, shape index: {}]  }
   0x1   :  { %s5711_s14 = smov 0  }
   0x2 LB: > { %s32_s15 = sadd.s32 1, %s5679_s13  ;;  %p4917_p0 = scmp.ge.s32.totalorder %s5683_s14, 1  ;;  %s5683_s14 = sphi %s5711_s14, %s13_s14   ;;  %s5679_s13 = sphi %s5709_s13, %s7659_s13   ;;  %s5675_s12 = sphi %s5707_s12, %s7658_s12  }
   0x3   : > { %p34_p1 = scmp.ge.s32.totalorder %s32_s15, 8  ;;  %p191_p2 = scmp.lt.s32.totalorder %s5683_s14, 9 }
   0x5   : > { %s7661_s15 = smov (%p34_p1, %s32_s15), 0  ;;  %p192_p3 = pnand %p4917_p0, %p191_p2 }
   0x6   : > { %v5257_v0 = vld [vmem:[%s7655_s1] sm:$0xff] (!%p192_p3)   ;;  %v5685_v1 = vmov (!%p192_p3), 0   ;;  %s4918_s18 = sshll.u32 (!%p192_p3), %s5675_s12, 8  ;;  %v5258_v2 = vld [vmem:[%s7655_s1 + $0x8] sm:$0xff] (!%p192_p3)   ;;  %v5259_v3 = vld [vmem:[%s7655_s1 + $0x10] sm:$0xff] (!%p192_p3)   ;;  %vm272_vm0 = vcmask (!%p192_p3), 523264  }
   0x7   : > { %195 = sbr.rel (%p192_p3) target bundleno = 803 (0x323), region = 32  ;;  %2449 = vmatprep.subr.bf16.mxu0 (!%p192_p3), %v5685_v1  ;;  %5199 = vmatprep.subr.bf16.mxu1 (!%p192_p3), %v5685_v1  ;;  %p236_p4 = scmp.lt.s32.totalorder (!%p192_p3), %s4918_s18, 2047  ;;  %v5260_v4 = vld [vmem:[%s7655_s1 + $0x18] sm:$0xff] (!%p192_p3)   ;;  %v5261_v5 = vld [vmem:[%s7655_s1 + $0x20] sm:$0xff] (!%p192_p3)   ;;  %v5262_v7 = vld [vmem:[%s7655_s1 + $0x28] sm:$0xff] (!%p192_p3)   ;;  %v5686_v61 = vmov (!%p192_p3), 0.0  }
   0x8   : > { %2450 = vmatpush1.bf16.msra.mxu0 (!%p192_p3), %v5257_v0  ;;  %5215 = vmatpush1.bf16.msra.mxu1 (!%p192_p3), %v5257_v0  ;;  %v5263_v9 = vld [vmem:[%s7655_s1 + $0x30] sm:$0xff] (!%p192_p3)   ;;  %v5264_v10 = vld [vmem:[%s7655_s1 + $0x38] sm:$0xff] (!%p192_p3)   ;;  %v5265_v11 = vld [vmem:[%s7655_s1 + $0x40] sm:$0xff] (!%p192_p3)   ;;  %273 = vst.msk [vmem:[#allocation2] sm:$0xff] (!%p192_p3), %vm272_vm0, %v5686_v61 }
   0x9   : > { %2451 = vmatprep.subr.bf16.mxu0 (!%p192_p3), %v5685_v1  ;;  %5200 = vmatprep.subr.bf16.mxu1 (!%p192_p3), %v5685_v1  ;;  %v5266_v12 = vld [vmem:[%s7655_s1 + $0x48] sm:$0xff] (!%p192_p3)   ;;  %v5267_v13 = vld [vmem:[%s7655_s1 + $0x50] sm:$0xff] (!%p192_p3)   ;;  %v5268_v14 = vld [vmem:[%s7655_s1 + $0x58] sm:$0xff] (!%p192_p3)   ;;  %274 = vst.msk [vmem:[#allocation2 + $0x8] sm:$0xff] (!%p192_p3), %vm272_vm0, %v5686_v61 }
   0xa   : > { %v5269_v15 = vld [vmem:[%s7655_s1 + $0x60] sm:$0xff] (!%p192_p3)   ;;  %v5270_v16 = vld [vmem:[%s7655_s1 + $0x68] sm:$0xff] (!%p192_p3)   ;;  %v5271_v17 = vld [vmem:[%s7655_s1 + $0x70] sm:$0xff] (!%p192_p3)   ;;  %275 = vst.msk [vmem:[#allocation2 + $0x10] sm:$0xff] (!%p192_p3), %vm272_vm0, %v5686_v61 }
   0xb   : > { %v5272_v18 = vld [vmem:[%s7655_s1 + $0x78] sm:$0xff] (!%p192_p3)   ;;  %276 = vst.msk [vmem:[#allocation2 + $0x18] sm:$0xff] (!%p192_p3), %vm272_vm0, %v5686_v61  ;;  %277 = vst.msk [vmem:[#allocation2 + $0x20] sm:$0xff] (!%p192_p3), %vm272_vm0, %v5686_v61 }
   0xc   : > { %2452 = vmatpush1.bf16.msra.mxu0 (!%p192_p3), %v5258_v2  ;;  %5216 = vmatpush1.bf16.msra.mxu1 (!%p192_p3), %v5258_v2  ;;  %278 = vst.msk [vmem:[#allocation2 + $0x28] sm:$0xff] (!%p192_p3), %vm272_vm0, %v5686_v61  ;;  %279 = vst.msk [vmem:[#allocation2 + $0x30] sm:$0xff] (!%p192_p3), %vm272_vm0, %v5686_v61 }
   0xd   : > { %2453 = vmatprep.subr.bf16.mxu0 (!%p192_p3), %v5685_v1  ;;  %5201 = vmatprep.subr.bf16.mxu1 (!%p192_p3), %v5685_v1  ;;  %280 = vst.msk [vmem:[#allocation2 + $0x38] sm:$0xff] (!%p192_p3), %vm272_vm0, %v5686_v61  ;;  %281 = vst.msk [vmem:[#allocation2 + $0x40] sm:$0xff] (!%p192_p3), %vm272_vm0, %v5686_v61 }
   0xe   : > { %s7663_s18 = smov (!%p236_p4, %s4918_s18), 2047  ;;  %282 = vst.msk [vmem:[#allocation2 + $0x48] sm:$0xff] %vm272_vm0, %v5686_v61  ;;  %283 = vst.msk [vmem:[#allocation2 + $0x50] sm:$0xff] %vm272_vm0, %v5686_v61 }
   0xf   : > { %s5198_s25 = sshll.u32 %s7663_s18, 3  ;;  %284 = vst.msk [vmem:[#allocation2 + $0x58] sm:$0xff] %vm272_vm0, %v5686_v61  ;;  %285 = vst.msk [vmem:[#allocation2 + $0x60] sm:$0xff] %vm272_vm0, %v5686_v61 }
  0x10   : > { %2454 = vmatpush1.bf16.msra.mxu0 %v5259_v3  ;;  %5217 = vmatpush1.bf16.msra.mxu1 %v5259_v3  ;;  %s5756_s30 = scalar_lea.vmem %s7654_s0, %s5198_s25  ;;  %286 = vst.msk [vmem:[#allocation2 + $0x68] sm:$0xff] %vm272_vm0, %v5686_v61  ;;  %287 = vst.msk [vmem:[#allocation2 + $0x70] sm:$0xff] %vm272_vm0, %v5686_v61  ;;  %s6464_s9 = scalar_lea.vmem %s7657_s3, %s5198_s25 }
  0x11   : > { %2455 = vmatprep.subr.bf16.mxu0 %v5685_v1  ;;  %5202 = vmatprep.subr.bf16.mxu1 %v5685_v1  ;;  %v5275_v6 = vld [vmem:[%s5756_s30 + $0x4] ss:$8 sps:$4 sm:$0xff]   ;;  %v5273_v19 = vld [vmem:[%s5756_s30] ss:$8 sps:$4 sm:$0xff]   ;;  %v5279_v21 = vld [vmem:[%s5756_s30 + $0x14] ss:$8 sps:$4 sm:$0xff]  }
  0x12   : > { %v5278_v8 = vld [vmem:[%s5756_s30 + $0x404] ss:$8 sps:$4 sm:$0xff]   ;;  %2481 = vmatprep.mubr.bf16.mxu0 %v5275_v6  ;;  %v5276_v20 = vld [vmem:[%s5756_s30 + $0x400] ss:$8 sps:$4 sm:$0xff]   ;;  %v5281_v22 = vld [vmem:[%s5756_s30 + $0x414] ss:$8 sps:$4 sm:$0xff]  }
  0x13   : > { %2993 = vmatprep.mubr.bf16.mxu1 %v5278_v8  ;;  %v5283_v23 = vld [vmem:[%s5756_s30 + $0x10] ss:$8 sps:$4 sm:$0xff]   ;;  %v5285_v25 = vld [vmem:[%s5756_s30 + $0x24] ss:$8 sps:$4 sm:$0xff]   ;;  %v5289_v27 = vld [vmem:[%s5756_s30 + $0x20] ss:$8 sps:$4 sm:$0xff]  }
  0x14   : > { %2456 = vmatpush1.bf16.msra.mxu0 %v5260_v4  ;;  %5218 = vmatpush1.bf16.msra.mxu1 %v5260_v4  ;;  %v5284_v24 = vld [vmem:[%s5756_s30 + $0x410] ss:$8 sps:$4 sm:$0xff]   ;;  %v5287_v26 = vld [vmem:[%s5756_s30 + $0x424] ss:$8 sps:$4 sm:$0xff]   ;;  %v5290_v28 = vld [vmem:[%s5756_s30 + $0x420] ss:$8 sps:$4 sm:$0xff]  }
  0x15   : > { %2457 = vmatprep.subr.bf16.mxu0 %v5685_v1  ;;  %5203 = vmatprep.subr.bf16.mxu1 %v5685_v1  ;;  %v5291_v29 = vld [vmem:[%s5756_s30 + $0x34] ss:$8 sps:$4 sm:$0xff]   ;;  %v5295_v31 = vld [vmem:[%s5756_s30 + $0x30] ss:$8 sps:$4 sm:$0xff]   ;;  %v5297_v33 = vld [vmem:[%s5756_s30 + $0x44] ss:$8 sps:$4 sm:$0xff]  }
  0x16   : > { %v5293_v30 = vld [vmem:[%s5756_s30 + $0x434] ss:$8 sps:$4 sm:$0xff]   ;;  %v5296_v32 = vld [vmem:[%s5756_s30 + $0x430] ss:$8 sps:$4 sm:$0xff]   ;;  %v5299_v34 = vld [vmem:[%s5756_s30 + $0x444] ss:$8 sps:$4 sm:$0xff]  }
  0x17   : > { %v5301_v35 = vld [vmem:[%s5756_s30 + $0x40] ss:$8 sps:$4 sm:$0xff]   ;;  %v5303_v37 = vld [vmem:[%s5756_s30 + $0x54] ss:$8 sps:$4 sm:$0xff]   ;;  %v5307_v39 = vld [vmem:[%s5756_s30 + $0x50] ss:$8 sps:$4 sm:$0xff]  }
  0x18   : > { %2458 = vmatpush1.bf16.msra.mxu0 %v5261_v5  ;;  %5219 = vmatpush1.bf16.msra.mxu1 %v5261_v5  ;;  %v5302_v36 = vld [vmem:[%s5756_s30 + $0x440] ss:$8 sps:$4 sm:$0xff]   ;;  %v5305_v38 = vld [vmem:[%s5756_s30 + $0x454] ss:$8 sps:$4 sm:$0xff]   ;;  %v5308_v40 = vld [vmem:[%s5756_s30 + $0x450] ss:$8 sps:$4 sm:$0xff]  }
  0x19   : > { %2459 = vmatprep.subr.bf16.mxu0 %v5685_v1  ;;  %5204 = vmatprep.subr.bf16.mxu1 %v5685_v1  ;;  %v5309_v41 = vld [vmem:[%s5756_s30 + $0x64] ss:$8 sps:$4 sm:$0xff]   ;;  %v5313_v43 = vld [vmem:[%s5756_s30 + $0x60] ss:$8 sps:$4 sm:$0xff]   ;;  %v5315_v45 = vld [vmem:[%s5756_s30 + $0x74] ss:$8 sps:$4 sm:$0xff]  }
  0x1a   : > { %v5311_v42 = vld [vmem:[%s5756_s30 + $0x464] ss:$8 sps:$4 sm:$0xff]   ;;  %v5314_v44 = vld [vmem:[%s5756_s30 + $0x460] ss:$8 sps:$4 sm:$0xff]   ;;  %v5317_v46 = vld [vmem:[%s5756_s30 + $0x474] ss:$8 sps:$4 sm:$0xff]  }
  0x1b   : > { %v5319_v47 = vld [vmem:[%s5756_s30 + $0x70] ss:$8 sps:$4 sm:$0xff]   ;;  %v5321_v49 = vld [vmem:[%s5756_s30 + $0x84] ss:$8 sps:$4 sm:$0xff]   ;;  %v5325_v51 = vld [vmem:[%s5756_s30 + $0x80] ss:$8 sps:$4 sm:$0xff]  }
  0x1c   : > { %2460 = vmatpush1.bf16.msra.mxu0 %v5262_v7  ;;  %5220 = vmatpush1.bf16.msra.mxu1 %v5262_v7  ;;  %v5320_v48 = vld [vmem:[%s5756_s30 + $0x470] ss:$8 sps:$4 sm:$0xff]   ;;  %v5323_v50 = vld [vmem:[%s5756_s30 + $0x484] ss:$8 sps:$4 sm:$0xff]   ;;  %v5326_v52 = vld [vmem:[%s5756_s30 + $0x480] ss:$8 sps:$4 sm:$0xff]  }
  0x1d   : > { %2461 = vmatprep.subr.bf16.mxu0 %v5685_v1  ;;  %5205 = vmatprep.subr.bf16.mxu1 %v5685_v1  ;;  %v5327_v53 = vld [vmem:[%s5756_s30 + $0x94] ss:$8 sps:$4 sm:$0xff]   ;;  %v5331_v55 = vld [vmem:[%s5756_s30 + $0x90] ss:$8 sps:$4 sm:$0xff]   ;;  %v5333_v57 = vld [vmem:[%s5756_s30 + $0xa4] ss:$8 sps:$4 sm:$0xff]  }
  0x1e   : > { %v5329_v54 = vld [vmem:[%s5756_s30 + $0x494] ss:$8 sps:$4 sm:$0xff]   ;;  %v5332_v56 = vld [vmem:[%s5756_s30 + $0x490] ss:$8 sps:$4 sm:$0xff]   ;;  %v5335_v58 = vld [vmem:[%s5756_s30 + $0x4a4] ss:$8 sps:$4 sm:$0xff]  }
  0x1f   : > { %v5858_v59 = vld [vmem:[%s5756_s30 + $0xa0] ss:$8 sps:$4 sm:$0xff]   ;;  %288 = vst.msk [vmem:[#allocation2 + $0x78] sm:$0xff] %vm272_vm0, %v5686_v61  ;;  %289 = vst.msk [vmem:[#allocation2 + $0x80] sm:$0xff] %vm272_vm0, %v5686_v61  ;;  %v5339_v62 = vld [vmem:[%s5756_s30 + $0xb4] ss:$8 sps:$4 sm:$0xff]  }
  0x20   : > { %2462 = vmatpush1.bf16.msra.mxu0 %v5263_v9  ;;  %5221 = vmatpush1.bf16.msra.mxu1 %v5263_v9  ;;  %v5861_v60 = vld [vmem:[%s5756_s30 + $0x4a0] ss:$8 sps:$4 sm:$0xff]   ;;  %290 = vst.msk [vmem:[#allocation2 + $0x88] sm:$0xff] %vm272_vm0, %v5686_v61  ;;  %291 = vst.msk [vmem:[#allocation2 + $0x90] sm:$0xff] %vm272_vm0, %v5686_v61  ;;  %v5341_v63 = vld [vmem:[%s5756_s30 + $0x4b4] ss:$8 sps:$4 sm:$0xff]  }
  0x21   : > { %2463 = vmatprep.subr.bf16.mxu0 %v5685_v1  ;;  %5206 = vmatprep.subr.bf16.mxu1 %v5685_v1  ;;  %292 = vst.msk [vmem:[#allocation2 + $0x98] sm:$0xff] %vm272_vm0, %v5686_v61  ;;  %293 = vst.msk [vmem:[#allocation2 + $0xa0] sm:$0xff] %vm272_vm0, %v5686_v61  ;;  %v5343_v0 = vld [vmem:[%s5756_s30 + $0xb0] ss:$8 sps:$4 sm:$0xff]   ;;  %v5345_v2 = vld [vmem:[%s5756_s30 + $0xc4] ss:$8 sps:$4 sm:$0xff]  }
  0x22   : > { %294 = vst.msk [vmem:[#allocation2 + $0xa8] sm:$0xff] %vm272_vm0, %v5686_v61  ;;  %295 = vst.msk [vmem:[#allocation2 + $0xb0] sm:$0xff] %vm272_vm0, %v5686_v61  ;;  %v5347_v3 = vld [vmem:[%s5756_s30 + $0x4c4] ss:$8 sps:$4 sm:$0xff]   ;;  %v5349_v4 = vld [vmem:[%s5756_s30 + $0xc0] ss:$8 sps:$4 sm:$0xff]  }
  0x23   : > { %296 = vst.msk [vmem:[#allocation2 + $0xb8] sm:$0xff] %vm272_vm0, %v5686_v61  ;;  %297 = vst.msk [vmem:[#allocation2 + $0xc0] sm:$0xff] %vm272_vm0, %v5686_v61  ;;  %v5350_v5 = vld [vmem:[%s5756_s30 + $0x4c0] ss:$8 sps:$4 sm:$0xff]   ;;  %v5351_v6 = vld [vmem:[%s5756_s30 + $0xd4] ss:$8 sps:$4 sm:$0xff]  }
  0x24   : > { %2464 = vmatpush1.bf16.msra.mxu0 %v5264_v10  ;;  %5222 = vmatpush1.bf16.msra.mxu1 %v5264_v10  ;;  %298 = vst.msk [vmem:[#allocation2 + $0xc8] sm:$0xff] %vm272_vm0, %v5686_v61  ;;  %299 = vst.msk [vmem:[#allocation2 + $0xd0] sm:$0xff] %vm272_vm0, %v5686_v61  ;;  %v5353_v7 = vld [vmem:[%s5756_s30 + $0x4d4] ss:$8 sps:$4 sm:$0xff]   ;;  %v5355_v8 = vld [vmem:[%s5756_s30 + $0xd0] ss:$8 sps:$4 sm:$0xff]  }
  0x25   : > { %2465 = vmatprep.subr.bf16.mxu0 %v5685_v1  ;;  %5207 = vmatprep.subr.bf16.mxu1 %v5685_v1  ;;  %300 = vst.msk [vmem:[#allocation2 + $0xd8] sm:$0xff] %vm272_vm0, %v5686_v61  ;;  %301 = vst.msk [vmem:[#allocation2 + $0xe0] sm:$0xff] %vm272_vm0, %v5686_v61  ;;  %v5356_v9 = vld [vmem:[%s5756_s30 + $0x4d0] ss:$8 sps:$4 sm:$0xff]   ;;  %v5357_v10 = vld [vmem:[%s5756_s30 + $0xe4] ss:$8 sps:$4 sm:$0xff]  }
  0x26   : > { %302 = vst.msk [vmem:[#allocation2 + $0xe8] sm:$0xff] %vm272_vm0, %v5686_v61  ;;  %303 = vst.msk [vmem:[#allocation2 + $0xf0] sm:$0xff] %vm272_vm0, %v5686_v61 }
  0x27   : > { %304 = vst.msk [vmem:[#allocation2 + $0xf8] sm:$0xff] %vm272_vm0, %v5686_v61  ;;  %305 = vst.msk [vmem:[#allocation2 + $0x100] sm:$0xff] %vm272_vm0, %v5686_v61 }
  0x28   : > { %2466 = vmatpush1.bf16.msra.mxu0 %v5265_v11  ;;  %5223 = vmatpush1.bf16.msra.mxu1 %v5265_v11  ;;  %306 = vst.msk [vmem:[#allocation2 + $0x108] sm:$0xff] %vm272_vm0, %v5686_v61  ;;  %307 = vst.msk [vmem:[#allocation2 + $0x110] sm:$0xff] %vm272_vm0, %v5686_v61  ;;  %v5359_v11 = vld [vmem:[%s5756_s30 + $0x4e4] ss:$8 sps:$4 sm:$0xff]  }
  0x29   : > { %2467 = vmatprep.subr.bf16.mxu0 %v5685_v1  ;;  %5208 = vmatprep.subr.bf16.mxu1 %v5685_v1  ;;  %308 = vst.msk [vmem:[#allocation2 + $0x118] sm:$0xff] %vm272_vm0, %v5686_v61  ;;  %309 = vst.msk [vmem:[#allocation2 + $0x120] sm:$0xff] %vm272_vm0, %v5686_v61 }
  0x2a   : > { %310 = vst.msk [vmem:[#allocation2 + $0x128] sm:$0xff] %vm272_vm0, %v5686_v61  ;;  %311 = vst.msk [vmem:[#allocation2 + $0x130] sm:$0xff] %vm272_vm0, %v5686_v61 }
  0x2b   : > { %312 = vst.msk [vmem:[#allocation2 + $0x138] sm:$0xff] %vm272_vm0, %v5686_v61  ;;  %313 = vst.msk [vmem:[#allocation2 + $0x140] sm:$0xff] %vm272_vm0, %v5686_v61 }
  0x2c   : > { %2468 = vmatpush1.bf16.msra.mxu0 %v5266_v12  ;;  %5224 = vmatpush1.bf16.msra.mxu1 %v5266_v12  ;;  %314 = vst.msk [vmem:[#allocation2 + $0x148] sm:$0xff] %vm272_vm0, %v5686_v61  ;;  %315 = vst.msk [vmem:[#allocation2 + $0x150] sm:$0xff] %vm272_vm0, %v5686_v61  ;;  %v5361_v12 = vld [vmem:[%s5756_s30 + $0xe0] ss:$8 sps:$4 sm:$0xff]  }
  0x2d   : > { %2469 = vmatprep.subr.bf16.mxu0 %v5685_v1  ;;  %5209 = vmatprep.subr.bf16.mxu1 %v5685_v1  ;;  %316 = vst.msk [vmem:[#allocation2 + $0x158] sm:$0xff] %vm272_vm0, %v5686_v61  ;;  %317 = vst.msk [vmem:[#allocation2 + $0x160] sm:$0xff] %vm272_vm0, %v5686_v61 }
  0x2e   : > { %318 = vst.msk [vmem:[#allocation2 + $0x168] sm:$0xff] %vm272_vm0, %v5686_v61  ;;  %319 = vst.msk [vmem:[#allocation2 + $0x170] sm:$0xff] %vm272_vm0, %v5686_v61 }
  0x2f   : > { %320 = vst.msk [vmem:[#allocation2 + $0x178] sm:$0xff] %vm272_vm0, %v5686_v61  ;;  %321 = vst.msk [vmem:[#allocation2 + $0x180] sm:$0xff] %vm272_vm0, %v5686_v61 }
  0x30   : > { %2470 = vmatpush1.bf16.msra.mxu0 %v5267_v13  ;;  %5225 = vmatpush1.bf16.msra.mxu1 %v5267_v13  ;;  %322 = vst.msk [vmem:[#allocation2 + $0x188] sm:$0xff] %vm272_vm0, %v5686_v61  ;;  %323 = vst.msk [vmem:[#allocation2 + $0x190] sm:$0xff] %vm272_vm0, %v5686_v61  ;;  %v5362_v13 = vld [vmem:[%s5756_s30 + $0x4e0] ss:$8 sps:$4 sm:$0xff]  }
  0x31   : > { %2471 = vmatprep.subr.bf16.mxu0 %v5685_v1  ;;  %5210 = vmatprep.subr.bf16.mxu1 %v5685_v1  ;;  %324 = vst.msk [vmem:[#allocation2 + $0x198] sm:$0xff] %vm272_vm0, %v5686_v61  ;;  %325 = vst.msk [vmem:[#allocation2 + $0x1a0] sm:$0xff] %vm272_vm0, %v5686_v61 }
  0x32   : > { %326 = vst.msk [vmem:[#allocation2 + $0x1a8] sm:$0xff] %vm272_vm0, %v5686_v61  ;;  %327 = vst.msk [vmem:[#allocation2 + $0x1b0] sm:$0xff] %vm272_vm0, %v5686_v61 }
  0x33   : > { %328 = vst.msk [vmem:[#allocation2 + $0x1b8] sm:$0xff] %vm272_vm0, %v5686_v61  ;;  %329 = vst.msk [vmem:[#allocation2 + $0x1c0] sm:$0xff] %vm272_vm0, %v5686_v61 }
  0x34   : > { %2472 = vmatpush1.bf16.msra.mxu0 %v5268_v14  ;;  %5226 = vmatpush1.bf16.msra.mxu1 %v5268_v14  ;;  %330 = vst.msk [vmem:[#allocation2 + $0x1c8] sm:$0xff] %vm272_vm0, %v5686_v61  ;;  %331 = vst.msk [vmem:[#allocation2 + $0x1d0] sm:$0xff] %vm272_vm0, %v5686_v61  ;;  %v5363_v14 = vld [vmem:[%s5756_s30 + $0xf4] ss:$8 sps:$4 sm:$0xff]  }
  0x35   : > { %2473 = vmatprep.subr.bf16.mxu0 %v5685_v1  ;;  %5211 = vmatprep.subr.bf16.mxu1 %v5685_v1  ;;  %332 = vst.msk [vmem:[#allocation2 + $0x1d8] sm:$0xff] %vm272_vm0, %v5686_v61  ;;  %333 = vst.msk [vmem:[#allocation2 + $0x1e0] sm:$0xff] %vm272_vm0, %v5686_v61 }
  0x36   : > { %334 = vst.msk [vmem:[#allocation2 + $0x1e8] sm:$0xff] %vm272_vm0, %v5686_v61  ;;  %335 = vst.msk [vmem:[#allocation2 + $0x1f0] sm:$0xff] %vm272_vm0, %v5686_v61 }
  0x37   : > { %336 = vst.msk [vmem:[#allocation2 + $0x1f8] sm:$0xff] %vm272_vm0, %v5686_v61  ;;  %337 = vst.msk [vmem:[#allocation2 + $0x200] sm:$0xff] %vm272_vm0, %v5686_v61 }
  0x38   : > { %2474 = vmatpush1.bf16.msra.mxu0 %v5269_v15  ;;  %5227 = vmatpush1.bf16.msra.mxu1 %v5269_v15  ;;  %338 = vst.msk [vmem:[#allocation2 + $0x208] sm:$0xff] %vm272_vm0, %v5686_v61  ;;  %339 = vst.msk [vmem:[#allocation2 + $0x210] sm:$0xff] %vm272_vm0, %v5686_v61  ;;  %v5365_v15 = vld [vmem:[%s5756_s30 + $0x4f4] ss:$8 sps:$4 sm:$0xff]  }
  0x39   : > { %2475 = vmatprep.subr.bf16.mxu0 %v5685_v1  ;;  %5212 = vmatprep.subr.bf16.mxu1 %v5685_v1  ;;  %340 = vst.msk [vmem:[#allocation2 + $0x218] sm:$0xff] %vm272_vm0, %v5686_v61  ;;  %341 = vst.msk [vmem:[#allocation2 + $0x220] sm:$0xff] %vm272_vm0, %v5686_v61 }
  0x3a   : > { %342 = vst.msk [vmem:[#allocation2 + $0x228] sm:$0xff] %vm272_vm0, %v5686_v61  ;;  %343 = vst.msk [vmem:[#allocation2 + $0x230] sm:$0xff] %vm272_vm0, %v5686_v61 }
  0x3b   : > { %344 = vst.msk [vmem:[#allocation2 + $0x238] sm:$0xff] %vm272_vm0, %v5686_v61  ;;  %345 = vst.msk [vmem:[#allocation2 + $0x240] sm:$0xff] %vm272_vm0, %v5686_v61 }
  0x3c   : > { %2476 = vmatpush1.bf16.msra.mxu0 %v5270_v16  ;;  %5228 = vmatpush1.bf16.msra.mxu1 %v5270_v16  ;;  %346 = vst.msk [vmem:[#allocation2 + $0x248] sm:$0xff] %vm272_vm0, %v5686_v61  ;;  %347 = vst.msk [vmem:[#allocation2 + $0x250] sm:$0xff] %vm272_vm0, %v5686_v61  ;;  %v5367_v16 = vld [vmem:[%s5756_s30 + $0xf0] ss:$8 sps:$4 sm:$0xff]  }
  0x3d   : > { %2477 = vmatprep.subr.bf16.mxu0 %v5685_v1  ;;  %5213 = vmatprep.subr.bf16.mxu1 %v5685_v1  ;;  %348 = vst.msk [vmem:[#allocation2 + $0x258] sm:$0xff] %vm272_vm0, %v5686_v61  ;;  %349 = vst.msk [vmem:[#allocation2 + $0x260] sm:$0xff] %vm272_vm0, %v5686_v61 }
  0x3e   : > { %350 = vst.msk [vmem:[#allocation2 + $0x268] sm:$0xff] %vm272_vm0, %v5686_v61  ;;  %351 = vst.msk [vmem:[#allocation2 + $0x270] sm:$0xff] %vm272_vm0, %v5686_v61 }
  0x3f   : > { %352 = vst.msk [vmem:[#allocation2 + $0x278] sm:$0xff] %vm272_vm0, %v5686_v61  ;;  %353 = vst.msk [vmem:[#allocation2 + $0x280] sm:$0xff] %vm272_vm0, %v5686_v61 }
  0x40   : > { %2478 = vmatpush1.bf16.msra.mxu0 %v5271_v17  ;;  %5229 = vmatpush1.bf16.msra.mxu1 %v5271_v17  ;;  %354 = vst.msk [vmem:[#allocation2 + $0x288] sm:$0xff] %vm272_vm0, %v5686_v61  ;;  %355 = vst.msk [vmem:[#allocation2 + $0x290] sm:$0xff] %vm272_vm0, %v5686_v61  ;;  %v5368_v17 = vld [vmem:[%s5756_s30 + $0x4f0] ss:$8 sps:$4 sm:$0xff]  }
  0x41   : > { %2479 = vmatprep.subr.bf16.mxu0 %v5685_v1  ;;  %5214 = vmatprep.subr.bf16.mxu1 %v5685_v1  ;;  %356 = vst.msk [vmem:[#allocation2 + $0x298] sm:$0xff] %vm272_vm0, %v5686_v61  ;;  %357 = vst.msk [vmem:[#allocation2 + $0x2a0] sm:$0xff] %vm272_vm0, %v5686_v61  ;;  %v5344_v1 = vld [vmem:[%s5756_s30 + $0x4b0] ss:$8 sps:$4 sm:$0xff]  }
  0x42   : > { %358 = vst.msk [vmem:[#allocation2 + $0x2a8] sm:$0xff] %vm272_vm0, %v5686_v61  ;;  %359 = vst.msk [vmem:[#allocation2 + $0x2b0] sm:$0xff] %vm272_vm0, %v5686_v61 }
  0x43   : > { %360 = vst.msk [vmem:[#allocation2 + $0x2b8] sm:$0xff] %vm272_vm0, %v5686_v61  ;;  %361 = vst.msk [vmem:[#allocation2 + $0x2c0] sm:$0xff] %vm272_vm0, %v5686_v61 }
  0x44   : > { %2480 = vmatpush1.bf16.msra.mxu0 %v5272_v18  ;;  %5230 = vmatpush1.bf16.msra.mxu1 %v5272_v18  ;;  %362 = vst.msk [vmem:[#allocation2 + $0x2c8] sm:$0xff] %vm272_vm0, %v5686_v61  ;;  %363 = vst.msk [vmem:[#allocation2 + $0x2d0] sm:$0xff] %vm272_vm0, %v5686_v61  ;;  %v5369_v18 = vld [vmem:[%s5756_s30 + $0x104] ss:$8 sps:$4 sm:$0xff]  }
  0x45   : > { %364 = vst.msk [vmem:[#allocation2 + $0x2d8] sm:$0xff] %vm272_vm0, %v5686_v61  ;;  %365 = vst.msk [vmem:[#allocation2 + $0x2e0] sm:$0xff] %vm272_vm0, %v5686_v61 }
  0x46   : > { %366 = vst.msk [vmem:[#allocation2 + $0x2e8] sm:$0xff] %vm272_vm0, %v5686_v61  ;;  %367 = vst.msk [vmem:[#allocation2 + $0x2f0] sm:$0xff] %vm272_vm0, %v5686_v61 }
  0x47   : > { %2482 = vmatmul.mubr.bf16.vlgmr.msra.gmra.mrb[0].mxu0 %v5273_v19  ;;  %2994 = vmatmul.mubr.bf16.vlgmr.msra.gmra.mrb[0].mxu1 %v5276_v20  ;;  %368 = vst.msk [vmem:[#allocation2 + $0x2f8] sm:$0xff] %vm272_vm0, %v5686_v61  ;;  %369 = vst.msk [vmem:[#allocation2 + $0x300] sm:$0xff] %vm272_vm0, %v5686_v61  ;;  %v5371_v19 = vld [vmem:[%s5756_s30 + $0x504] ss:$8 sps:$4 sm:$0xff]   ;;  %v5373_v20 = vld [vmem:[%s5756_s30 + $0x100] ss:$8 sps:$4 sm:$0xff]  }
  0x48   : > { %2489 = vmatprep.mubr.bf16.mxu0 %v5279_v21  ;;  %3001 = vmatprep.mubr.bf16.mxu1 %v5281_v22  ;;  %370 = vst.msk [vmem:[#allocation2 + $0x308] sm:$0xff] %vm272_vm0, %v5686_v61  ;;  %371 = vst.msk [vmem:[#allocation2 + $0x310] sm:$0xff] %vm272_vm0, %v5686_v61  ;;  %v5374_v21 = vld [vmem:[%s5756_s30 + $0x500] ss:$8 sps:$4 sm:$0xff]   ;;  %v5375_v22 = vld [vmem:[%s5756_s30 + $0x114] ss:$8 sps:$4 sm:$0xff]  }
  0x49   : > { %372 = vst.msk [vmem:[#allocation2 + $0x318] sm:$0xff] %vm272_vm0, %v5686_v61  ;;  %373 = vst.msk [vmem:[#allocation2 + $0x320] sm:$0xff] %vm272_vm0, %v5686_v61 }
  0x4a   : > { %374 = vst.msk [vmem:[#allocation2 + $0x328] sm:$0xff] %vm272_vm0, %v5686_v61  ;;  %375 = vst.msk [vmem:[#allocation2 + $0x330] sm:$0xff] %vm272_vm0, %v5686_v61 }
  0x4b   : > { %376 = vst.msk [vmem:[#allocation2 + $0x338] sm:$0xff] %vm272_vm0, %v5686_v61  ;;  %377 = vst.msk [vmem:[#allocation2 + $0x340] sm:$0xff] %vm272_vm0, %v5686_v61 }
  0x4c   : > { %378 = vst.msk [vmem:[#allocation2 + $0x348] sm:$0xff] %vm272_vm0, %v5686_v61  ;;  %379 = vst.msk [vmem:[#allocation2 + $0x350] sm:$0xff] %vm272_vm0, %v5686_v61 }
  0x4d   : > { %380 = vst.msk [vmem:[#allocation2 + $0x358] sm:$0xff] %vm272_vm0, %v5686_v61  ;;  %381 = vst.msk [vmem:[#allocation2 + $0x360] sm:$0xff] %vm272_vm0, %v5686_v61 }
  0x4e   : > { %382 = vst.msk [vmem:[#allocation2 + $0x368] sm:$0xff] %vm272_vm0, %v5686_v61  ;;  %383 = vst.msk [vmem:[#allocation2 + $0x370] sm:$0xff] %vm272_vm0, %v5686_v61 }
  0x4f   : > { %2490 = vmatmul.mubr.bf16.gmra.mrb[4].mxu0 %v5283_v23  ;;  %3002 = vmatmul.mubr.bf16.gmra.mrb[4].mxu1 %v5284_v24  ;;  %384 = vst.msk [vmem:[#allocation2 + $0x378] sm:$0xff] %vm272_vm0, %v5686_v61  ;;  %385 = vst.msk [vmem:[#allocation2 + $0x380] sm:$0xff] %vm272_vm0, %v5686_v61  ;;  %v5377_v23 = vld [vmem:[%s5756_s30 + $0x514] ss:$8 sps:$4 sm:$0xff]   ;;  %v5379_v24 = vld [vmem:[%s5756_s30 + $0x110] ss:$8 sps:$4 sm:$0xff]  }
  0x50   : > { %2497 = vmatprep.mubr.bf16.mxu0 %v5285_v25  ;;  %3009 = vmatprep.mubr.bf16.mxu1 %v5287_v26  ;;  %386 = vst.msk [vmem:[#allocation2 + $0x388] sm:$0xff] %vm272_vm0, %v5686_v61  ;;  %387 = vst.msk [vmem:[#allocation2 + $0x390] sm:$0xff] %vm272_vm0, %v5686_v61  ;;  %v5380_v25 = vld [vmem:[%s5756_s30 + $0x510] ss:$8 sps:$4 sm:$0xff]   ;;  %v5381_v26 = vld [vmem:[%s5756_s30 + $0x124] ss:$8 sps:$4 sm:$0xff]  }
  0x51   : > { %388 = vst.msk [vmem:[#allocation2 + $0x398] sm:$0xff] %vm272_vm0, %v5686_v61  ;;  %389 = vst.msk [vmem:[#allocation2 + $0x3a0] sm:$0xff] %vm272_vm0, %v5686_v61 }
  0x52   : > { %390 = vst.msk [vmem:[#allocation2 + $0x3a8] sm:$0xff] %vm272_vm0, %v5686_v61  ;;  %391 = vst.msk [vmem:[#allocation2 + $0x3b0] sm:$0xff] %vm272_vm0, %v5686_v61 }
  0x53   : > { %392 = vst.msk [vmem:[#allocation2 + $0x3b8] sm:$0xff] %vm272_vm0, %v5686_v61  ;;  %393 = vst.msk [vmem:[#allocation2 + $0x3c0] sm:$0xff] %vm272_vm0, %v5686_v61 }
  0x54   : > { %394 = vst.msk [vmem:[#allocation2 + $0x3c8] sm:$0xff] %vm272_vm0, %v5686_v61  ;;  %395 = vst.msk [vmem:[#allocation2 + $0x3d0] sm:$0xff] %vm272_vm0, %v5686_v61 }
  0x55   : > { %396 = vst.msk [vmem:[#allocation2 + $0x3d8] sm:$0xff] %vm272_vm0, %v5686_v61  ;;  %397 = vst.msk [vmem:[#allocation2 + $0x3e0] sm:$0xff] %vm272_vm0, %v5686_v61 }
  0x56   : > { %398 = vst.msk [vmem:[#allocation2 + $0x3e8] sm:$0xff] %vm272_vm0, %v5686_v61  ;;  %399 = vst.msk [vmem:[#allocation2 + $0x3f0] sm:$0xff] %vm272_vm0, %v5686_v61 }
  0x57   : > { %2498 = vmatmul.mubr.bf16.gmra.mrb[8].mxu0 %v5289_v27  ;;  %3010 = vmatmul.mubr.bf16.gmra.mrb[8].mxu1 %v5290_v28  ;;  %400 = vst.msk [vmem:[#allocation2 + $0x3f8] sm:$0xff] %vm272_vm0, %v5686_v61  ;;  %401 = vst.msk [vmem:[#allocation2 + $0x400] sm:$0xff] %vm272_vm0, %v5686_v61  ;;  %v5383_v27 = vld [vmem:[%s5756_s30 + $0x524] ss:$8 sps:$4 sm:$0xff]   ;;  %v5385_v28 = vld [vmem:[%s5756_s30 + $0x120] ss:$8 sps:$4 sm:$0xff]  }
  0x58   : > { %2505 = vmatprep.mubr.bf16.mxu0 %v5291_v29  ;;  %3017 = vmatprep.mubr.bf16.mxu1 %v5293_v30  ;;  %402 = vst.msk [vmem:[#allocation2 + $0x408] sm:$0xff] %vm272_vm0, %v5686_v61  ;;  %403 = vst.msk [vmem:[#allocation2 + $0x410] sm:$0xff] %vm272_vm0, %v5686_v61  ;;  %v5386_v29 = vld [vmem:[%s5756_s30 + $0x520] ss:$8 sps:$4 sm:$0xff]   ;;  %v5387_v30 = vld [vmem:[%s5756_s30 + $0x134] ss:$8 sps:$4 sm:$0xff]  }
  0x59   : > { %404 = vst.msk [vmem:[#allocation2 + $0x418] sm:$0xff] %vm272_vm0, %v5686_v61  ;;  %405 = vst.msk [vmem:[#allocation2 + $0x420] sm:$0xff] %vm272_vm0, %v5686_v61 }
  0x5a   : > { %406 = vst.msk [vmem:[#allocation2 + $0x428] sm:$0xff] %vm272_vm0, %v5686_v61  ;;  %407 = vst.msk [vmem:[#allocation2 + $0x430] sm:$0xff] %vm272_vm0, %v5686_v61 }
  0x5b   : > { %408 = vst.msk [vmem:[#allocation2 + $0x438] sm:$0xff] %vm272_vm0, %v5686_v61  ;;  %409 = vst.msk [vmem:[#allocation2 + $0x440] sm:$0xff] %vm272_vm0, %v5686_v61 }
  0x5c   : > { %410 = vst.msk [vmem:[#allocation2 + $0x448] sm:$0xff] %vm272_vm0, %v5686_v61  ;;  %411 = vst.msk [vmem:[#allocation2 + $0x450] sm:$0xff] %vm272_vm0, %v5686_v61 }
  0x5d   : > { %412 = vst.msk [vmem:[#allocation2 + $0x458] sm:$0xff] %vm272_vm0, %v5686_v61  ;;  %413 = vst.msk [vmem:[#allocation2 + $0x460] sm:$0xff] %vm272_vm0, %v5686_v61 }
  0x5e   : > { %414 = vst.msk [vmem:[#allocation2 + $0x468] sm:$0xff] %vm272_vm0, %v5686_v61  ;;  %415 = vst.msk [vmem:[#allocation2 + $0x470] sm:$0xff] %vm272_vm0, %v5686_v61 }
  0x5f   : > { %2506 = vmatmul.mubr.bf16.gmra.mrb[12].mxu0 %v5295_v31  ;;  %3018 = vmatmul.mubr.bf16.gmra.mrb[12].mxu1 %v5296_v32  ;;  %416 = vst.msk [vmem:[#allocation2 + $0x478] sm:$0xff] %vm272_vm0, %v5686_v61  ;;  %417 = vst.msk [vmem:[#allocation2 + $0x480] sm:$0xff] %vm272_vm0, %v5686_v61  ;;  %v5389_v31 = vld [vmem:[%s5756_s30 + $0x534] ss:$8 sps:$4 sm:$0xff]   ;;  %v5391_v32 = vld [vmem:[%s5756_s30 + $0x130] ss:$8 sps:$4 sm:$0xff]  }
  0x60   : > { %2513 = vmatprep.mubr.bf16.mxu0 %v5297_v33  ;;  %3025 = vmatprep.mubr.bf16.mxu1 %v5299_v34  ;;  %418 = vst.msk [vmem:[#allocation2 + $0x488] sm:$0xff] %vm272_vm0, %v5686_v61  ;;  %419 = vst.msk [vmem:[#allocation2 + $0x490] sm:$0xff] %vm272_vm0, %v5686_v61  ;;  %v5392_v33 = vld [vmem:[%s5756_s30 + $0x530] ss:$8 sps:$4 sm:$0xff]   ;;  %v5393_v34 = vld [vmem:[%s5756_s30 + $0x144] ss:$8 sps:$4 sm:$0xff]  }
  0x61   : > { %420 = vst.msk [vmem:[#allocation2 + $0x498] sm:$0xff] %vm272_vm0, %v5686_v61  ;;  %421 = vst.msk [vmem:[#allocation2 + $0x4a0] sm:$0xff] %vm272_vm0, %v5686_v61 }
  0x62   : > { %422 = vst.msk [vmem:[#allocation2 + $0x4a8] sm:$0xff] %vm272_vm0, %v5686_v61  ;;  %423 = vst.msk [vmem:[#allocation2 + $0x4b0] sm:$0xff] %vm272_vm0, %v5686_v61 }
  0x63   : > { %424 = vst.msk [vmem:[#allocation2 + $0x4b8] sm:$0xff] %vm272_vm0, %v5686_v61  ;;  %425 = vst.msk [vmem:[#allocation2 + $0x4c0] sm:$0xff] %vm272_vm0, %v5686_v61 }
  0x64   : > { %426 = vst.msk [vmem:[#allocation2 + $0x4c8] sm:$0xff] %vm272_vm0, %v5686_v61  ;;  %427 = vst.msk [vmem:[#allocation2 + $0x4d0] sm:$0xff] %vm272_vm0, %v5686_v61 }
  0x65   : > { %428 = vst.msk [vmem:[#allocation2 + $0x4d8] sm:$0xff] %vm272_vm0, %v5686_v61  ;;  %429 = vst.msk [vmem:[#allocation2 + $0x4e0] sm:$0xff] %vm272_vm0, %v5686_v61 }
  0x66   : > { %430 = vst.msk [vmem:[#allocation2 + $0x4e8] sm:$0xff] %vm272_vm0, %v5686_v61  ;;  %431 = vst.msk [vmem:[#allocation2 + $0x4f0] sm:$0xff] %vm272_vm0, %v5686_v61 }
  0x67   : > { %2514 = vmatmul.mubr.bf16.gmra.mrb[16].mxu0 %v5301_v35  ;;  %3026 = vmatmul.mubr.bf16.gmra.mrb[16].mxu1 %v5302_v36  ;;  %432 = vst.msk [vmem:[#allocation2 + $0x4f8] sm:$0xff] %vm272_vm0, %v5686_v61  ;;  %433 = vst.msk [vmem:[#allocation2 + $0x500] sm:$0xff] %vm272_vm0, %v5686_v61  ;;  %v5395_v35 = vld [vmem:[%s5756_s30 + $0x544] ss:$8 sps:$4 sm:$0xff]   ;;  %v5397_v36 = vld [vmem:[%s5756_s30 + $0x140] ss:$8 sps:$4 sm:$0xff]  }
  0x68   : > { %2521 = vmatprep.mubr.bf16.mxu0 %v5303_v37  ;;  %3033 = vmatprep.mubr.bf16.mxu1 %v5305_v38  ;;  %434 = vst.msk [vmem:[#allocation2 + $0x508] sm:$0xff] %vm272_vm0, %v5686_v61  ;;  %435 = vst.msk [vmem:[#allocation2 + $0x510] sm:$0xff] %vm272_vm0, %v5686_v61  ;;  %v5398_v37 = vld [vmem:[%s5756_s30 + $0x540] ss:$8 sps:$4 sm:$0xff]   ;;  %v5399_v38 = vld [vmem:[%s5756_s30 + $0x154] ss:$8 sps:$4 sm:$0xff]  }
  0x69   : > { %436 = vst.msk [vmem:[#allocation2 + $0x518] sm:$0xff] %vm272_vm0, %v5686_v61  ;;  %437 = vst.msk [vmem:[#allocation2 + $0x520] sm:$0xff] %vm272_vm0, %v5686_v61 }
  0x6a   : > { %438 = vst.msk [vmem:[#allocation2 + $0x528] sm:$0xff] %vm272_vm0, %v5686_v61  ;;  %439 = vst.msk [vmem:[#allocation2 + $0x530] sm:$0xff] %vm272_vm0, %v5686_v61 }
  0x6b   : > { %440 = vst.msk [vmem:[#allocation2 + $0x538] sm:$0xff] %vm272_vm0, %v5686_v61  ;;  %441 = vst.msk [vmem:[#allocation2 + $0x540] sm:$0xff] %vm272_vm0, %v5686_v61 }
  0x6c   : > { %442 = vst.msk [vmem:[#allocation2 + $0x548] sm:$0xff] %vm272_vm0, %v5686_v61  ;;  %443 = vst.msk [vmem:[#allocation2 + $0x550] sm:$0xff] %vm272_vm0, %v5686_v61 }
  0x6d   : > { %444 = vst.msk [vmem:[#allocation2 + $0x558] sm:$0xff] %vm272_vm0, %v5686_v61  ;;  %445 = vst.msk [vmem:[#allocation2 + $0x560] sm:$0xff] %vm272_vm0, %v5686_v61 }
  0x6e   : > { %446 = vst.msk [vmem:[#allocation2 + $0x568] sm:$0xff] %vm272_vm0, %v5686_v61  ;;  %447 = vst.msk [vmem:[#allocation2 + $0x570] sm:$0xff] %vm272_vm0, %v5686_v61 }
  0x6f   : > { %2522 = vmatmul.mubr.bf16.gmra.mrb[20].mxu0 %v5307_v39  ;;  %3034 = vmatmul.mubr.bf16.gmra.mrb[20].mxu1 %v5308_v40  ;;  %448 = vst.msk [vmem:[#allocation2 + $0x578] sm:$0xff] %vm272_vm0, %v5686_v61  ;;  %449 = vst.msk [vmem:[#allocation2 + $0x580] sm:$0xff] %vm272_vm0, %v5686_v61  ;;  %v5401_v39 = vld [vmem:[%s5756_s30 + $0x554] ss:$8 sps:$4 sm:$0xff]   ;;  %v5403_v40 = vld [vmem:[%s5756_s30 + $0x150] ss:$8 sps:$4 sm:$0xff]  }
  0x70   : > { %2529 = vmatprep.mubr.bf16.mxu0 %v5309_v41  ;;  %3041 = vmatprep.mubr.bf16.mxu1 %v5311_v42  ;;  %450 = vst.msk [vmem:[#allocation2 + $0x588] sm:$0xff] %vm272_vm0, %v5686_v61  ;;  %451 = vst.msk [vmem:[#allocation2 + $0x590] sm:$0xff] %vm272_vm0, %v5686_v61  ;;  %v5404_v41 = vld [vmem:[%s5756_s30 + $0x550] ss:$8 sps:$4 sm:$0xff]   ;;  %v5405_v42 = vld [vmem:[%s5756_s30 + $0x164] ss:$8 sps:$4 sm:$0xff]  }
  0x71   : > { %452 = vst.msk [vmem:[#allocation2 + $0x598] sm:$0xff] %vm272_vm0, %v5686_v61  ;;  %453 = vst.msk [vmem:[#allocation2 + $0x5a0] sm:$0xff] %vm272_vm0, %v5686_v61 }
  0x72   : > { %454 = vst.msk [vmem:[#allocation2 + $0x5a8] sm:$0xff] %vm272_vm0, %v5686_v61  ;;  %455 = vst.msk [vmem:[#allocation2 + $0x5b0] sm:$0xff] %vm272_vm0, %v5686_v61 }
  0x73   : > { %456 = vst.msk [vmem:[#allocation2 + $0x5b8] sm:$0xff] %vm272_vm0, %v5686_v61  ;;  %457 = vst.msk [vmem:[#allocation2 + $0x5c0] sm:$0xff] %vm272_vm0, %v5686_v61 }
  0x74   : > { %458 = vst.msk [vmem:[#allocation2 + $0x5c8] sm:$0xff] %vm272_vm0, %v5686_v61  ;;  %459 = vst.msk [vmem:[#allocation2 + $0x5d0] sm:$0xff] %vm272_vm0, %v5686_v61 }
  0x75   : > { %460 = vst.msk [vmem:[#allocation2 + $0x5d8] sm:$0xff] %vm272_vm0, %v5686_v61  ;;  %461 = vst.msk [vmem:[#allocation2 + $0x5e0] sm:$0xff] %vm272_vm0, %v5686_v61 }
  0x76   : > { %462 = vst.msk [vmem:[#allocation2 + $0x5e8] sm:$0xff] %vm272_vm0, %v5686_v61  ;;  %463 = vst.msk [vmem:[#allocation2 + $0x5f0] sm:$0xff] %vm272_vm0, %v5686_v61 }
  0x77   : > { %2530 = vmatmul.mubr.bf16.gmra.mrb[24].mxu0 %v5313_v43  ;;  %3042 = vmatmul.mubr.bf16.gmra.mrb[24].mxu1 %v5314_v44  ;;  %464 = vst.msk [vmem:[#allocation2 + $0x5f8] sm:$0xff] %vm272_vm0, %v5686_v61  ;;  %465 = vst.msk [vmem:[#allocation2 + $0x600] sm:$0xff] %vm272_vm0, %v5686_v61  ;;  %v5407_v43 = vld [vmem:[%s5756_s30 + $0x564] ss:$8 sps:$4 sm:$0xff]   ;;  %v5409_v44 = vld [vmem:[%s5756_s30 + $0x160] ss:$8 sps:$4 sm:$0xff]  }
  0x78   : > { %2537 = vmatprep.mubr.bf16.mxu0 %v5315_v45  ;;  %3049 = vmatprep.mubr.bf16.mxu1 %v5317_v46  ;;  %466 = vst.msk [vmem:[#allocation2 + $0x608] sm:$0xff] %vm272_vm0, %v5686_v61  ;;  %467 = vst.msk [vmem:[#allocation2 + $0x610] sm:$0xff] %vm272_vm0, %v5686_v61  ;;  %v5410_v45 = vld [vmem:[%s5756_s30 + $0x560] ss:$8 sps:$4 sm:$0xff]   ;;  %v5411_v46 = vld [vmem:[%s5756_s30 + $0x174] ss:$8 sps:$4 sm:$0xff]  }
  0x79   : > { %468 = vst.msk [vmem:[#allocation2 + $0x618] sm:$0xff] %vm272_vm0, %v5686_v61  ;;  %469 = vst.msk [vmem:[#allocation2 + $0x620] sm:$0xff] %vm272_vm0, %v5686_v61 }
  0x7a   : > { %470 = vst.msk [vmem:[#allocation2 + $0x628] sm:$0xff] %vm272_vm0, %v5686_v61  ;;  %471 = vst.msk [vmem:[#allocation2 + $0x630] sm:$0xff] %vm272_vm0, %v5686_v61 }
  0x7b   : > { %472 = vst.msk [vmem:[#allocation2 + $0x638] sm:$0xff] %vm272_vm0, %v5686_v61  ;;  %473 = vst.msk [vmem:[#allocation2 + $0x640] sm:$0xff] %vm272_vm0, %v5686_v61 }
  0x7c   : > { %474 = vst.msk [vmem:[#allocation2 + $0x648] sm:$0xff] %vm272_vm0, %v5686_v61  ;;  %475 = vst.msk [vmem:[#allocation2 + $0x650] sm:$0xff] %vm272_vm0, %v5686_v61 }
  0x7d   : > { %476 = vst.msk [vmem:[#allocation2 + $0x658] sm:$0xff] %vm272_vm0, %v5686_v61  ;;  %477 = vst.msk [vmem:[#allocation2 + $0x660] sm:$0xff] %vm272_vm0, %v5686_v61 }
  0x7e   : > { %478 = vst.msk [vmem:[#allocation2 + $0x668] sm:$0xff] %vm272_vm0, %v5686_v61  ;;  %479 = vst.msk [vmem:[#allocation2 + $0x670] sm:$0xff] %vm272_vm0, %v5686_v61 }
  0x7f   : > { %2538 = vmatmul.mubr.bf16.gmra.mrb[28].mxu0 %v5319_v47  ;;  %3050 = vmatmul.mubr.bf16.gmra.mrb[28].mxu1 %v5320_v48  ;;  %480 = vst.msk [vmem:[#allocation2 + $0x678] sm:$0xff] %vm272_vm0, %v5686_v61  ;;  %481 = vst.msk [vmem:[#allocation2 + $0x680] sm:$0xff] %vm272_vm0, %v5686_v61  ;;  %v5413_v47 = vld [vmem:[%s5756_s30 + $0x574] ss:$8 sps:$4 sm:$0xff]   ;;  %v5415_v48 = vld [vmem:[%s5756_s30 + $0x170] ss:$8 sps:$4 sm:$0xff]  }
  0x80   : > { %2545 = vmatprep.mubr.bf16.mxu0 %v5321_v49  ;;  %3057 = vmatprep.mubr.bf16.mxu1 %v5323_v50  ;;  %482 = vst.msk [vmem:[#allocation2 + $0x688] sm:$0xff] %vm272_vm0, %v5686_v61  ;;  %483 = vst.msk [vmem:[#allocation2 + $0x690] sm:$0xff] %vm272_vm0, %v5686_v61  ;;  %v5416_v49 = vld [vmem:[%s5756_s30 + $0x570] ss:$8 sps:$4 sm:$0xff]   ;;  %v5417_v50 = vld [vmem:[%s5756_s30 + $0x184] ss:$8 sps:$4 sm:$0xff]  }
  0x81   : > { %484 = vst.msk [vmem:[#allocation2 + $0x698] sm:$0xff] %vm272_vm0, %v5686_v61  ;;  %485 = vst.msk [vmem:[#allocation2 + $0x6a0] sm:$0xff] %vm272_vm0, %v5686_v61 }
  0x82   : > { %486 = vst.msk [vmem:[#allocation2 + $0x6a8] sm:$0xff] %vm272_vm0, %v5686_v61  ;;  %487 = vst.msk [vmem:[#allocation2 + $0x6b0] sm:$0xff] %vm272_vm0, %v5686_v61 }
  0x83   : > { %488 = vst.msk [vmem:[#allocation2 + $0x6b8] sm:$0xff] %vm272_vm0, %v5686_v61  ;;  %489 = vst.msk [vmem:[#allocation2 + $0x6c0] sm:$0xff] %vm272_vm0, %v5686_v61 }
  0x84   : > { %490 = vst.msk [vmem:[#allocation2 + $0x6c8] sm:$0xff] %vm272_vm0, %v5686_v61  ;;  %491 = vst.msk [vmem:[#allocation2 + $0x6d0] sm:$0xff] %vm272_vm0, %v5686_v61 }
  0x85   : > { %492 = vst.msk [vmem:[#allocation2 + $0x6d8] sm:$0xff] %vm272_vm0, %v5686_v61  ;;  %493 = vst.msk [vmem:[#allocation2 + $0x6e0] sm:$0xff] %vm272_vm0, %v5686_v61 }
  0x86   : > { %494 = vst.msk [vmem:[#allocation2 + $0x6e8] sm:$0xff] %vm272_vm0, %v5686_v61  ;;  %495 = vst.msk [vmem:[#allocation2 + $0x6f0] sm:$0xff] %vm272_vm0, %v5686_v61 }
  0x87   : > { %2546 = vmatmul.mubr.bf16.gmra.mrb[32].mxu0 %v5325_v51  ;;  %3058 = vmatmul.mubr.bf16.gmra.mrb[32].mxu1 %v5326_v52  ;;  %496 = vst.msk [vmem:[#allocation2 + $0x6f8] sm:$0xff] %vm272_vm0, %v5686_v61  ;;  %497 = vst.msk [vmem:[#allocation2 + $0x700] sm:$0xff] %vm272_vm0, %v5686_v61  ;;  %v5419_v51 = vld [vmem:[%s5756_s30 + $0x584] ss:$8 sps:$4 sm:$0xff]   ;;  %v5421_v52 = vld [vmem:[%s5756_s30 + $0x180] ss:$8 sps:$4 sm:$0xff]  }
  0x88   : > { %2553 = vmatprep.mubr.bf16.mxu0 %v5327_v53  ;;  %3065 = vmatprep.mubr.bf16.mxu1 %v5329_v54  ;;  %498 = vst.msk [vmem:[#allocation2 + $0x708] sm:$0xff] %vm272_vm0, %v5686_v61  ;;  %499 = vst.msk [vmem:[#allocation2 + $0x710] sm:$0xff] %vm272_vm0, %v5686_v61  ;;  %v5422_v53 = vld [vmem:[%s5756_s30 + $0x580] ss:$8 sps:$4 sm:$0xff]   ;;  %v5423_v54 = vld [vmem:[%s5756_s30 + $0x194] ss:$8 sps:$4 sm:$0xff]  }
  0x89   : > { %500 = vst.msk [vmem:[#allocation2 + $0x718] sm:$0xff] %vm272_vm0, %v5686_v61  ;;  %501 = vst.msk [vmem:[#allocation2 + $0x720] sm:$0xff] %vm272_vm0, %v5686_v61 }
  0x8a   : > { %502 = vst.msk [vmem:[#allocation2 + $0x728] sm:$0xff] %vm272_vm0, %v5686_v61  ;;  %503 = vst.msk [vmem:[#allocation2 + $0x730] sm:$0xff] %vm272_vm0, %v5686_v61 }
  0x8b   : > { %504 = vst.msk [vmem:[#allocation2 + $0x738] sm:$0xff] %vm272_vm0, %v5686_v61  ;;  %505 = vst.msk [vmem:[#allocation2 + $0x740] sm:$0xff] %vm272_vm0, %v5686_v61 }
  0x8c   : > { %506 = vst.msk [vmem:[#allocation2 + $0x748] sm:$0xff] %vm272_vm0, %v5686_v61  ;;  %507 = vst.msk [vmem:[#allocation2 + $0x750] sm:$0xff] %vm272_vm0, %v5686_v61 }
  0x8d   : > { %508 = vst.msk [vmem:[#allocation2 + $0x758] sm:$0xff] %vm272_vm0, %v5686_v61  ;;  %509 = vst.msk [vmem:[#allocation2 + $0x760] sm:$0xff] %vm272_vm0, %v5686_v61 }
  0x8e   : > { %510 = vst.msk [vmem:[#allocation2 + $0x768] sm:$0xff] %vm272_vm0, %v5686_v61  ;;  %511 = vst.msk [vmem:[#allocation2 + $0x770] sm:$0xff] %vm272_vm0, %v5686_v61 }
  0x8f   : > { %2554 = vmatmul.mubr.bf16.gmra.mrb[36].mxu0 %v5331_v55  ;;  %3066 = vmatmul.mubr.bf16.gmra.mrb[36].mxu1 %v5332_v56  ;;  %512 = vst.msk [vmem:[#allocation2 + $0x778] sm:$0xff] %vm272_vm0, %v5686_v61  ;;  %513 = vst.msk [vmem:[#allocation2 + $0x780] sm:$0xff] %vm272_vm0, %v5686_v61  ;;  %v5425_v55 = vld [vmem:[%s5756_s30 + $0x594] ss:$8 sps:$4 sm:$0xff]   ;;  %v5427_v56 = vld [vmem:[%s5756_s30 + $0x190] ss:$8 sps:$4 sm:$0xff]  }
  0x90   : > { %2561 = vmatprep.mubr.bf16.mxu0 %v5333_v57  ;;  %3073 = vmatprep.mubr.bf16.mxu1 %v5335_v58  ;;  %514 = vst.msk [vmem:[#allocation2 + $0x788] sm:$0xff] %vm272_vm0, %v5686_v61  ;;  %515 = vst.msk [vmem:[#allocation2 + $0x790] sm:$0xff] %vm272_vm0, %v5686_v61  ;;  %v5428_v57 = vld [vmem:[%s5756_s30 + $0x590] ss:$8 sps:$4 sm:$0xff]   ;;  %v5429_v58 = vld [vmem:[%s5756_s30 + $0x1a4] ss:$8 sps:$4 sm:$0xff]  }
  0x91   : > { %516 = vst.msk [vmem:[#allocation2 + $0x798] sm:$0xff] %vm272_vm0, %v5686_v61  ;;  %517 = vst.msk [vmem:[#allocation2 + $0x7a0] sm:$0xff] %vm272_vm0, %v5686_v61 }
  0x92   : > { %518 = vst.msk [vmem:[#allocation2 + $0x7a8] sm:$0xff] %vm272_vm0, %v5686_v61  ;;  %519 = vst.msk [vmem:[#allocation2 + $0x7b0] sm:$0xff] %vm272_vm0, %v5686_v61 }
  0x93   : > { %520 = vst.msk [vmem:[#allocation2 + $0x7b8] sm:$0xff] %vm272_vm0, %v5686_v61  ;;  %521 = vst.msk [vmem:[#allocation2 + $0x7c0] sm:$0xff] %vm272_vm0, %v5686_v61 }
  0x94   : > { %522 = vst.msk [vmem:[#allocation2 + $0x7c8] sm:$0xff] %vm272_vm0, %v5686_v61  ;;  %523 = vst.msk [vmem:[#allocation2 + $0x7d0] sm:$0xff] %vm272_vm0, %v5686_v61 }
  0x95   : > { %524 = vst.msk [vmem:[#allocation2 + $0x7d8] sm:$0xff] %vm272_vm0, %v5686_v61  ;;  %525 = vst.msk [vmem:[#allocation2 + $0x7e0] sm:$0xff] %vm272_vm0, %v5686_v61 }
  0x96   : > { %526 = vst.msk [vmem:[#allocation2 + $0x7e8] sm:$0xff] %vm272_vm0, %v5686_v61  ;;  %527 = vst.msk [vmem:[#allocation2 + $0x7f0] sm:$0xff] %vm272_vm0, %v5686_v61 }
  0x97   : > { %528 = vst.msk [vmem:[#allocation2 + $0x7f8] sm:$0xff] %vm272_vm0, %v5686_v61  ;;  %2562 = vmatmul.mubr.bf16.gmra.mrb[40].mxu0 %v5858_v59  ;;  %3074 = vmatmul.mubr.bf16.gmra.mrb[40].mxu1 %v5861_v60  ;;  %v5431_v59 = vld [vmem:[%s5756_s30 + $0x5a4] ss:$8 sps:$4 sm:$0xff]   ;;  %v5433_v60 = vld [vmem:[%s5756_s30 + $0x1a0] ss:$8 sps:$4 sm:$0xff]  }
  0x98   : > { %2569 = vmatprep.mubr.bf16.mxu0 %v5339_v62  ;;  %3081 = vmatprep.mubr.bf16.mxu1 %v5341_v63  ;;  %v5434_v61 = vld [vmem:[%s5756_s30 + $0x5a0] ss:$8 sps:$4 sm:$0xff]   ;;  %v5435_v62 = vld [vmem:[%s5756_s30 + $0x1b4] ss:$8 sps:$4 sm:$0xff]  }
  0x99   : > { %v5437_v63 = vld [vmem:[%s5756_s30 + $0x5b4] ss:$8 sps:$4 sm:$0xff]  }
  0x9f   : > { %2570 = vmatmul.mubr.bf16.gmra.mrb[44].mxu0 %v5343_v0  ;;  %3082 = vmatmul.mubr.bf16.gmra.mrb[44].mxu1 %v5344_v1  ;;  %v529_v0 = vld [vmem:[#allocation2] sm:$0xff] }
  0xa0   : > { %2577 = vmatprep.mubr.bf16.mxu0 %v5345_v2  ;;  %3089 = vmatprep.mubr.bf16.mxu1 %v5347_v3  ;;  %v657_v1 = vld [vmem:[#allocation2 + $0x400] sm:$0xff] }
  0xa7   : > { %2578 = vmatmul.mubr.bf16.gmra.mrb[48].mxu0 %v5349_v4  ;;  %3090 = vmatmul.mubr.bf16.gmra.mrb[48].mxu1 %v5350_v5  ;;  %v530_v4 = vld [vmem:[#allocation2 + $0x8] sm:$0xff] }
  0xa8   : > { %2585 = vmatprep.mubr.bf16.mxu0 %v5351_v6  ;;  %3097 = vmatprep.mubr.bf16.mxu1 %v5353_v7  ;;  %v658_v5 = vld [vmem:[#allocation2 + $0x408] sm:$0xff] }
  0xaf   : > { %2586 = vmatmul.mubr.bf16.gmra.mrb[52].mxu0 %v5355_v8  ;;  %3098 = vmatmul.mubr.bf16.gmra.mrb[52].mxu1 %v5356_v9 }
  0xb0   : > { %2593 = vmatprep.mubr.bf16.mxu0 %v5357_v10  ;;  %3105 = vmatprep.mubr.bf16.mxu1 %v5359_v11  ;;  %v5439_v10 = vld [vmem:[%s5756_s30 + $0x1b0] ss:$8 sps:$4 sm:$0xff]  }
  0xb1   : > { %v5440_v11 = vld [vmem:[%s5756_s30 + $0x5b0] ss:$8 sps:$4 sm:$0xff]  }
  0xb7   : > { %2594 = vmatmul.mubr.bf16.gmra.mrb[56].mxu0 %v5361_v12  ;;  %3106 = vmatmul.mubr.bf16.gmra.mrb[56].mxu1 %v5362_v13 }
  0xb8   : > { %2601 = vmatprep.mubr.bf16.mxu0 %v5363_v14  ;;  %3113 = vmatprep.mubr.bf16.mxu1 %v5365_v15  ;;  %v5441_v14 = vld [vmem:[%s5756_s30 + $0x1c4] ss:$8 sps:$4 sm:$0xff]  }
  0xb9   : > { %v5443_v15 = vld [vmem:[%s5756_s30 + $0x5c4] ss:$8 sps:$4 sm:$0xff]  }
  0xbf   : > { %2602 = vmatmul.mubr.bf16.gmra.mrb[60].mxu0 %v5367_v16  ;;  %3114 = vmatmul.mubr.bf16.gmra.mrb[60].mxu1 %v5368_v17 }
  0xc0   : > { %2609 = vmatprep.mubr.bf16.mxu0 %v5369_v18  ;;  %3121 = vmatprep.mubr.bf16.mxu1 %v5371_v19 }
  0xc7   : > { %2610 = vmatmul.mubr.bf16.gmra.mrb[64].mxu0 %v5373_v20  ;;  %3122 = vmatmul.mubr.bf16.gmra.mrb[64].mxu1 %v5374_v21  ;;  %v531_v20 = vld [vmem:[#allocation2 + $0x10] sm:$0xff] }
  0xc8   : > { %2617 = vmatprep.mubr.bf16.mxu0 %v5375_v22  ;;  %3129 = vmatprep.mubr.bf16.mxu1 %v5377_v23  ;;  %v659_v21 = vld [vmem:[#allocation2 + $0x410] sm:$0xff]  ;;  %v6454_v22 = vld [vmem:[%s7656_s2] ss:$0 sm:$0xff] }
  0xcf   : > { %2618 = vmatmul.mubr.bf16.gmra.mrb[68].mxu0 %v5379_v24  ;;  %3130 = vmatmul.mubr.bf16.gmra.mrb[68].mxu1 %v5380_v25  ;;  %v532_v25 = vld [vmem:[#allocation2 + $0x18] sm:$0xff] }
  0xd0   : > { %2625 = vmatprep.mubr.bf16.mxu0 %v5381_v26  ;;  %3137 = vmatprep.mubr.bf16.mxu1 %v5383_v27  ;;  %v660_v26 = vld [vmem:[#allocation2 + $0x418] sm:$0xff]  ;;  %v5445_v27 = vld [vmem:[%s5756_s30 + $0x1c0] ss:$8 sps:$4 sm:$0xff]  }
  0xd7   : > { %2626 = vmatmul.mubr.bf16.gmra.mrb[72].mxu0 %v5385_v28  ;;  %3138 = vmatmul.mubr.bf16.gmra.mrb[72].mxu1 %v5386_v29 }
  0xd8   : > { %2633 = vmatprep.mubr.bf16.mxu0 %v5387_v30  ;;  %3145 = vmatprep.mubr.bf16.mxu1 %v5389_v31 }
  0xdf   : > { %2634 = vmatmul.mubr.bf16.gmra.mrb[76].mxu0 %v5391_v32  ;;  %3146 = vmatmul.mubr.bf16.gmra.mrb[76].mxu1 %v5392_v33  ;;  %v5446_v32 = vld [vmem:[%s5756_s30 + $0x5c0] ss:$8 sps:$4 sm:$0xff]   ;;  %v5447_v33 = vld [vmem:[%s5756_s30 + $0x1d4] ss:$8 sps:$4 sm:$0xff]  }
  0xe0   : > { %2641 = vmatprep.mubr.bf16.mxu0 %v5393_v34  ;;  %3153 = vmatprep.mubr.bf16.mxu1 %v5395_v35 }
  0xe7   : > { %2642 = vmatmul.mubr.bf16.gmra.mrb[80].mxu0 %v5397_v36  ;;  %3154 = vmatmul.mubr.bf16.gmra.mrb[80].mxu1 %v5398_v37 }
  0xe8   : > { %2649 = vmatprep.mubr.bf16.mxu0 %v5399_v38  ;;  %3161 = vmatprep.mubr.bf16.mxu1 %v5401_v39  ;;  %v5449_v38 = vld [vmem:[%s5756_s30 + $0x5d4] ss:$8 sps:$4 sm:$0xff]  }
  0xef   : > { %2650 = vmatmul.mubr.bf16.gmra.mrb[84].mxu0 %v5403_v40  ;;  %3162 = vmatmul.mubr.bf16.gmra.mrb[84].mxu1 %v5404_v41 }
  0xf0   : > { %2657 = vmatprep.mubr.bf16.mxu0 %v5405_v42  ;;  %3169 = vmatprep.mubr.bf16.mxu1 %v5407_v43 }
  0xf7   : > { %2658 = vmatmul.mubr.bf16.gmra.mrb[88].mxu0 %v5409_v44  ;;  %3170 = vmatmul.mubr.bf16.gmra.mrb[88].mxu1 %v5410_v45 }
  0xf8   : > { %2665 = vmatprep.mubr.bf16.mxu0 %v5411_v46  ;;  %3177 = vmatprep.mubr.bf16.mxu1 %v5413_v47 }
  0xff   : > { %2666 = vmatmul.mubr.bf16.gmra.mrb[92].mxu0 %v5415_v48  ;;  %3178 = vmatmul.mubr.bf16.gmra.mrb[92].mxu1 %v5416_v49  ;;  %v533_v49 = vld [vmem:[#allocation2 + $0x20] sm:$0xff] }
 0x100   : > { %2673 = vmatprep.mubr.bf16.mxu0 %v5417_v50  ;;  %3185 = vmatprep.mubr.bf16.mxu1 %v5419_v51  ;;  %v661_v50 = vld [vmem:[#allocation2 + $0x420] sm:$0xff] }
 0x107   : > { %2674 = vmatmul.mubr.bf16.gmra.mrb[96].mxu0 %v5421_v52  ;;  %3186 = vmatmul.mubr.bf16.gmra.mrb[96].mxu1 %v5422_v53  ;;  %v534_v53 = vld [vmem:[#allocation2 + $0x28] sm:$0xff] }
 0x108   : > { %2681 = vmatprep.mubr.bf16.mxu0 %v5423_v54  ;;  %3193 = vmatprep.mubr.bf16.mxu1 %v5425_v55  ;;  %v662_v54 = vld [vmem:[#allocation2 + $0x428] sm:$0xff]  ;;  %v5451_v55 = vld [vmem:[%s5756_s30 + $0x1d0] ss:$8 sps:$4 sm:$0xff]  }
 0x10f   : > { %2682 = vmatmul.mubr.bf16.gmra.mrb[100].mxu0 %v5427_v56  ;;  %3194 = vmatmul.mubr.bf16.gmra.mrb[100].mxu1 %v5428_v57 }
 0x110   : > { %2689 = vmatprep.mubr.bf16.mxu0 %v5429_v58  ;;  %3201 = vmatprep.mubr.bf16.mxu1 %v5431_v59 }
 0x117   : > { %2690 = vmatmul.mubr.bf16.gmra.mrb[104].mxu0 %v5433_v60  ;;  %3202 = vmatmul.mubr.bf16.gmra.mrb[104].mxu1 %v5434_v61  ;;  %v5452_v60 = vld [vmem:[%s5756_s30 + $0x5d0] ss:$8 sps:$4 sm:$0xff]   ;;  %v5453_v61 = vld [vmem:[%s5756_s30 + $0x1e4] ss:$8 sps:$4 sm:$0xff]  }
 0x118   : > { %2697 = vmatprep.mubr.bf16.mxu0 %v5435_v62  ;;  %3209 = vmatprep.mubr.bf16.mxu1 %v5437_v63 }
 0x11a   : > { %v2483_v2 = vpop.f32.mrb[0].mxu0  ;;  %v2995_v3 = vpop.f32.mrb[0].mxu1 }
 0x11b   : > { %v3506_v6 = vadd.f32 %v2483_v2, %v529_v0  ;;  %v3634_v7 = vadd.f32 %v2995_v3, %v657_v1  ;;  %v2485_v8 = vpop.f32.mrb[1].mxu0  ;;  %v2997_v9 = vpop.f32.mrb[1].mxu1  ;;  %v5455_v2 = vld [vmem:[%s5756_s30 + $0x5e4] ss:$8 sps:$4 sm:$0xff]  }
 0x11c   : > { %v2486_v12 = vpop.f32.mrb[2].mxu0  ;;  %v2998_v13 = vpop.f32.mrb[2].mxu1 }
 0x11d   : > { %3763 = vst.msk [vmem:[#allocation2] sm:$0xff] %vm272_vm0, %v3506_v6  ;;  %3891 = vst.msk [vmem:[#allocation2 + $0x400] sm:$0xff] %vm272_vm0, %v3634_v7  ;;  %v3507_v16 = vadd.f32 %v2486_v12, %v530_v4  ;;  %v3635_v17 = vadd.f32 %v2998_v13, %v658_v5  ;;  %v2488_v18 = vpop.f32.mrb[3].mxu0  ;;  %v3000_v19 = vpop.f32.mrb[3].mxu1  ;;  %v535_v13 = vld [vmem:[#allocation2 + $0x30] sm:$0xff] }
 0x11e   : > { %v664_v18 = vld [vmem:[#allocation2 + $0x438] sm:$0xff]  ;;  %v5457_v19 = vld [vmem:[%s5756_s30 + $0x1e0] ss:$8 sps:$4 sm:$0xff]  }
 0x11f   : > { %3764 = vst.msk [vmem:[#allocation2 + $0x8] sm:$0xff] %vm272_vm0, %v3507_v16  ;;  %3892 = vst.msk [vmem:[#allocation2 + $0x408] sm:$0xff] %vm272_vm0, %v3635_v17  ;;  %2698 = vmatmul.mubr.bf16.gmra.mrb[108].mxu0 %v5439_v10  ;;  %3210 = vmatmul.mubr.bf16.gmra.mrb[108].mxu1 %v5440_v11  ;;  %v536_v17 = vld [vmem:[#allocation2 + $0x38] sm:$0xff] }
 0x120   : > { %2705 = vmatprep.mubr.bf16.mxu0 %v5441_v14  ;;  %3217 = vmatprep.mubr.bf16.mxu1 %v5443_v15  ;;  %v663_v14 = vld [vmem:[#allocation2 + $0x430] sm:$0xff] }
 0x122   : > { %v2491_v23 = vpop.f32.mrb[4].mxu0  ;;  %v3003_v24 = vpop.f32.mrb[4].mxu1 }
 0x123   : > { %v3508_v28 = vadd.f32 %v2491_v23, %v531_v20  ;;  %v3636_v29 = vadd.f32 %v3003_v24, %v659_v21  ;;  %v2493_v30 = vpop.f32.mrb[5].mxu0  ;;  %v3005_v31 = vpop.f32.mrb[5].mxu1 }
 0x124   : > { %v4022_v34 = vld [vmem:[#allocation2] sm:$0xff]  ;;  %v2494_v36 = vpop.f32.mrb[6].mxu0  ;;  %v3006_v37 = vpop.f32.mrb[6].mxu1  ;;  %v5461_v31 = vld [vmem:[%s5756_s30 + $0x5f4] ss:$8 sps:$4 sm:$0xff]  }
 0x125   : > { %v4150_v35 = vld [vmem:[#allocation2 + $0x400] sm:$0xff]  ;;  %v4285_v39 = vadd.f32 %v6454_v22, %v4022_v34  ;;  %3765 = vst.msk [vmem:[#allocation2 + $0x10] sm:$0xff] %vm272_vm0, %v3508_v28  ;;  %3893 = vst.msk [vmem:[#allocation2 + $0x410] sm:$0xff] %vm272_vm0, %v3636_v29  ;;  %v3509_v41 = vadd.f32 %v2494_v36, %v532_v25  ;;  %v3637_v42 = vadd.f32 %v3006_v37, %v660_v26  ;;  %v2496_v43 = vpop.f32.mrb[7].mxu0  ;;  %v3008_v44 = vpop.f32.mrb[7].mxu1 }
 0x126   : > { %v4413_v40 = vadd.f32 %v6454_v22, %v4150_v35  ;;  %v4023_v45 = vld [vmem:[#allocation2 + $0x8] sm:$0xff]  ;;  %v5459_v26 = vld [vmem:[%s5756_s30 + $0x1f4] ss:$8 sps:$4 sm:$0xff]   ;;  %v665_v43 = vld [vmem:[#allocation2 + $0x440] sm:$0xff] }
 0x127   : > { %v4151_v46 = vld [vmem:[#allocation2 + $0x408] sm:$0xff]  ;;  %4541 = vst.msk [vmem:[%s6464_s9] sm:$0xff] %vm272_vm0, %v4285_v39  ;;  %v4286_v47 = vadd.f32 %v6454_v22, %v4023_v45  ;;  %3766 = vst.msk [vmem:[#allocation2 + $0x18] sm:$0xff] %vm272_vm0, %v3509_v41  ;;  %2706 = vmatmul.mubr.bf16.gmra.mrb[112].mxu0 %v5445_v27  ;;  %3218 = vmatmul.mubr.bf16.gmra.mrb[112].mxu1 %v5446_v32 }
 0x128   : > { %4669 = vst.msk [vmem:[%s6464_s9 + $0x400] sm:$0xff] %vm272_vm0, %v4413_v40  ;;  %v4414_v48 = vadd.f32 %v6454_v22, %v4151_v46  ;;  %3894 = vst.msk [vmem:[#allocation2 + $0x418] sm:$0xff] %vm272_vm0, %v3637_v42  ;;  %2713 = vmatprep.mubr.bf16.mxu0 %v5447_v33  ;;  %3225 = vmatprep.mubr.bf16.mxu1 %v5449_v38  ;;  %v5458_v25 = vld [vmem:[%s5756_s30 + $0x5e0] ss:$8 sps:$4 sm:$0xff]  }
 0x129   : > { %4542 = vst.msk [vmem:[%s6464_s9 + $0x8] sm:$0xff] %vm272_vm0, %v4286_v47  ;;  %v537_v42 = vld [vmem:[#allocation2 + $0x40] sm:$0xff]  ;;  %v538_v46 = vld [vmem:[#allocation2 + $0x48] sm:$0xff] }
 0x12a   : > { %4670 = vst.msk [vmem:[%s6464_s9 + $0x408] sm:$0xff] %vm272_vm0, %v4414_v48  ;;  %v2499_v51 = vpop.f32.mrb[8].mxu0  ;;  %v3011_v52 = vpop.f32.mrb[8].mxu1  ;;  %v666_v47 = vld [vmem:[#allocation2 + $0x448] sm:$0xff]  ;;  %v5463_v48 = vld [vmem:[%s5756_s30 + $0x1f0] ss:$8 sps:$4 sm:$0xff]  }
 0x12b   : > { %v3510_v56 = vadd.f32 %v2499_v51, %v533_v49  ;;  %v3638_v57 = vadd.f32 %v3011_v52, %v661_v50  ;;  %v2501_v58 = vpop.f32.mrb[9].mxu0  ;;  %v3013_v59 = vpop.f32.mrb[9].mxu1 }
 0x12c   : > { %v4024_v62 = vld [vmem:[#allocation2 + $0x10] sm:$0xff]  ;;  %v2502_v0 = vpop.f32.mrb[10].mxu0  ;;  %v3014_v1 = vpop.f32.mrb[10].mxu1  ;;  %v5467_v59 = vld [vmem:[%s5756_s30 + $0x604] ss:$8 sps:$4 sm:$0xff]  }
 0x12d   : > { %v4152_v63 = vld [vmem:[#allocation2 + $0x410] sm:$0xff]  ;;  %v4287_v3 = vadd.f32 %v6454_v22, %v4024_v62  ;;  %3767 = vst.msk [vmem:[#allocation2 + $0x20] sm:$0xff] %vm272_vm0, %v3510_v56  ;;  %3895 = vst.msk [vmem:[#allocation2 + $0x420] sm:$0xff] %vm272_vm0, %v3638_v57  ;;  %v3511_v5 = vadd.f32 %v2502_v0, %v534_v53  ;;  %v3639_v6 = vadd.f32 %v3014_v1, %v662_v54  ;;  %v2504_v7 = vpop.f32.mrb[11].mxu0  ;;  %v3016_v8 = vpop.f32.mrb[11].mxu1 }
 0x12e   : > { %v4415_v4 = vadd.f32 %v6454_v22, %v4152_v63  ;;  %v4025_v9 = vld [vmem:[#allocation2 + $0x18] sm:$0xff]  ;;  %v5465_v54 = vld [vmem:[%s5756_s30 + $0x204] ss:$8 sps:$4 sm:$0xff]   ;;  %v667_v7 = vld [vmem:[#allocation2 + $0x450] sm:$0xff] }
 0x12f   : > { %v4153_v10 = vld [vmem:[#allocation2 + $0x418] sm:$0xff]  ;;  %4543 = vst.msk [vmem:[%s6464_s9 + $0x10] sm:$0xff] %vm272_vm0, %v4287_v3  ;;  %v4288_v11 = vadd.f32 %v6454_v22, %v4025_v9  ;;  %3768 = vst.msk [vmem:[#allocation2 + $0x28] sm:$0xff] %vm272_vm0, %v3511_v5  ;;  %2714 = vmatmul.mubr.bf16.gmra.mrb[116].mxu0 %v5451_v55  ;;  %3226 = vmatmul.mubr.bf16.gmra.mrb[116].mxu1 %v5452_v60 }
 0x130   : > { %4671 = vst.msk [vmem:[%s6464_s9 + $0x410] sm:$0xff] %vm272_vm0, %v4415_v4  ;;  %v4416_v12 = vadd.f32 %v6454_v22, %v4153_v10  ;;  %3896 = vst.msk [vmem:[#allocation2 + $0x428] sm:$0xff] %vm272_vm0, %v3639_v6  ;;  %2721 = vmatprep.mubr.bf16.mxu0 %v5453_v61  ;;  %3233 = vmatprep.mubr.bf16.mxu1 %v5455_v2  ;;  %v5464_v53 = vld [vmem:[%s5756_s30 + $0x5f0] ss:$8 sps:$4 sm:$0xff]  }
 0x131   : > { %4544 = vst.msk [vmem:[%s6464_s9 + $0x18] sm:$0xff] %vm272_vm0, %v4288_v11  ;;  %v539_v6 = vld [vmem:[#allocation2 + $0x50] sm:$0xff]  ;;  %v540_v10 = vld [vmem:[#allocation2 + $0x58] sm:$0xff] }
 0x132   : > { %4672 = vst.msk [vmem:[%s6464_s9 + $0x418] sm:$0xff] %vm272_vm0, %v4416_v12  ;;  %v2507_v15 = vpop.f32.mrb[12].mxu0  ;;  %v3019_v16 = vpop.f32.mrb[12].mxu1  ;;  %v668_v11 = vld [vmem:[#allocation2 + $0x458] sm:$0xff]  ;;  %v5469_v12 = vld [vmem:[%s5756_s30 + $0x200] ss:$8 sps:$4 sm:$0xff]  }
 0x133   : > { %v3512_v20 = vadd.f32 %v2507_v15, %v535_v13  ;;  %v3640_v21 = vadd.f32 %v3019_v16, %v663_v14  ;;  %v2509_v23 = vpop.f32.mrb[13].mxu0  ;;  %v3021_v24 = vpop.f32.mrb[13].mxu1 }
 0x134   : > { %v4026_v27 = vld [vmem:[#allocation2 + $0x20] sm:$0xff]  ;;  %v2510_v29 = vpop.f32.mrb[14].mxu0  ;;  %v3022_v30 = vpop.f32.mrb[14].mxu1  ;;  %v5473_v24 = vld [vmem:[%s5756_s30 + $0x614] ss:$8 sps:$4 sm:$0xff]  }
 0x135   : > { %v4154_v28 = vld [vmem:[#allocation2 + $0x420] sm:$0xff]  ;;  %v4289_v32 = vadd.f32 %v6454_v22, %v4026_v27  ;;  %3769 = vst.msk [vmem:[#allocation2 + $0x30] sm:$0xff] %vm272_vm0, %v3512_v20  ;;  %3897 = vst.msk [vmem:[#allocation2 + $0x430] sm:$0xff] %vm272_vm0, %v3640_v21  ;;  %v3513_v34 = vadd.f32 %v2510_v29, %v536_v17  ;;  %v3641_v35 = vadd.f32 %v3022_v30, %v664_v18  ;;  %v2512_v36 = vpop.f32.mrb[15].mxu0  ;;  %v3024_v37 = vpop.f32.mrb[15].mxu1 }
 0x136   : > { %v4417_v33 = vadd.f32 %v6454_v22, %v4154_v28  ;;  %v4027_v38 = vld [vmem:[#allocation2 + $0x28] sm:$0xff]  ;;  %v5471_v18 = vld [vmem:[%s5756_s30 + $0x214] ss:$8 sps:$4 sm:$0xff]   ;;  %v669_v36 = vld [vmem:[#allocation2 + $0x460] sm:$0xff] }
 0x137   : > { %v4155_v39 = vld [vmem:[#allocation2 + $0x428] sm:$0xff]  ;;  %4545 = vst.msk [vmem:[%s6464_s9 + $0x20] sm:$0xff] %vm272_vm0, %v4289_v32  ;;  %v4290_v40 = vadd.f32 %v6454_v22, %v4027_v38  ;;  %3770 = vst.msk [vmem:[#allocation2 + $0x38] sm:$0xff] %vm272_vm0, %v3513_v34  ;;  %2722 = vmatmul.mubr.bf16.gmra.mrb[120].mxu0 %v5457_v19  ;;  %3234 = vmatmul.mubr.bf16.gmra.mrb[120].mxu1 %v5458_v25 }
 0x138   : > { %4673 = vst.msk [vmem:[%s6464_s9 + $0x420] sm:$0xff] %vm272_vm0, %v4417_v33  ;;  %v4418_v41 = vadd.f32 %v6454_v22, %v4155_v39  ;;  %3898 = vst.msk [vmem:[#allocation2 + $0x438] sm:$0xff] %vm272_vm0, %v3641_v35  ;;  %2729 = vmatprep.mubr.bf16.mxu0 %v5459_v26  ;;  %3241 = vmatprep.mubr.bf16.mxu1 %v5461_v31  ;;  %v5470_v17 = vld [vmem:[%s5756_s30 + $0x600] ss:$8 sps:$4 sm:$0xff]  }
 0x139   : > { %4546 = vst.msk [vmem:[%s6464_s9 + $0x28] sm:$0xff] %vm272_vm0, %v4290_v40  ;;  %v541_v35 = vld [vmem:[#allocation2 + $0x60] sm:$0xff]  ;;  %v542_v39 = vld [vmem:[#allocation2 + $0x68] sm:$0xff] }
 0x13a   : > { %4674 = vst.msk [vmem:[%s6464_s9 + $0x428] sm:$0xff] %vm272_vm0, %v4418_v41  ;;  %v2515_v44 = vpop.f32.mrb[16].mxu0  ;;  %v3027_v45 = vpop.f32.mrb[16].mxu1  ;;  %v670_v40 = vld [vmem:[#allocation2 + $0x468] sm:$0xff]  ;;  %v5475_v41 = vld [vmem:[%s5756_s30 + $0x210] ss:$8 sps:$4 sm:$0xff]  }
 0x13b   : > { %v3514_v49 = vadd.f32 %v2515_v44, %v537_v42  ;;  %v3642_v50 = vadd.f32 %v3027_v45, %v665_v43  ;;  %v2517_v51 = vpop.f32.mrb[17].mxu0  ;;  %v3029_v52 = vpop.f32.mrb[17].mxu1 }
 0x13c   : > { %v4028_v55 = vld [vmem:[#allocation2 + $0x30] sm:$0xff]  ;;  %v2518_v57 = vpop.f32.mrb[18].mxu0  ;;  %v3030_v58 = vpop.f32.mrb[18].mxu1  ;;  %v5479_v52 = vld [vmem:[%s5756_s30 + $0x624] ss:$8 sps:$4 sm:$0xff]  }
 0x13d   : > { %v4156_v56 = vld [vmem:[#allocation2 + $0x430] sm:$0xff]  ;;  %v4291_v60 = vadd.f32 %v6454_v22, %v4028_v55  ;;  %3771 = vst.msk [vmem:[#allocation2 + $0x40] sm:$0xff] %vm272_vm0, %v3514_v49  ;;  %3899 = vst.msk [vmem:[#allocation2 + $0x440] sm:$0xff] %vm272_vm0, %v3642_v50  ;;  %v3515_v62 = vadd.f32 %v2518_v57, %v538_v46  ;;  %v3643_v63 = vadd.f32 %v3030_v58, %v666_v47  ;;  %v2520_v0 = vpop.f32.mrb[19].mxu0  ;;  %v3032_v1 = vpop.f32.mrb[19].mxu1 }
 0x13e   : > { %v4419_v61 = vadd.f32 %v6454_v22, %v4156_v56  ;;  %v4029_v2 = vld [vmem:[#allocation2 + $0x38] sm:$0xff]  ;;  %v5477_v47 = vld [vmem:[%s5756_s30 + $0x224] ss:$8 sps:$4 sm:$0xff]   ;;  %v671_v0 = vld [vmem:[#allocation2 + $0x470] sm:$0xff] }
 0x13f   : > { %v4157_v3 = vld [vmem:[#allocation2 + $0x438] sm:$0xff]  ;;  %4547 = vst.msk [vmem:[%s6464_s9 + $0x30] sm:$0xff] %vm272_vm0, %v4291_v60  ;;  %v4292_v4 = vadd.f32 %v6454_v22, %v4029_v2  ;;  %3772 = vst.msk [vmem:[#allocation2 + $0x48] sm:$0xff] %vm272_vm0, %v3515_v62  ;;  %2730 = vmatmul.mubr.bf16.gmra.mrb[124].mxu0 %v5463_v48  ;;  %3242 = vmatmul.mubr.bf16.gmra.mrb[124].mxu1 %v5464_v53 }
 0x140   : > { %4675 = vst.msk [vmem:[%s6464_s9 + $0x430] sm:$0xff] %vm272_vm0, %v4419_v61  ;;  %v4420_v5 = vadd.f32 %v6454_v22, %v4157_v3  ;;  %3900 = vst.msk [vmem:[#allocation2 + $0x448] sm:$0xff] %vm272_vm0, %v3643_v63  ;;  %2737 = vmatprep.mubr.bf16.mxu0 %v5465_v54  ;;  %3249 = vmatprep.mubr.bf16.mxu1 %v5467_v59  ;;  %v5476_v46 = vld [vmem:[%s5756_s30 + $0x610] ss:$8 sps:$4 sm:$0xff]  }
 0x141   : > { %4548 = vst.msk [vmem:[%s6464_s9 + $0x38] sm:$0xff] %vm272_vm0, %v4292_v4  ;;  %v543_v63 = vld [vmem:[#allocation2 + $0x70] sm:$0xff]  ;;  %v544_v3 = vld [vmem:[#allocation2 + $0x78] sm:$0xff] }
 0x142   : > { %4676 = vst.msk [vmem:[%s6464_s9 + $0x438] sm:$0xff] %vm272_vm0, %v4420_v5  ;;  %v2523_v8 = vpop.f32.mrb[20].mxu0  ;;  %v3035_v9 = vpop.f32.mrb[20].mxu1  ;;  %v672_v4 = vld [vmem:[#allocation2 + $0x478] sm:$0xff]  ;;  %v5481_v5 = vld [vmem:[%s5756_s30 + $0x220] ss:$8 sps:$4 sm:$0xff]  }
 0x143   : > { %v3516_v13 = vadd.f32 %v2523_v8, %v539_v6  ;;  %v3644_v14 = vadd.f32 %v3035_v9, %v667_v7  ;;  %v2525_v15 = vpop.f32.mrb[21].mxu0  ;;  %v3037_v16 = vpop.f32.mrb[21].mxu1 }
 0x144   : > { %v4030_v19 = vld [vmem:[#allocation2 + $0x40] sm:$0xff]  ;;  %v2526_v21 = vpop.f32.mrb[22].mxu0  ;;  %v3038_v23 = vpop.f32.mrb[22].mxu1  ;;  %v5485_v16 = vld [vmem:[%s5756_s30 + $0x634] ss:$8 sps:$4 sm:$0xff]  }
 0x145   : > { %v4158_v20 = vld [vmem:[#allocation2 + $0x440] sm:$0xff]  ;;  %v4293_v25 = vadd.f32 %v6454_v22, %v4030_v19  ;;  %3773 = vst.msk [vmem:[#allocation2 + $0x50] sm:$0xff] %vm272_vm0, %v3516_v13  ;;  %3901 = vst.msk [vmem:[#allocation2 + $0x450] sm:$0xff] %vm272_vm0, %v3644_v14  ;;  %v3517_v27 = vadd.f32 %v2526_v21, %v540_v10  ;;  %v3645_v28 = vadd.f32 %v3038_v23, %v668_v11  ;;  %v2528_v29 = vpop.f32.mrb[23].mxu0  ;;  %v3040_v30 = vpop.f32.mrb[23].mxu1 }
 0x146   : > { %v4421_v26 = vadd.f32 %v6454_v22, %v4158_v20  ;;  %v4031_v31 = vld [vmem:[#allocation2 + $0x48] sm:$0xff]  ;;  %v5483_v11 = vld [vmem:[%s5756_s30 + $0x234] ss:$8 sps:$4 sm:$0xff]   ;;  %v673_v29 = vld [vmem:[#allocation2 + $0x480] sm:$0xff] }
 0x147   : > { %v4159_v32 = vld [vmem:[#allocation2 + $0x448] sm:$0xff]  ;;  %4549 = vst.msk [vmem:[%s6464_s9 + $0x40] sm:$0xff] %vm272_vm0, %v4293_v25  ;;  %v4294_v33 = vadd.f32 %v6454_v22, %v4031_v31  ;;  %3774 = vst.msk [vmem:[#allocation2 + $0x58] sm:$0xff] %vm272_vm0, %v3517_v27  ;;  %2738 = vmatmul.mubr.bf16.gmra.mrb[128].mxu0 %v5469_v12  ;;  %3250 = vmatmul.mubr.bf16.gmra.mrb[128].mxu1 %v5470_v17 }
 0x148   : > { %4677 = vst.msk [vmem:[%s6464_s9 + $0x440] sm:$0xff] %vm272_vm0, %v4421_v26  ;;  %v4422_v34 = vadd.f32 %v6454_v22, %v4159_v32  ;;  %3902 = vst.msk [vmem:[#allocation2 + $0x458] sm:$0xff] %vm272_vm0, %v3645_v28  ;;  %2745 = vmatprep.mubr.bf16.mxu0 %v5471_v18  ;;  %3257 = vmatprep.mubr.bf16.mxu1 %v5473_v24  ;;  %v5482_v10 = vld [vmem:[%s5756_s30 + $0x620] ss:$8 sps:$4 sm:$0xff]  }
 0x149   : > { %4550 = vst.msk [vmem:[%s6464_s9 + $0x48] sm:$0xff] %vm272_vm0, %v4294_v33  ;;  %v545_v28 = vld [vmem:[#allocation2 + $0x80] sm:$0xff]  ;;  %v546_v32 = vld [vmem:[#allocation2 + $0x88] sm:$0xff] }
 0x14a   : > { %4678 = vst.msk [vmem:[%s6464_s9 + $0x448] sm:$0xff] %vm272_vm0, %v4422_v34  ;;  %v2531_v37 = vpop.f32.mrb[24].mxu0  ;;  %v3043_v38 = vpop.f32.mrb[24].mxu1  ;;  %v674_v33 = vld [vmem:[#allocation2 + $0x488] sm:$0xff]  ;;  %v5487_v34 = vld [vmem:[%s5756_s30 + $0x230] ss:$8 sps:$4 sm:$0xff]  }
 0x14b   : > { %v3518_v42 = vadd.f32 %v2531_v37, %v541_v35  ;;  %v3646_v43 = vadd.f32 %v3043_v38, %v669_v36  ;;  %v2533_v44 = vpop.f32.mrb[25].mxu0  ;;  %v3045_v45 = vpop.f32.mrb[25].mxu1 }
 0x14c   : > { %v4032_v48 = vld [vmem:[#allocation2 + $0x50] sm:$0xff]  ;;  %v2534_v50 = vpop.f32.mrb[26].mxu0  ;;  %v3046_v51 = vpop.f32.mrb[26].mxu1  ;;  %v5491_v45 = vld [vmem:[%s5756_s30 + $0x644] ss:$8 sps:$4 sm:$0xff]  }
 0x14d   : > { %v4160_v49 = vld [vmem:[#allocation2 + $0x450] sm:$0xff]  ;;  %v4295_v53 = vadd.f32 %v6454_v22, %v4032_v48  ;;  %3775 = vst.msk [vmem:[#allocation2 + $0x60] sm:$0xff] %vm272_vm0, %v3518_v42  ;;  %3903 = vst.msk [vmem:[#allocation2 + $0x460] sm:$0xff] %vm272_vm0, %v3646_v43  ;;  %v3519_v55 = vadd.f32 %v2534_v50, %v542_v39  ;;  %v3647_v56 = vadd.f32 %v3046_v51, %v670_v40  ;;  %v2536_v57 = vpop.f32.mrb[27].mxu0  ;;  %v3048_v58 = vpop.f32.mrb[27].mxu1 }
 0x14e   : > { %v4423_v54 = vadd.f32 %v6454_v22, %v4160_v49  ;;  %v4033_v59 = vld [vmem:[#allocation2 + $0x58] sm:$0xff]  ;;  %v5489_v40 = vld [vmem:[%s5756_s30 + $0x244] ss:$8 sps:$4 sm:$0xff]   ;;  %v675_v57 = vld [vmem:[#allocation2 + $0x490] sm:$0xff] }
 0x14f   : > { %v4161_v60 = vld [vmem:[#allocation2 + $0x458] sm:$0xff]  ;;  %4551 = vst.msk [vmem:[%s6464_s9 + $0x50] sm:$0xff] %vm272_vm0, %v4295_v53  ;;  %v4296_v61 = vadd.f32 %v6454_v22, %v4033_v59  ;;  %3776 = vst.msk [vmem:[#allocation2 + $0x68] sm:$0xff] %vm272_vm0, %v3519_v55  ;;  %2746 = vmatmul.mubr.bf16.gmra.mrb[132].mxu0 %v5475_v41  ;;  %3258 = vmatmul.mubr.bf16.gmra.mrb[132].mxu1 %v5476_v46 }
 0x150   : > { %4679 = vst.msk [vmem:[%s6464_s9 + $0x450] sm:$0xff] %vm272_vm0, %v4423_v54  ;;  %v4424_v62 = vadd.f32 %v6454_v22, %v4161_v60  ;;  %3904 = vst.msk [vmem:[#allocation2 + $0x468] sm:$0xff] %vm272_vm0, %v3647_v56  ;;  %2753 = vmatprep.mubr.bf16.mxu0 %v5477_v47  ;;  %3265 = vmatprep.mubr.bf16.mxu1 %v5479_v52  ;;  %v5488_v39 = vld [vmem:[%s5756_s30 + $0x630] ss:$8 sps:$4 sm:$0xff]  }
 0x151   : > { %4552 = vst.msk [vmem:[%s6464_s9 + $0x58] sm:$0xff] %vm272_vm0, %v4296_v61  ;;  %v547_v56 = vld [vmem:[#allocation2 + $0x90] sm:$0xff]  ;;  %v548_v60 = vld [vmem:[#allocation2 + $0x98] sm:$0xff] }
 0x152   : > { %4680 = vst.msk [vmem:[%s6464_s9 + $0x458] sm:$0xff] %vm272_vm0, %v4424_v62  ;;  %v2539_v1 = vpop.f32.mrb[28].mxu0  ;;  %v3051_v2 = vpop.f32.mrb[28].mxu1  ;;  %v676_v61 = vld [vmem:[#allocation2 + $0x498] sm:$0xff]  ;;  %v5493_v62 = vld [vmem:[%s5756_s30 + $0x240] ss:$8 sps:$4 sm:$0xff]  }
 0x153   : > { %v3520_v6 = vadd.f32 %v2539_v1, %v543_v63  ;;  %v3648_v7 = vadd.f32 %v3051_v2, %v671_v0  ;;  %v2541_v8 = vpop.f32.mrb[29].mxu0  ;;  %v3053_v9 = vpop.f32.mrb[29].mxu1 }
 0x154   : > { %v4034_v12 = vld [vmem:[#allocation2 + $0x60] sm:$0xff]  ;;  %v2542_v14 = vpop.f32.mrb[30].mxu0  ;;  %v3054_v15 = vpop.f32.mrb[30].mxu1  ;;  %v5497_v9 = vld [vmem:[%s5756_s30 + $0x654] ss:$8 sps:$4 sm:$0xff]  }
 0x155   : > { %v4162_v13 = vld [vmem:[#allocation2 + $0x460] sm:$0xff]  ;;  %v4297_v17 = vadd.f32 %v6454_v22, %v4034_v12  ;;  %3777 = vst.msk [vmem:[#allocation2 + $0x70] sm:$0xff] %vm272_vm0, %v3520_v6  ;;  %3905 = vst.msk [vmem:[#allocation2 + $0x470] sm:$0xff] %vm272_vm0, %v3648_v7  ;;  %v3521_v19 = vadd.f32 %v2542_v14, %v544_v3  ;;  %v3649_v20 = vadd.f32 %v3054_v15, %v672_v4  ;;  %v2544_v21 = vpop.f32.mrb[31].mxu0  ;;  %v3056_v23 = vpop.f32.mrb[31].mxu1 }
 0x156   : > { %v4425_v18 = vadd.f32 %v6454_v22, %v4162_v13  ;;  %v4035_v24 = vld [vmem:[#allocation2 + $0x68] sm:$0xff]  ;;  %v5495_v4 = vld [vmem:[%s5756_s30 + $0x254] ss:$8 sps:$4 sm:$0xff]   ;;  %v677_v21 = vld [vmem:[#allocation2 + $0x4a0] sm:$0xff] }
 0x157   : > { %v4163_v25 = vld [vmem:[#allocation2 + $0x468] sm:$0xff]  ;;  %4553 = vst.msk [vmem:[%s6464_s9 + $0x60] sm:$0xff] %vm272_vm0, %v4297_v17  ;;  %v4298_v26 = vadd.f32 %v6454_v22, %v4035_v24  ;;  %3778 = vst.msk [vmem:[#allocation2 + $0x78] sm:$0xff] %vm272_vm0, %v3521_v19  ;;  %2754 = vmatmul.mubr.bf16.gmra.mrb[136].mxu0 %v5481_v5  ;;  %3266 = vmatmul.mubr.bf16.gmra.mrb[136].mxu1 %v5482_v10 }
 0x158   : > { %4681 = vst.msk [vmem:[%s6464_s9 + $0x460] sm:$0xff] %vm272_vm0, %v4425_v18  ;;  %v4426_v27 = vadd.f32 %v6454_v22, %v4163_v25  ;;  %3906 = vst.msk [vmem:[#allocation2 + $0x478] sm:$0xff] %vm272_vm0, %v3649_v20  ;;  %2761 = vmatprep.mubr.bf16.mxu0 %v5483_v11  ;;  %3273 = vmatprep.mubr.bf16.mxu1 %v5485_v16  ;;  %v5494_v3 = vld [vmem:[%s5756_s30 + $0x640] ss:$8 sps:$4 sm:$0xff]  }
 0x159   : > { %4554 = vst.msk [vmem:[%s6464_s9 + $0x68] sm:$0xff] %vm272_vm0, %v4298_v26  ;;  %v549_v20 = vld [vmem:[#allocation2 + $0xa0] sm:$0xff]  ;;  %v550_v25 = vld [vmem:[#allocation2 + $0xa8] sm:$0xff] }
 0x15a   : > { %4682 = vst.msk [vmem:[%s6464_s9 + $0x468] sm:$0xff] %vm272_vm0, %v4426_v27  ;;  %v2547_v30 = vpop.f32.mrb[32].mxu0  ;;  %v3059_v31 = vpop.f32.mrb[32].mxu1  ;;  %v678_v26 = vld [vmem:[#allocation2 + $0x4a8] sm:$0xff]  ;;  %v5499_v27 = vld [vmem:[%s5756_s30 + $0x250] ss:$8 sps:$4 sm:$0xff]  }
 0x15b   : > { %v3522_v35 = vadd.f32 %v2547_v30, %v545_v28  ;;  %v3650_v36 = vadd.f32 %v3059_v31, %v673_v29  ;;  %v2549_v37 = vpop.f32.mrb[33].mxu0  ;;  %v3061_v38 = vpop.f32.mrb[33].mxu1 }
 0x15c   : > { %v4036_v41 = vld [vmem:[#allocation2 + $0x70] sm:$0xff]  ;;  %v2550_v43 = vpop.f32.mrb[34].mxu0  ;;  %v3062_v44 = vpop.f32.mrb[34].mxu1  ;;  %v5503_v38 = vld [vmem:[%s5756_s30 + $0x664] ss:$8 sps:$4 sm:$0xff]  }
 0x15d   : > { %v4164_v42 = vld [vmem:[#allocation2 + $0x470] sm:$0xff]  ;;  %v4299_v46 = vadd.f32 %v6454_v22, %v4036_v41  ;;  %3779 = vst.msk [vmem:[#allocation2 + $0x80] sm:$0xff] %vm272_vm0, %v3522_v35  ;;  %3907 = vst.msk [vmem:[#allocation2 + $0x480] sm:$0xff] %vm272_vm0, %v3650_v36  ;;  %v3523_v48 = vadd.f32 %v2550_v43, %v546_v32  ;;  %v3651_v49 = vadd.f32 %v3062_v44, %v674_v33  ;;  %v2552_v50 = vpop.f32.mrb[35].mxu0  ;;  %v3064_v51 = vpop.f32.mrb[35].mxu1 }
 0x15e   : > { %v4427_v47 = vadd.f32 %v6454_v22, %v4164_v42  ;;  %v4037_v52 = vld [vmem:[#allocation2 + $0x78] sm:$0xff]  ;;  %v5501_v33 = vld [vmem:[%s5756_s30 + $0x264] ss:$8 sps:$4 sm:$0xff]   ;;  %v679_v50 = vld [vmem:[#allocation2 + $0x4b0] sm:$0xff] }
 0x15f   : > { %v4165_v53 = vld [vmem:[#allocation2 + $0x478] sm:$0xff]  ;;  %4555 = vst.msk [vmem:[%s6464_s9 + $0x70] sm:$0xff] %vm272_vm0, %v4299_v46  ;;  %v4300_v54 = vadd.f32 %v6454_v22, %v4037_v52  ;;  %3780 = vst.msk [vmem:[#allocation2 + $0x88] sm:$0xff] %vm272_vm0, %v3523_v48  ;;  %2762 = vmatmul.mubr.bf16.gmra.mrb[140].mxu0 %v5487_v34  ;;  %3274 = vmatmul.mubr.bf16.gmra.mrb[140].mxu1 %v5488_v39 }
 0x160   : > { %4683 = vst.msk [vmem:[%s6464_s9 + $0x470] sm:$0xff] %vm272_vm0, %v4427_v47  ;;  %v4428_v55 = vadd.f32 %v6454_v22, %v4165_v53  ;;  %3908 = vst.msk [vmem:[#allocation2 + $0x488] sm:$0xff] %vm272_vm0, %v3651_v49  ;;  %2769 = vmatprep.mubr.bf16.mxu0 %v5489_v40  ;;  %3281 = vmatprep.mubr.bf16.mxu1 %v5491_v45  ;;  %v5500_v32 = vld [vmem:[%s5756_s30 + $0x650] ss:$8 sps:$4 sm:$0xff]  }
 0x161   : > { %4556 = vst.msk [vmem:[%s6464_s9 + $0x78] sm:$0xff] %vm272_vm0, %v4300_v54  ;;  %v551_v49 = vld [vmem:[#allocation2 + $0xb0] sm:$0xff]  ;;  %v552_v53 = vld [vmem:[#allocation2 + $0xb8] sm:$0xff] }
 0x162   : > { %4684 = vst.msk [vmem:[%s6464_s9 + $0x478] sm:$0xff] %vm272_vm0, %v4428_v55  ;;  %v2555_v58 = vpop.f32.mrb[36].mxu0  ;;  %v3067_v59 = vpop.f32.mrb[36].mxu1  ;;  %v680_v54 = vld [vmem:[#allocation2 + $0x4b8] sm:$0xff]  ;;  %v5505_v55 = vld [vmem:[%s5756_s30 + $0x260] ss:$8 sps:$4 sm:$0xff]  }
 0x163   : > { %v3524_v63 = vadd.f32 %v2555_v58, %v547_v56  ;;  %v3652_v0 = vadd.f32 %v3067_v59, %v675_v57  ;;  %v2557_v1 = vpop.f32.mrb[37].mxu0  ;;  %v3069_v2 = vpop.f32.mrb[37].mxu1 }
 0x164   : > { %v4038_v5 = vld [vmem:[#allocation2 + $0x80] sm:$0xff]  ;;  %v2558_v7 = vpop.f32.mrb[38].mxu0  ;;  %v3070_v8 = vpop.f32.mrb[38].mxu1  ;;  %v5509_v2 = vld [vmem:[%s5756_s30 + $0x674] ss:$8 sps:$4 sm:$0xff]  }
 0x165   : > { %v4166_v6 = vld [vmem:[#allocation2 + $0x480] sm:$0xff]  ;;  %v4301_v10 = vadd.f32 %v6454_v22, %v4038_v5  ;;  %3781 = vst.msk [vmem:[#allocation2 + $0x90] sm:$0xff] %vm272_vm0, %v3524_v63  ;;  %3909 = vst.msk [vmem:[#allocation2 + $0x490] sm:$0xff] %vm272_vm0, %v3652_v0  ;;  %v3525_v12 = vadd.f32 %v2558_v7, %v548_v60  ;;  %v3653_v13 = vadd.f32 %v3070_v8, %v676_v61  ;;  %v2560_v14 = vpop.f32.mrb[39].mxu0  ;;  %v3072_v15 = vpop.f32.mrb[39].mxu1 }
 0x166   : > { %v4429_v11 = vadd.f32 %v6454_v22, %v4166_v6  ;;  %v4039_v16 = vld [vmem:[#allocation2 + $0x88] sm:$0xff]  ;;  %v5507_v61 = vld [vmem:[%s5756_s30 + $0x274] ss:$8 sps:$4 sm:$0xff]   ;;  %v681_v14 = vld [vmem:[#allocation2 + $0x4c0] sm:$0xff] }
 0x167   : > { %v4167_v17 = vld [vmem:[#allocation2 + $0x488] sm:$0xff]  ;;  %4557 = vst.msk [vmem:[%s6464_s9 + $0x80] sm:$0xff] %vm272_vm0, %v4301_v10  ;;  %v4302_v18 = vadd.f32 %v6454_v22, %v4039_v16  ;;  %3782 = vst.msk [vmem:[#allocation2 + $0x98] sm:$0xff] %vm272_vm0, %v3525_v12  ;;  %2770 = vmatmul.mubr.bf16.gmra.mrb[144].mxu0 %v5493_v62  ;;  %3282 = vmatmul.mubr.bf16.gmra.mrb[144].mxu1 %v5494_v3 }
 0x168   : > { %4685 = vst.msk [vmem:[%s6464_s9 + $0x480] sm:$0xff] %vm272_vm0, %v4429_v11  ;;  %v4430_v19 = vadd.f32 %v6454_v22, %v4167_v17  ;;  %3910 = vst.msk [vmem:[#allocation2 + $0x498] sm:$0xff] %vm272_vm0, %v3653_v13  ;;  %2777 = vmatprep.mubr.bf16.mxu0 %v5495_v4  ;;  %3289 = vmatprep.mubr.bf16.mxu1 %v5497_v9  ;;  %v5506_v60 = vld [vmem:[%s5756_s30 + $0x660] ss:$8 sps:$4 sm:$0xff]  }
 0x169   : > { %4558 = vst.msk [vmem:[%s6464_s9 + $0x88] sm:$0xff] %vm272_vm0, %v4302_v18  ;;  %v553_v13 = vld [vmem:[#allocation2 + $0xc0] sm:$0xff]  ;;  %v554_v17 = vld [vmem:[#allocation2 + $0xc8] sm:$0xff] }
 0x16a   : > { %4686 = vst.msk [vmem:[%s6464_s9 + $0x488] sm:$0xff] %vm272_vm0, %v4430_v19  ;;  %v2563_v23 = vpop.f32.mrb[40].mxu0  ;;  %v3075_v24 = vpop.f32.mrb[40].mxu1  ;;  %v682_v18 = vld [vmem:[#allocation2 + $0x4c8] sm:$0xff]  ;;  %v5511_v19 = vld [vmem:[%s5756_s30 + $0x270] ss:$8 sps:$4 sm:$0xff]  }
 0x16b   : > { %v3526_v28 = vadd.f32 %v2563_v23, %v549_v20  ;;  %v3654_v29 = vadd.f32 %v3075_v24, %v677_v21  ;;  %v2565_v30 = vpop.f32.mrb[41].mxu0  ;;  %v3077_v31 = vpop.f32.mrb[41].mxu1 }
 0x16c   : > { %v4040_v34 = vld [vmem:[#allocation2 + $0x90] sm:$0xff]  ;;  %v2566_v36 = vpop.f32.mrb[42].mxu0  ;;  %v3078_v37 = vpop.f32.mrb[42].mxu1  ;;  %v5515_v31 = vld [vmem:[%s5756_s30 + $0x684] ss:$8 sps:$4 sm:$0xff]  }
 0x16d   : > { %v4168_v35 = vld [vmem:[#allocation2 + $0x490] sm:$0xff]  ;;  %v4303_v39 = vadd.f32 %v6454_v22, %v4040_v34  ;;  %3783 = vst.msk [vmem:[#allocation2 + $0xa0] sm:$0xff] %vm272_vm0, %v3526_v28  ;;  %3911 = vst.msk [vmem:[#allocation2 + $0x4a0] sm:$0xff] %vm272_vm0, %v3654_v29  ;;  %v3527_v41 = vadd.f32 %v2566_v36, %v550_v25  ;;  %v3655_v42 = vadd.f32 %v3078_v37, %v678_v26  ;;  %v2568_v43 = vpop.f32.mrb[43].mxu0  ;;  %v3080_v44 = vpop.f32.mrb[43].mxu1 }
 0x16e   : > { %v4431_v40 = vadd.f32 %v6454_v22, %v4168_v35  ;;  %v4041_v45 = vld [vmem:[#allocation2 + $0x98] sm:$0xff]  ;;  %v5513_v26 = vld [vmem:[%s5756_s30 + $0x284] ss:$8 sps:$4 sm:$0xff]   ;;  %v683_v43 = vld [vmem:[#allocation2 + $0x4d0] sm:$0xff] }
 0x16f   : > { %v4169_v46 = vld [vmem:[#allocation2 + $0x498] sm:$0xff]  ;;  %4559 = vst.msk [vmem:[%s6464_s9 + $0x90] sm:$0xff] %vm272_vm0, %v4303_v39  ;;  %v4304_v47 = vadd.f32 %v6454_v22, %v4041_v45  ;;  %3784 = vst.msk [vmem:[#allocation2 + $0xa8] sm:$0xff] %vm272_vm0, %v3527_v41  ;;  %2778 = vmatmul.mubr.bf16.gmra.mrb[148].mxu0 %v5499_v27  ;;  %3290 = vmatmul.mubr.bf16.gmra.mrb[148].mxu1 %v5500_v32 }
 0x170   : > { %4687 = vst.msk [vmem:[%s6464_s9 + $0x490] sm:$0xff] %vm272_vm0, %v4431_v40  ;;  %v4432_v48 = vadd.f32 %v6454_v22, %v4169_v46  ;;  %3912 = vst.msk [vmem:[#allocation2 + $0x4a8] sm:$0xff] %vm272_vm0, %v3655_v42  ;;  %2785 = vmatprep.mubr.bf16.mxu0 %v5501_v33  ;;  %3297 = vmatprep.mubr.bf16.mxu1 %v5503_v38  ;;  %v5512_v25 = vld [vmem:[%s5756_s30 + $0x670] ss:$8 sps:$4 sm:$0xff]  }
 0x171   : > { %4560 = vst.msk [vmem:[%s6464_s9 + $0x98] sm:$0xff] %vm272_vm0, %v4304_v47  ;;  %v555_v42 = vld [vmem:[#allocation2 + $0xd0] sm:$0xff]  ;;  %v556_v46 = vld [vmem:[#allocation2 + $0xd8] sm:$0xff] }
 0x172   : > { %4688 = vst.msk [vmem:[%s6464_s9 + $0x498] sm:$0xff] %vm272_vm0, %v4432_v48  ;;  %v2571_v51 = vpop.f32.mrb[44].mxu0  ;;  %v3083_v52 = vpop.f32.mrb[44].mxu1  ;;  %v684_v47 = vld [vmem:[#allocation2 + $0x4d8] sm:$0xff]  ;;  %v5517_v48 = vld [vmem:[%s5756_s30 + $0x280] ss:$8 sps:$4 sm:$0xff]  }
 0x173   : > { %v3528_v56 = vadd.f32 %v2571_v51, %v551_v49  ;;  %v3656_v57 = vadd.f32 %v3083_v52, %v679_v50  ;;  %v2573_v58 = vpop.f32.mrb[45].mxu0  ;;  %v3085_v59 = vpop.f32.mrb[45].mxu1 }
 0x174   : > { %v4042_v62 = vld [vmem:[#allocation2 + $0xa0] sm:$0xff]  ;;  %v2574_v0 = vpop.f32.mrb[46].mxu0  ;;  %v3086_v1 = vpop.f32.mrb[46].mxu1  ;;  %v5521_v59 = vld [vmem:[%s5756_s30 + $0x694] ss:$8 sps:$4 sm:$0xff]  }
 0x175   : > { %v4170_v63 = vld [vmem:[#allocation2 + $0x4a0] sm:$0xff]  ;;  %v4305_v3 = vadd.f32 %v6454_v22, %v4042_v62  ;;  %3785 = vst.msk [vmem:[#allocation2 + $0xb0] sm:$0xff] %vm272_vm0, %v3528_v56  ;;  %3913 = vst.msk [vmem:[#allocation2 + $0x4b0] sm:$0xff] %vm272_vm0, %v3656_v57  ;;  %v3529_v5 = vadd.f32 %v2574_v0, %v552_v53  ;;  %v3657_v6 = vadd.f32 %v3086_v1, %v680_v54  ;;  %v2576_v7 = vpop.f32.mrb[47].mxu0  ;;  %v3088_v8 = vpop.f32.mrb[47].mxu1 }
 0x176   : > { %v4433_v4 = vadd.f32 %v6454_v22, %v4170_v63  ;;  %v4043_v9 = vld [vmem:[#allocation2 + $0xa8] sm:$0xff]  ;;  %v5519_v54 = vld [vmem:[%s5756_s30 + $0x294] ss:$8 sps:$4 sm:$0xff]   ;;  %v685_v7 = vld [vmem:[#allocation2 + $0x4e0] sm:$0xff] }
 0x177   : > { %v4171_v10 = vld [vmem:[#allocation2 + $0x4a8] sm:$0xff]  ;;  %4561 = vst.msk [vmem:[%s6464_s9 + $0xa0] sm:$0xff] %vm272_vm0, %v4305_v3  ;;  %v4306_v11 = vadd.f32 %v6454_v22, %v4043_v9  ;;  %3786 = vst.msk [vmem:[#allocation2 + $0xb8] sm:$0xff] %vm272_vm0, %v3529_v5  ;;  %2786 = vmatmul.mubr.bf16.gmra.mrb[152].mxu0 %v5505_v55  ;;  %3298 = vmatmul.mubr.bf16.gmra.mrb[152].mxu1 %v5506_v60 }
 0x178   : > { %4689 = vst.msk [vmem:[%s6464_s9 + $0x4a0] sm:$0xff] %vm272_vm0, %v4433_v4  ;;  %v4434_v12 = vadd.f32 %v6454_v22, %v4171_v10  ;;  %3914 = vst.msk [vmem:[#allocation2 + $0x4b8] sm:$0xff] %vm272_vm0, %v3657_v6  ;;  %2793 = vmatprep.mubr.bf16.mxu0 %v5507_v61  ;;  %3305 = vmatprep.mubr.bf16.mxu1 %v5509_v2  ;;  %v5518_v53 = vld [vmem:[%s5756_s30 + $0x680] ss:$8 sps:$4 sm:$0xff]  }
 0x179   : > { %4562 = vst.msk [vmem:[%s6464_s9 + $0xa8] sm:$0xff] %vm272_vm0, %v4306_v11  ;;  %v557_v6 = vld [vmem:[#allocation2 + $0xe0] sm:$0xff]  ;;  %v686_v10 = vld [vmem:[#allocation2 + $0x4e8] sm:$0xff]  ;;  %v5523_v11 = vld [vmem:[%s5756_s30 + $0x290] ss:$8 sps:$4 sm:$0xff]  }
 0x17a   : > { %4690 = vst.msk [vmem:[%s6464_s9 + $0x4a8] sm:$0xff] %vm272_vm0, %v4434_v12  ;;  %v2579_v15 = vpop.f32.mrb[48].mxu0  ;;  %v3091_v16 = vpop.f32.mrb[48].mxu1 }
 0x17b   : > { %v3530_v20 = vadd.f32 %v2579_v15, %v553_v13  ;;  %v3658_v21 = vadd.f32 %v3091_v16, %v681_v14  ;;  %v2581_v23 = vpop.f32.mrb[49].mxu0  ;;  %v3093_v24 = vpop.f32.mrb[49].mxu1  ;;  %v5524_v16 = vld [vmem:[%s5756_s30 + $0x690] ss:$8 sps:$4 sm:$0xff]  }
 0x17c   : > { %v4044_v27 = vld [vmem:[#allocation2 + $0xb0] sm:$0xff]  ;;  %v2582_v29 = vpop.f32.mrb[50].mxu0  ;;  %v3094_v30 = vpop.f32.mrb[50].mxu1  ;;  %v5527_v23 = vld [vmem:[%s5756_s30 + $0x6a4] ss:$8 sps:$4 sm:$0xff]  }
 0x17d   : > { %v4172_v28 = vld [vmem:[#allocation2 + $0x4b0] sm:$0xff]  ;;  %v4307_v32 = vadd.f32 %v6454_v22, %v4044_v27  ;;  %3787 = vst.msk [vmem:[#allocation2 + $0xc0] sm:$0xff] %vm272_vm0, %v3530_v20  ;;  %3915 = vst.msk [vmem:[#allocation2 + $0x4c0] sm:$0xff] %vm272_vm0, %v3658_v21  ;;  %v3531_v34 = vadd.f32 %v2582_v29, %v554_v17  ;;  %v3659_v35 = vadd.f32 %v3094_v30, %v682_v18  ;;  %v2584_v36 = vpop.f32.mrb[51].mxu0  ;;  %v3096_v37 = vpop.f32.mrb[51].mxu1 }
 0x17e   : > { %v4435_v33 = vadd.f32 %v6454_v22, %v4172_v28  ;;  %v4045_v38 = vld [vmem:[#allocation2 + $0xb8] sm:$0xff]  ;;  %v5525_v17 = vld [vmem:[%s5756_s30 + $0x2a4] ss:$8 sps:$4 sm:$0xff]   ;;  %v6730_v24 = vld [vmem:[%s7656_s2] ss:$0 sm:$0xff] }
 0x17f   : > { %v4173_v39 = vld [vmem:[#allocation2 + $0x4b8] sm:$0xff]  ;;  %4563 = vst.msk [vmem:[%s6464_s9 + $0xb0] sm:$0xff] %vm272_vm0, %v4307_v32  ;;  %v4308_v40 = vadd.f32 %v6454_v22, %v4045_v38  ;;  %3788 = vst.msk [vmem:[#allocation2 + $0xc8] sm:$0xff] %vm272_vm0, %v3531_v34  ;;  %2794 = vmatmul.mubr.bf16.gmra.mrb[156].mxu0 %v5511_v19  ;;  %3306 = vmatmul.mubr.bf16.gmra.mrb[156].mxu1 %v5512_v25  ;;  %v687_v36 = vld [vmem:[#allocation2 + $0x4f0] sm:$0xff] }
 0x180   : > { %4691 = vst.msk [vmem:[%s6464_s9 + $0x4b0] sm:$0xff] %vm272_vm0, %v4435_v33  ;;  %v4436_v41 = vadd.f32 %v6454_v22, %v4173_v39  ;;  %3916 = vst.msk [vmem:[#allocation2 + $0x4c8] sm:$0xff] %vm272_vm0, %v3659_v35  ;;  %2801 = vmatprep.mubr.bf16.mxu0 %v5513_v26  ;;  %3313 = vmatprep.mubr.bf16.mxu1 %v5515_v31  ;;  %v559_v35 = vld [vmem:[#allocation2 + $0xf0] sm:$0xff]  ;;  %v560_v39 = vld [vmem:[#allocation2 + $0xf8] sm:$0xff] }
 0x181   : > { %4564 = vst.msk [vmem:[%s6464_s9 + $0xb8] sm:$0xff] %vm272_vm0, %v4308_v40  ;;  %v688_v40 = vld [vmem:[#allocation2 + $0x4f8] sm:$0xff] }
 0x182   : > { %4692 = vst.msk [vmem:[%s6464_s9 + $0x4b8] sm:$0xff] %vm272_vm0, %v4436_v41  ;;  %v2587_v44 = vpop.f32.mrb[52].mxu0  ;;  %v3099_v45 = vpop.f32.mrb[52].mxu1  ;;  %v5529_v41 = vld [vmem:[%s5756_s30 + $0x2a0] ss:$8 sps:$4 sm:$0xff]  }
 0x183   : > { %v3532_v49 = vadd.f32 %v2587_v44, %v555_v42  ;;  %v3660_v50 = vadd.f32 %v3099_v45, %v683_v43  ;;  %v2589_v51 = vpop.f32.mrb[53].mxu0  ;;  %v3101_v52 = vpop.f32.mrb[53].mxu1 }
 0x184   : > { %v4046_v55 = vld [vmem:[#allocation2 + $0xc0] sm:$0xff]  ;;  %v2590_v57 = vpop.f32.mrb[54].mxu0  ;;  %v3102_v58 = vpop.f32.mrb[54].mxu1  ;;  %v5533_v52 = vld [vmem:[%s5756_s30 + $0x6b4] ss:$8 sps:$4 sm:$0xff]  }
 0x185   : > { %v4174_v56 = vld [vmem:[#allocation2 + $0x4c0] sm:$0xff]  ;;  %v4309_v60 = vadd.f32 %v6454_v22, %v4046_v55  ;;  %3789 = vst.msk [vmem:[#allocation2 + $0xd0] sm:$0xff] %vm272_vm0, %v3532_v49  ;;  %3917 = vst.msk [vmem:[#allocation2 + $0x4d0] sm:$0xff] %vm272_vm0, %v3660_v50  ;;  %v3533_v62 = vadd.f32 %v2590_v57, %v556_v46  ;;  %v3661_v63 = vadd.f32 %v3102_v58, %v684_v47  ;;  %v2592_v0 = vpop.f32.mrb[55].mxu0  ;;  %v3104_v1 = vpop.f32.mrb[55].mxu1 }
 0x186   : > { %v4437_v61 = vadd.f32 %v6454_v22, %v4174_v56  ;;  %v4047_v2 = vld [vmem:[#allocation2 + $0xc8] sm:$0xff]  ;;  %v5531_v47 = vld [vmem:[%s5756_s30 + $0x2b4] ss:$8 sps:$4 sm:$0xff]   ;;  %v689_v0 = vld [vmem:[#allocation2 + $0x500] sm:$0xff] }
 0x187   : > { %v4175_v3 = vld [vmem:[#allocation2 + $0x4c8] sm:$0xff]  ;;  %4565 = vst.msk [vmem:[%s6464_s9 + $0xc0] sm:$0xff] %vm272_vm0, %v4309_v60  ;;  %v4310_v4 = vadd.f32 %v6454_v22, %v4047_v2  ;;  %3790 = vst.msk [vmem:[#allocation2 + $0xd8] sm:$0xff] %vm272_vm0, %v3533_v62  ;;  %2802 = vmatmul.mubr.bf16.gmra.mrb[160].mxu0 %v5517_v48  ;;  %3314 = vmatmul.mubr.bf16.gmra.mrb[160].mxu1 %v5518_v53 }
 0x188   : > { %4693 = vst.msk [vmem:[%s6464_s9 + $0x4c0] sm:$0xff] %vm272_vm0, %v4437_v61  ;;  %v4438_v5 = vadd.f32 %v6454_v22, %v4175_v3  ;;  %3918 = vst.msk [vmem:[#allocation2 + $0x4d8] sm:$0xff] %vm272_vm0, %v3661_v63  ;;  %2809 = vmatprep.mubr.bf16.mxu0 %v5519_v54  ;;  %3321 = vmatprep.mubr.bf16.mxu1 %v5521_v59  ;;  %v558_v22 = vld [vmem:[#allocation2 + $0xe8] sm:$0xff]  ;;  %v561_v63 = vld [vmem:[#allocation2 + $0x100] sm:$0xff] }
 0x189   : > { %4566 = vst.msk [vmem:[%s6464_s9 + $0xc8] sm:$0xff] %vm272_vm0, %v4310_v4  ;;  %v5530_v46 = vld [vmem:[%s5756_s30 + $0x6a0] ss:$8 sps:$4 sm:$0xff]  }
 0x18a   : > { %4694 = vst.msk [vmem:[%s6464_s9 + $0x4c8] sm:$0xff] %vm272_vm0, %v4438_v5  ;;  %v2595_v8 = vpop.f32.mrb[56].mxu0  ;;  %v3107_v9 = vpop.f32.mrb[56].mxu1  ;;  %v562_v3 = vld [vmem:[#allocation2 + $0x108] sm:$0xff]  ;;  %v5535_v5 = vld [vmem:[%s5756_s30 + $0x2b0] ss:$8 sps:$4 sm:$0xff]  }
 0x18b   : > { %v3534_v12 = vadd.f32 %v2595_v8, %v557_v6  ;;  %v3662_v13 = vadd.f32 %v3107_v9, %v685_v7  ;;  %v2597_v14 = vpop.f32.mrb[57].mxu0  ;;  %v3109_v15 = vpop.f32.mrb[57].mxu1  ;;  %v690_v4 = vld [vmem:[#allocation2 + $0x508] sm:$0xff] }
 0x18c   : > { %v4048_v18 = vld [vmem:[#allocation2 + $0xd0] sm:$0xff]  ;;  %v2598_v20 = vpop.f32.mrb[58].mxu0  ;;  %v3110_v21 = vpop.f32.mrb[58].mxu1  ;;  %v5539_v15 = vld [vmem:[%s5756_s30 + $0x6c4] ss:$8 sps:$4 sm:$0xff]  }
 0x18d   : > { %v4176_v19 = vld [vmem:[#allocation2 + $0x4d0] sm:$0xff]  ;;  %v4311_v25 = vadd.f32 %v6730_v24, %v4048_v18  ;;  %3791 = vst.msk [vmem:[#allocation2 + $0xe0] sm:$0xff] %vm272_vm0, %v3534_v12  ;;  %3919 = vst.msk [vmem:[#allocation2 + $0x4e0] sm:$0xff] %vm272_vm0, %v3662_v13  ;;  %v3535_v27 = vadd.f32 %v2598_v20, %v558_v22  ;;  %v3663_v28 = vadd.f32 %v3110_v21, %v686_v10  ;;  %v2600_v29 = vpop.f32.mrb[59].mxu0  ;;  %v3112_v30 = vpop.f32.mrb[59].mxu1 }
 0x18e   : > { %v4439_v26 = vadd.f32 %v6730_v24, %v4176_v19  ;;  %v4049_v31 = vld [vmem:[#allocation2 + $0xd8] sm:$0xff]  ;;  %v5537_v10 = vld [vmem:[%s5756_s30 + $0x2c4] ss:$8 sps:$4 sm:$0xff]   ;;  %v691_v29 = vld [vmem:[#allocation2 + $0x510] sm:$0xff] }
 0x18f   : > { %v4177_v32 = vld [vmem:[#allocation2 + $0x4d8] sm:$0xff]  ;;  %4567 = vst.msk [vmem:[%s6464_s9 + $0xd0] sm:$0xff] %vm272_vm0, %v4311_v25  ;;  %v4312_v33 = vadd.f32 %v6730_v24, %v4049_v31  ;;  %3792 = vst.msk [vmem:[#allocation2 + $0xe8] sm:$0xff] %vm272_vm0, %v3535_v27  ;;  %2810 = vmatmul.mubr.bf16.gmra.mrb[164].mxu0 %v5523_v11  ;;  %3322 = vmatmul.mubr.bf16.gmra.mrb[164].mxu1 %v5524_v16 }
 0x190   : > { %4695 = vst.msk [vmem:[%s6464_s9 + $0x4d0] sm:$0xff] %vm272_vm0, %v4439_v26  ;;  %v4440_v34 = vadd.f32 %v6730_v24, %v4177_v32  ;;  %3920 = vst.msk [vmem:[#allocation2 + $0x4e8] sm:$0xff] %vm272_vm0, %v3663_v28  ;;  %2817 = vmatprep.mubr.bf16.mxu0 %v5525_v17  ;;  %3329 = vmatprep.mubr.bf16.mxu1 %v5527_v23  ;;  %v5536_v22 = vld [vmem:[%s5756_s30 + $0x6b0] ss:$8 sps:$4 sm:$0xff]  }
 0x191   : > { %4568 = vst.msk [vmem:[%s6464_s9 + $0xd8] sm:$0xff] %vm272_vm0, %v4312_v33  ;;  %v563_v28 = vld [vmem:[#allocation2 + $0x110] sm:$0xff]  ;;  %v564_v32 = vld [vmem:[#allocation2 + $0x118] sm:$0xff] }
 0x192   : > { %4696 = vst.msk [vmem:[%s6464_s9 + $0x4d8] sm:$0xff] %vm272_vm0, %v4440_v34  ;;  %v2603_v37 = vpop.f32.mrb[60].mxu0  ;;  %v3115_v38 = vpop.f32.mrb[60].mxu1  ;;  %v692_v33 = vld [vmem:[#allocation2 + $0x518] sm:$0xff]  ;;  %v5541_v34 = vld [vmem:[%s5756_s30 + $0x2c0] ss:$8 sps:$4 sm:$0xff]  }
 0x193   : > { %v3536_v42 = vadd.f32 %v2603_v37, %v559_v35  ;;  %v3664_v43 = vadd.f32 %v3115_v38, %v687_v36  ;;  %v2605_v44 = vpop.f32.mrb[61].mxu0  ;;  %v3117_v45 = vpop.f32.mrb[61].mxu1 }
 0x194   : > { %v4050_v48 = vld [vmem:[#allocation2 + $0xe0] sm:$0xff]  ;;  %v2606_v50 = vpop.f32.mrb[62].mxu0  ;;  %v3118_v51 = vpop.f32.mrb[62].mxu1  ;;  %v5545_v45 = vld [vmem:[%s5756_s30 + $0x6d4] ss:$8 sps:$4 sm:$0xff]  }
 0x195   : > { %v4178_v49 = vld [vmem:[#allocation2 + $0x4e0] sm:$0xff]  ;;  %v4313_v53 = vadd.f32 %v6730_v24, %v4050_v48  ;;  %3793 = vst.msk [vmem:[#allocation2 + $0xf0] sm:$0xff] %vm272_vm0, %v3536_v42  ;;  %3921 = vst.msk [vmem:[#allocation2 + $0x4f0] sm:$0xff] %vm272_vm0, %v3664_v43  ;;  %v3537_v55 = vadd.f32 %v2606_v50, %v560_v39  ;;  %v3665_v56 = vadd.f32 %v3118_v51, %v688_v40  ;;  %v2608_v57 = vpop.f32.mrb[63].mxu0  ;;  %v3120_v58 = vpop.f32.mrb[63].mxu1 }
 0x196   : > { %v4441_v54 = vadd.f32 %v6730_v24, %v4178_v49  ;;  %v4051_v59 = vld [vmem:[#allocation2 + $0xe8] sm:$0xff]  ;;  %v5543_v40 = vld [vmem:[%s5756_s30 + $0x2d4] ss:$8 sps:$4 sm:$0xff]   ;;  %v693_v57 = vld [vmem:[#allocation2 + $0x520] sm:$0xff] }
 0x197   : > { %v4179_v60 = vld [vmem:[#allocation2 + $0x4e8] sm:$0xff]  ;;  %4569 = vst.msk [vmem:[%s6464_s9 + $0xe0] sm:$0xff] %vm272_vm0, %v4313_v53  ;;  %v4314_v61 = vadd.f32 %v6730_v24, %v4051_v59  ;;  %3794 = vst.msk [vmem:[#allocation2 + $0xf8] sm:$0xff] %vm272_vm0, %v3537_v55  ;;  %2818 = vmatmul.mubr.bf16.gmra.mrb[168].mxu0 %v5529_v41  ;;  %3330 = vmatmul.mubr.bf16.gmra.mrb[168].mxu1 %v5530_v46 }
 0x198   : > { %4697 = vst.msk [vmem:[%s6464_s9 + $0x4e0] sm:$0xff] %vm272_vm0, %v4441_v54  ;;  %v4442_v62 = vadd.f32 %v6730_v24, %v4179_v60  ;;  %3922 = vst.msk [vmem:[#allocation2 + $0x4f8] sm:$0xff] %vm272_vm0, %v3665_v56  ;;  %2825 = vmatprep.mubr.bf16.mxu0 %v5531_v47  ;;  %3337 = vmatprep.mubr.bf16.mxu1 %v5533_v52  ;;  %v5542_v39 = vld [vmem:[%s5756_s30 + $0x6c0] ss:$8 sps:$4 sm:$0xff]  }
 0x199   : > { %4570 = vst.msk [vmem:[%s6464_s9 + $0xe8] sm:$0xff] %vm272_vm0, %v4314_v61  ;;  %v565_v56 = vld [vmem:[#allocation2 + $0x120] sm:$0xff]  ;;  %v566_v60 = vld [vmem:[#allocation2 + $0x128] sm:$0xff] }
 0x19a   : > { %4698 = vst.msk [vmem:[%s6464_s9 + $0x4e8] sm:$0xff] %vm272_vm0, %v4442_v62  ;;  %v2611_v1 = vpop.f32.mrb[64].mxu0  ;;  %v3123_v2 = vpop.f32.mrb[64].mxu1  ;;  %v694_v61 = vld [vmem:[#allocation2 + $0x528] sm:$0xff]  ;;  %v5547_v62 = vld [vmem:[%s5756_s30 + $0x2d0] ss:$8 sps:$4 sm:$0xff]  }
 0x19b   : > { %v3538_v6 = vadd.f32 %v2611_v1, %v561_v63  ;;  %v3666_v7 = vadd.f32 %v3123_v2, %v689_v0  ;;  %v2613_v8 = vpop.f32.mrb[65].mxu0  ;;  %v3125_v9 = vpop.f32.mrb[65].mxu1 }
 0x19c   : > { %v4052_v11 = vld [vmem:[#allocation2 + $0xf0] sm:$0xff]  ;;  %v2614_v13 = vpop.f32.mrb[66].mxu0  ;;  %v3126_v14 = vpop.f32.mrb[66].mxu1  ;;  %v5551_v9 = vld [vmem:[%s5756_s30 + $0x6e4] ss:$8 sps:$4 sm:$0xff]  }
 0x19d   : > { %v4180_v12 = vld [vmem:[#allocation2 + $0x4f0] sm:$0xff]  ;;  %v4315_v16 = vadd.f32 %v6730_v24, %v4052_v11  ;;  %3795 = vst.msk [vmem:[#allocation2 + $0x100] sm:$0xff] %vm272_vm0, %v3538_v6  ;;  %3923 = vst.msk [vmem:[#allocation2 + $0x500] sm:$0xff] %vm272_vm0, %v3666_v7  ;;  %v3539_v18 = vadd.f32 %v2614_v13, %v562_v3  ;;  %v3667_v19 = vadd.f32 %v3126_v14, %v690_v4  ;;  %v2616_v20 = vpop.f32.mrb[67].mxu0  ;;  %v3128_v21 = vpop.f32.mrb[67].mxu1 }
 0x19e   : > { %v4443_v17 = vadd.f32 %v6730_v24, %v4180_v12  ;;  %v4053_v23 = vld [vmem:[#allocation2 + $0xf8] sm:$0xff]  ;;  %v5549_v4 = vld [vmem:[%s5756_s30 + $0x2e4] ss:$8 sps:$4 sm:$0xff]   ;;  %v695_v20 = vld [vmem:[#allocation2 + $0x530] sm:$0xff] }
 0x19f   : > { %v4181_v25 = vld [vmem:[#allocation2 + $0x4f8] sm:$0xff]  ;;  %4571 = vst.msk [vmem:[%s6464_s9 + $0xf0] sm:$0xff] %vm272_vm0, %v4315_v16  ;;  %v4316_v26 = vadd.f32 %v6730_v24, %v4053_v23  ;;  %3796 = vst.msk [vmem:[#allocation2 + $0x108] sm:$0xff] %vm272_vm0, %v3539_v18  ;;  %2826 = vmatmul.mubr.bf16.gmra.mrb[172].mxu0 %v5535_v5  ;;  %3338 = vmatmul.mubr.bf16.gmra.mrb[172].mxu1 %v5536_v22 }
 0x1a0   : > { %4699 = vst.msk [vmem:[%s6464_s9 + $0x4f0] sm:$0xff] %vm272_vm0, %v4443_v17  ;;  %v4444_v27 = vadd.f32 %v6730_v24, %v4181_v25  ;;  %3924 = vst.msk [vmem:[#allocation2 + $0x508] sm:$0xff] %vm272_vm0, %v3667_v19  ;;  %2833 = vmatprep.mubr.bf16.mxu0 %v5537_v10  ;;  %3345 = vmatprep.mubr.bf16.mxu1 %v5539_v15  ;;  %v5548_v3 = vld [vmem:[%s5756_s30 + $0x6d0] ss:$8 sps:$4 sm:$0xff]  }
 0x1a1   : > { %4572 = vst.msk [vmem:[%s6464_s9 + $0xf8] sm:$0xff] %vm272_vm0, %v4316_v26  ;;  %v567_v19 = vld [vmem:[#allocation2 + $0x130] sm:$0xff]  ;;  %v568_v25 = vld [vmem:[#allocation2 + $0x138] sm:$0xff] }
 0x1a2   : > { %4700 = vst.msk [vmem:[%s6464_s9 + $0x4f8] sm:$0xff] %vm272_vm0, %v4444_v27  ;;  %v2619_v30 = vpop.f32.mrb[68].mxu0  ;;  %v3131_v31 = vpop.f32.mrb[68].mxu1  ;;  %v696_v26 = vld [vmem:[#allocation2 + $0x538] sm:$0xff]  ;;  %v5553_v27 = vld [vmem:[%s5756_s30 + $0x2e0] ss:$8 sps:$4 sm:$0xff]  }
 0x1a3   : > { %v3540_v35 = vadd.f32 %v2619_v30, %v563_v28  ;;  %v3668_v36 = vadd.f32 %v3131_v31, %v691_v29  ;;  %v2621_v37 = vpop.f32.mrb[69].mxu0  ;;  %v3133_v38 = vpop.f32.mrb[69].mxu1 }
 0x1a4   : > { %v4054_v41 = vld [vmem:[#allocation2 + $0x100] sm:$0xff]  ;;  %v2622_v43 = vpop.f32.mrb[70].mxu0  ;;  %v3134_v44 = vpop.f32.mrb[70].mxu1  ;;  %v5557_v38 = vld [vmem:[%s5756_s30 + $0x6f4] ss:$8 sps:$4 sm:$0xff]  }
 0x1a5   : > { %v4182_v42 = vld [vmem:[#allocation2 + $0x500] sm:$0xff]  ;;  %v4317_v46 = vadd.f32 %v6730_v24, %v4054_v41  ;;  %3797 = vst.msk [vmem:[#allocation2 + $0x110] sm:$0xff] %vm272_vm0, %v3540_v35  ;;  %3925 = vst.msk [vmem:[#allocation2 + $0x510] sm:$0xff] %vm272_vm0, %v3668_v36  ;;  %v3541_v48 = vadd.f32 %v2622_v43, %v564_v32  ;;  %v3669_v49 = vadd.f32 %v3134_v44, %v692_v33  ;;  %v2624_v50 = vpop.f32.mrb[71].mxu0  ;;  %v3136_v51 = vpop.f32.mrb[71].mxu1 }
 0x1a6   : > { %v4445_v47 = vadd.f32 %v6730_v24, %v4182_v42  ;;  %v4055_v52 = vld [vmem:[#allocation2 + $0x108] sm:$0xff]  ;;  %v5555_v33 = vld [vmem:[%s5756_s30 + $0x2f4] ss:$8 sps:$4 sm:$0xff]   ;;  %v697_v50 = vld [vmem:[#allocation2 + $0x540] sm:$0xff] }
 0x1a7   : > { %v4183_v53 = vld [vmem:[#allocation2 + $0x508] sm:$0xff]  ;;  %4573 = vst.msk [vmem:[%s6464_s9 + $0x100] sm:$0xff] %vm272_vm0, %v4317_v46  ;;  %v4318_v54 = vadd.f32 %v6730_v24, %v4055_v52  ;;  %3798 = vst.msk [vmem:[#allocation2 + $0x118] sm:$0xff] %vm272_vm0, %v3541_v48  ;;  %2834 = vmatmul.mubr.bf16.gmra.mrb[176].mxu0 %v5541_v34  ;;  %3346 = vmatmul.mubr.bf16.gmra.mrb[176].mxu1 %v5542_v39 }
 0x1a8   : > { %4701 = vst.msk [vmem:[%s6464_s9 + $0x500] sm:$0xff] %vm272_vm0, %v4445_v47  ;;  %v4446_v55 = vadd.f32 %v6730_v24, %v4183_v53  ;;  %3926 = vst.msk [vmem:[#allocation2 + $0x518] sm:$0xff] %vm272_vm0, %v3669_v49  ;;  %2841 = vmatprep.mubr.bf16.mxu0 %v5543_v40  ;;  %3353 = vmatprep.mubr.bf16.mxu1 %v5545_v45  ;;  %v5554_v32 = vld [vmem:[%s5756_s30 + $0x6e0] ss:$8 sps:$4 sm:$0xff]  }
 0x1a9   : > { %4574 = vst.msk [vmem:[%s6464_s9 + $0x108] sm:$0xff] %vm272_vm0, %v4318_v54  ;;  %v569_v49 = vld [vmem:[#allocation2 + $0x140] sm:$0xff]  ;;  %v570_v53 = vld [vmem:[#allocation2 + $0x148] sm:$0xff] }
 0x1aa   : > { %4702 = vst.msk [vmem:[%s6464_s9 + $0x508] sm:$0xff] %vm272_vm0, %v4446_v55  ;;  %v2627_v58 = vpop.f32.mrb[72].mxu0  ;;  %v3139_v59 = vpop.f32.mrb[72].mxu1  ;;  %v698_v54 = vld [vmem:[#allocation2 + $0x548] sm:$0xff]  ;;  %v5559_v55 = vld [vmem:[%s5756_s30 + $0x2f0] ss:$8 sps:$4 sm:$0xff]  }
 0x1ab   : > { %v3542_v63 = vadd.f32 %v2627_v58, %v565_v56  ;;  %v3670_v0 = vadd.f32 %v3139_v59, %v693_v57  ;;  %v2629_v1 = vpop.f32.mrb[73].mxu0  ;;  %v3141_v2 = vpop.f32.mrb[73].mxu1 }
 0x1ac   : > { %v4056_v5 = vld [vmem:[#allocation2 + $0x110] sm:$0xff]  ;;  %v2630_v7 = vpop.f32.mrb[74].mxu0  ;;  %v3142_v8 = vpop.f32.mrb[74].mxu1  ;;  %v5563_v2 = vld [vmem:[%s5756_s30 + $0x704] ss:$8 sps:$4 sm:$0xff]  }
 0x1ad   : > { %v4184_v6 = vld [vmem:[#allocation2 + $0x510] sm:$0xff]  ;;  %v4319_v22 = vadd.f32 %v6730_v24, %v4056_v5  ;;  %3799 = vst.msk [vmem:[#allocation2 + $0x120] sm:$0xff] %vm272_vm0, %v3542_v63  ;;  %3927 = vst.msk [vmem:[#allocation2 + $0x520] sm:$0xff] %vm272_vm0, %v3670_v0  ;;  %v3543_v11 = vadd.f32 %v2630_v7, %v566_v60  ;;  %v3671_v12 = vadd.f32 %v3142_v8, %v694_v61  ;;  %v2632_v13 = vpop.f32.mrb[75].mxu0  ;;  %v3144_v14 = vpop.f32.mrb[75].mxu1 }
 0x1ae   : > { %v4447_v10 = vadd.f32 %v6730_v24, %v4184_v6  ;;  %v4057_v15 = vld [vmem:[#allocation2 + $0x118] sm:$0xff]  ;;  %v5561_v61 = vld [vmem:[%s5756_s30 + $0x304] ss:$8 sps:$4 sm:$0xff]   ;;  %v699_v13 = vld [vmem:[#allocation2 + $0x550] sm:$0xff] }
 0x1af   : > { %v4185_v16 = vld [vmem:[#allocation2 + $0x518] sm:$0xff]  ;;  %4575 = vst.msk [vmem:[%s6464_s9 + $0x110] sm:$0xff] %vm272_vm0, %v4319_v22  ;;  %v4320_v17 = vadd.f32 %v6730_v24, %v4057_v15  ;;  %3800 = vst.msk [vmem:[#allocation2 + $0x128] sm:$0xff] %vm272_vm0, %v3543_v11  ;;  %2842 = vmatmul.mubr.bf16.gmra.mrb[180].mxu0 %v5547_v62  ;;  %3354 = vmatmul.mubr.bf16.gmra.mrb[180].mxu1 %v5548_v3 }
 0x1b0   : > { %4703 = vst.msk [vmem:[%s6464_s9 + $0x510] sm:$0xff] %vm272_vm0, %v4447_v10  ;;  %v4448_v18 = vadd.f32 %v6730_v24, %v4185_v16  ;;  %3928 = vst.msk [vmem:[#allocation2 + $0x528] sm:$0xff] %vm272_vm0, %v3671_v12  ;;  %2849 = vmatprep.mubr.bf16.mxu0 %v5549_v4  ;;  %3361 = vmatprep.mubr.bf16.mxu1 %v5551_v9  ;;  %v5560_v60 = vld [vmem:[%s5756_s30 + $0x6f0] ss:$8 sps:$4 sm:$0xff]  }
 0x1b1   : > { %4576 = vst.msk [vmem:[%s6464_s9 + $0x118] sm:$0xff] %vm272_vm0, %v4320_v17  ;;  %v571_v12 = vld [vmem:[#allocation2 + $0x150] sm:$0xff]  ;;  %v572_v16 = vld [vmem:[#allocation2 + $0x158] sm:$0xff] }
 0x1b2   : > { %4704 = vst.msk [vmem:[%s6464_s9 + $0x518] sm:$0xff] %vm272_vm0, %v4448_v18  ;;  %v2635_v21 = vpop.f32.mrb[76].mxu0  ;;  %v3147_v23 = vpop.f32.mrb[76].mxu1  ;;  %v700_v17 = vld [vmem:[#allocation2 + $0x558] sm:$0xff]  ;;  %v5565_v18 = vld [vmem:[%s5756_s30 + $0x300] ss:$8 sps:$4 sm:$0xff]  }
 0x1b3   : > { %v3544_v28 = vadd.f32 %v2635_v21, %v567_v19  ;;  %v3672_v29 = vadd.f32 %v3147_v23, %v695_v20  ;;  %v2637_v30 = vpop.f32.mrb[77].mxu0  ;;  %v3149_v31 = vpop.f32.mrb[77].mxu1 }
 0x1b4   : > { %v4058_v34 = vld [vmem:[#allocation2 + $0x120] sm:$0xff]  ;;  %v2638_v36 = vpop.f32.mrb[78].mxu0  ;;  %v3150_v37 = vpop.f32.mrb[78].mxu1  ;;  %v5569_v31 = vld [vmem:[%s5756_s30 + $0x714] ss:$8 sps:$4 sm:$0xff]  }
 0x1b5   : > { %v4186_v35 = vld [vmem:[#allocation2 + $0x520] sm:$0xff]  ;;  %v4321_v39 = vadd.f32 %v6730_v24, %v4058_v34  ;;  %3801 = vst.msk [vmem:[#allocation2 + $0x130] sm:$0xff] %vm272_vm0, %v3544_v28  ;;  %3929 = vst.msk [vmem:[#allocation2 + $0x530] sm:$0xff] %vm272_vm0, %v3672_v29  ;;  %v3545_v41 = vadd.f32 %v2638_v36, %v568_v25  ;;  %v3673_v42 = vadd.f32 %v3150_v37, %v696_v26  ;;  %v2640_v43 = vpop.f32.mrb[79].mxu0  ;;  %v3152_v44 = vpop.f32.mrb[79].mxu1 }
 0x1b6   : > { %v4449_v40 = vadd.f32 %v6730_v24, %v4186_v35  ;;  %v4059_v45 = vld [vmem:[#allocation2 + $0x128] sm:$0xff]  ;;  %v5567_v26 = vld [vmem:[%s5756_s30 + $0x314] ss:$8 sps:$4 sm:$0xff]   ;;  %v701_v43 = vld [vmem:[#allocation2 + $0x560] sm:$0xff] }
 0x1b7   : > { %v4187_v46 = vld [vmem:[#allocation2 + $0x528] sm:$0xff]  ;;  %4577 = vst.msk [vmem:[%s6464_s9 + $0x120] sm:$0xff] %vm272_vm0, %v4321_v39  ;;  %v4322_v47 = vadd.f32 %v6730_v24, %v4059_v45  ;;  %3802 = vst.msk [vmem:[#allocation2 + $0x138] sm:$0xff] %vm272_vm0, %v3545_v41  ;;  %2850 = vmatmul.mubr.bf16.gmra.mrb[184].mxu0 %v5553_v27  ;;  %3362 = vmatmul.mubr.bf16.gmra.mrb[184].mxu1 %v5554_v32 }
 0x1b8   : > { %4705 = vst.msk [vmem:[%s6464_s9 + $0x520] sm:$0xff] %vm272_vm0, %v4449_v40  ;;  %v4450_v48 = vadd.f32 %v6730_v24, %v4187_v46  ;;  %3930 = vst.msk [vmem:[#allocation2 + $0x538] sm:$0xff] %vm272_vm0, %v3673_v42  ;;  %2857 = vmatprep.mubr.bf16.mxu0 %v5555_v33  ;;  %3369 = vmatprep.mubr.bf16.mxu1 %v5557_v38  ;;  %v5566_v25 = vld [vmem:[%s5756_s30 + $0x700] ss:$8 sps:$4 sm:$0xff]  }
 0x1b9   : > { %4578 = vst.msk [vmem:[%s6464_s9 + $0x128] sm:$0xff] %vm272_vm0, %v4322_v47  ;;  %v573_v42 = vld [vmem:[#allocation2 + $0x160] sm:$0xff]  ;;  %v574_v46 = vld [vmem:[#allocation2 + $0x168] sm:$0xff] }
 0x1ba   : > { %4706 = vst.msk [vmem:[%s6464_s9 + $0x528] sm:$0xff] %vm272_vm0, %v4450_v48  ;;  %v2643_v51 = vpop.f32.mrb[80].mxu0  ;;  %v3155_v52 = vpop.f32.mrb[80].mxu1  ;;  %v702_v47 = vld [vmem:[#allocation2 + $0x568] sm:$0xff]  ;;  %v5571_v48 = vld [vmem:[%s5756_s30 + $0x310] ss:$8 sps:$4 sm:$0xff]  }
 0x1bb   : > { %v3546_v56 = vadd.f32 %v2643_v51, %v569_v49  ;;  %v3674_v57 = vadd.f32 %v3155_v52, %v697_v50  ;;  %v2645_v58 = vpop.f32.mrb[81].mxu0  ;;  %v3157_v59 = vpop.f32.mrb[81].mxu1 }
 0x1bc   : > { %v4060_v62 = vld [vmem:[#allocation2 + $0x130] sm:$0xff]  ;;  %v2646_v0 = vpop.f32.mrb[82].mxu0  ;;  %v3158_v1 = vpop.f32.mrb[82].mxu1  ;;  %v5575_v59 = vld [vmem:[%s5756_s30 + $0x724] ss:$8 sps:$4 sm:$0xff]  }
 0x1bd   : > { %v4188_v63 = vld [vmem:[#allocation2 + $0x530] sm:$0xff]  ;;  %v4323_v3 = vadd.f32 %v6730_v24, %v4060_v62  ;;  %3803 = vst.msk [vmem:[#allocation2 + $0x140] sm:$0xff] %vm272_vm0, %v3546_v56  ;;  %3931 = vst.msk [vmem:[#allocation2 + $0x540] sm:$0xff] %vm272_vm0, %v3674_v57  ;;  %v3547_v5 = vadd.f32 %v2646_v0, %v570_v53  ;;  %v3675_v6 = vadd.f32 %v3158_v1, %v698_v54  ;;  %v2648_v7 = vpop.f32.mrb[83].mxu0  ;;  %v3160_v8 = vpop.f32.mrb[83].mxu1 }
 0x1be   : > { %v4451_v4 = vadd.f32 %v6730_v24, %v4188_v63  ;;  %v4061_v9 = vld [vmem:[#allocation2 + $0x138] sm:$0xff]  ;;  %v5573_v54 = vld [vmem:[%s5756_s30 + $0x324] ss:$8 sps:$4 sm:$0xff]   ;;  %v703_v7 = vld [vmem:[#allocation2 + $0x570] sm:$0xff] }
 0x1bf   : > { %v4189_v22 = vld [vmem:[#allocation2 + $0x538] sm:$0xff]  ;;  %4579 = vst.msk [vmem:[%s6464_s9 + $0x130] sm:$0xff] %vm272_vm0, %v4323_v3  ;;  %v4324_v10 = vadd.f32 %v6730_v24, %v4061_v9  ;;  %3804 = vst.msk [vmem:[#allocation2 + $0x148] sm:$0xff] %vm272_vm0, %v3547_v5  ;;  %2858 = vmatmul.mubr.bf16.gmra.mrb[188].mxu0 %v5559_v55  ;;  %3370 = vmatmul.mubr.bf16.gmra.mrb[188].mxu1 %v5560_v60 }
 0x1c0   : > { %4707 = vst.msk [vmem:[%s6464_s9 + $0x530] sm:$0xff] %vm272_vm0, %v4451_v4  ;;  %v4452_v11 = vadd.f32 %v6730_v24, %v4189_v22  ;;  %3932 = vst.msk [vmem:[#allocation2 + $0x548] sm:$0xff] %vm272_vm0, %v3675_v6  ;;  %2865 = vmatprep.mubr.bf16.mxu0 %v5561_v61  ;;  %3377 = vmatprep.mubr.bf16.mxu1 %v5563_v2  ;;  %v5572_v53 = vld [vmem:[%s5756_s30 + $0x710] ss:$8 sps:$4 sm:$0xff]  }
 0x1c1   : > { %4580 = vst.msk [vmem:[%s6464_s9 + $0x138] sm:$0xff] %vm272_vm0, %v4324_v10  ;;  %v575_v6 = vld [vmem:[#allocation2 + $0x170] sm:$0xff]  ;;  %v576_v22 = vld [vmem:[#allocation2 + $0x178] sm:$0xff] }
 0x1c2   : > { %4708 = vst.msk [vmem:[%s6464_s9 + $0x538] sm:$0xff] %vm272_vm0, %v4452_v11  ;;  %v2651_v14 = vpop.f32.mrb[84].mxu0  ;;  %v3163_v15 = vpop.f32.mrb[84].mxu1  ;;  %v704_v10 = vld [vmem:[#allocation2 + $0x578] sm:$0xff]  ;;  %v5577_v11 = vld [vmem:[%s5756_s30 + $0x320] ss:$8 sps:$4 sm:$0xff]  }
 0x1c3   : > { %v3548_v19 = vadd.f32 %v2651_v14, %v571_v12  ;;  %v3676_v20 = vadd.f32 %v3163_v15, %v699_v13  ;;  %v2653_v21 = vpop.f32.mrb[85].mxu0  ;;  %v3165_v23 = vpop.f32.mrb[85].mxu1 }
 0x1c4   : > { %v4062_v27 = vld [vmem:[#allocation2 + $0x140] sm:$0xff]  ;;  %v2654_v29 = vpop.f32.mrb[86].mxu0  ;;  %v3166_v30 = vpop.f32.mrb[86].mxu1  ;;  %v5581_v23 = vld [vmem:[%s5756_s30 + $0x734] ss:$8 sps:$4 sm:$0xff]  }
 0x1c5   : > { %v4190_v28 = vld [vmem:[#allocation2 + $0x540] sm:$0xff]  ;;  %v4325_v32 = vadd.f32 %v6730_v24, %v4062_v27  ;;  %3805 = vst.msk [vmem:[#allocation2 + $0x150] sm:$0xff] %vm272_vm0, %v3548_v19  ;;  %3933 = vst.msk [vmem:[#allocation2 + $0x550] sm:$0xff] %vm272_vm0, %v3676_v20  ;;  %v3549_v34 = vadd.f32 %v2654_v29, %v572_v16  ;;  %v3677_v35 = vadd.f32 %v3166_v30, %v700_v17  ;;  %v2656_v36 = vpop.f32.mrb[87].mxu0  ;;  %v3168_v37 = vpop.f32.mrb[87].mxu1 }
 0x1c6   : > { %v4453_v33 = vadd.f32 %v6730_v24, %v4190_v28  ;;  %v4063_v38 = vld [vmem:[#allocation2 + $0x148] sm:$0xff]  ;;  %v5579_v17 = vld [vmem:[%s5756_s30 + $0x334] ss:$8 sps:$4 sm:$0xff]   ;;  %v705_v36 = vld [vmem:[#allocation2 + $0x580] sm:$0xff] }
 0x1c7   : > { %v4191_v39 = vld [vmem:[#allocation2 + $0x548] sm:$0xff]  ;;  %4581 = vst.msk [vmem:[%s6464_s9 + $0x140] sm:$0xff] %vm272_vm0, %v4325_v32  ;;  %v4326_v40 = vadd.f32 %v6730_v24, %v4063_v38  ;;  %3806 = vst.msk [vmem:[#allocation2 + $0x158] sm:$0xff] %vm272_vm0, %v3549_v34  ;;  %2866 = vmatmul.mubr.bf16.gmra.mrb[192].mxu0 %v5565_v18  ;;  %3378 = vmatmul.mubr.bf16.gmra.mrb[192].mxu1 %v5566_v25 }
 0x1c8   : > { %4709 = vst.msk [vmem:[%s6464_s9 + $0x540] sm:$0xff] %vm272_vm0, %v4453_v33  ;;  %v4454_v41 = vadd.f32 %v6730_v24, %v4191_v39  ;;  %3934 = vst.msk [vmem:[#allocation2 + $0x558] sm:$0xff] %vm272_vm0, %v3677_v35  ;;  %2873 = vmatprep.mubr.bf16.mxu0 %v5567_v26  ;;  %3385 = vmatprep.mubr.bf16.mxu1 %v5569_v31  ;;  %v5578_v16 = vld [vmem:[%s5756_s30 + $0x720] ss:$8 sps:$4 sm:$0xff]  }
 0x1c9   : > { %4582 = vst.msk [vmem:[%s6464_s9 + $0x148] sm:$0xff] %vm272_vm0, %v4326_v40  ;;  %v577_v35 = vld [vmem:[#allocation2 + $0x180] sm:$0xff]  ;;  %v578_v39 = vld [vmem:[#allocation2 + $0x188] sm:$0xff] }
 0x1ca   : > { %4710 = vst.msk [vmem:[%s6464_s9 + $0x548] sm:$0xff] %vm272_vm0, %v4454_v41  ;;  %v2659_v44 = vpop.f32.mrb[88].mxu0  ;;  %v3171_v45 = vpop.f32.mrb[88].mxu1  ;;  %v706_v40 = vld [vmem:[#allocation2 + $0x588] sm:$0xff]  ;;  %v5583_v41 = vld [vmem:[%s5756_s30 + $0x330] ss:$8 sps:$4 sm:$0xff]  }
 0x1cb   : > { %v3550_v49 = vadd.f32 %v2659_v44, %v573_v42  ;;  %v3678_v50 = vadd.f32 %v3171_v45, %v701_v43  ;;  %v2661_v51 = vpop.f32.mrb[89].mxu0  ;;  %v3173_v52 = vpop.f32.mrb[89].mxu1 }
 0x1cc   : > { %v4064_v55 = vld [vmem:[#allocation2 + $0x150] sm:$0xff]  ;;  %v2662_v57 = vpop.f32.mrb[90].mxu0  ;;  %v3174_v58 = vpop.f32.mrb[90].mxu1  ;;  %v5587_v52 = vld [vmem:[%s5756_s30 + $0x744] ss:$8 sps:$4 sm:$0xff]  }
 0x1cd   : > { %v4192_v56 = vld [vmem:[#allocation2 + $0x550] sm:$0xff]  ;;  %v4327_v60 = vadd.f32 %v6730_v24, %v4064_v55  ;;  %3807 = vst.msk [vmem:[#allocation2 + $0x160] sm:$0xff] %vm272_vm0, %v3550_v49  ;;  %3935 = vst.msk [vmem:[#allocation2 + $0x560] sm:$0xff] %vm272_vm0, %v3678_v50  ;;  %v3551_v62 = vadd.f32 %v2662_v57, %v574_v46  ;;  %v3679_v63 = vadd.f32 %v3174_v58, %v702_v47  ;;  %v2664_v0 = vpop.f32.mrb[91].mxu0  ;;  %v3176_v1 = vpop.f32.mrb[91].mxu1 }
 0x1ce   : > { %v4455_v61 = vadd.f32 %v6730_v24, %v4192_v56  ;;  %v4065_v2 = vld [vmem:[#allocation2 + $0x158] sm:$0xff]  ;;  %v5585_v47 = vld [vmem:[%s5756_s30 + $0x344] ss:$8 sps:$4 sm:$0xff]   ;;  %v707_v0 = vld [vmem:[#allocation2 + $0x590] sm:$0xff] }
 0x1cf   : > { %v4193_v3 = vld [vmem:[#allocation2 + $0x558] sm:$0xff]  ;;  %4583 = vst.msk [vmem:[%s6464_s9 + $0x150] sm:$0xff] %vm272_vm0, %v4327_v60  ;;  %v4328_v4 = vadd.f32 %v6730_v24, %v4065_v2  ;;  %3808 = vst.msk [vmem:[#allocation2 + $0x168] sm:$0xff] %vm272_vm0, %v3551_v62  ;;  %2874 = vmatmul.mubr.bf16.gmra.mrb[196].mxu0 %v5571_v48  ;;  %3386 = vmatmul.mubr.bf16.gmra.mrb[196].mxu1 %v5572_v53 }
 0x1d0   : > { %4711 = vst.msk [vmem:[%s6464_s9 + $0x550] sm:$0xff] %vm272_vm0, %v4455_v61  ;;  %v4456_v5 = vadd.f32 %v6730_v24, %v4193_v3  ;;  %3936 = vst.msk [vmem:[#allocation2 + $0x568] sm:$0xff] %vm272_vm0, %v3679_v63  ;;  %2881 = vmatprep.mubr.bf16.mxu0 %v5573_v54  ;;  %3393 = vmatprep.mubr.bf16.mxu1 %v5575_v59  ;;  %v5584_v46 = vld [vmem:[%s5756_s30 + $0x730] ss:$8 sps:$4 sm:$0xff]  }
 0x1d1   : > { %4584 = vst.msk [vmem:[%s6464_s9 + $0x158] sm:$0xff] %vm272_vm0, %v4328_v4  ;;  %v579_v63 = vld [vmem:[#allocation2 + $0x190] sm:$0xff]  ;;  %v580_v3 = vld [vmem:[#allocation2 + $0x198] sm:$0xff] }
 0x1d2   : > { %4712 = vst.msk [vmem:[%s6464_s9 + $0x558] sm:$0xff] %vm272_vm0, %v4456_v5  ;;  %v2667_v8 = vpop.f32.mrb[92].mxu0  ;;  %v3179_v9 = vpop.f32.mrb[92].mxu1  ;;  %v708_v4 = vld [vmem:[#allocation2 + $0x598] sm:$0xff]  ;;  %v5589_v5 = vld [vmem:[%s5756_s30 + $0x340] ss:$8 sps:$4 sm:$0xff]  }
 0x1d3   : > { %v3552_v12 = vadd.f32 %v2667_v8, %v575_v6  ;;  %v3680_v13 = vadd.f32 %v3179_v9, %v703_v7  ;;  %v2669_v14 = vpop.f32.mrb[93].mxu0  ;;  %v3181_v15 = vpop.f32.mrb[93].mxu1 }
 0x1d4   : > { %v4066_v18 = vld [vmem:[#allocation2 + $0x160] sm:$0xff]  ;;  %v2670_v20 = vpop.f32.mrb[94].mxu0  ;;  %v3182_v21 = vpop.f32.mrb[94].mxu1  ;;  %v5593_v15 = vld [vmem:[%s5756_s30 + $0x754] ss:$8 sps:$4 sm:$0xff]  }
 0x1d5   : > { %v4194_v19 = vld [vmem:[#allocation2 + $0x560] sm:$0xff]  ;;  %v4329_v25 = vadd.f32 %v6730_v24, %v4066_v18  ;;  %3809 = vst.msk [vmem:[#allocation2 + $0x170] sm:$0xff] %vm272_vm0, %v3552_v12  ;;  %3937 = vst.msk [vmem:[#allocation2 + $0x570] sm:$0xff] %vm272_vm0, %v3680_v13  ;;  %v3553_v27 = vadd.f32 %v2670_v20, %v576_v22  ;;  %v3681_v28 = vadd.f32 %v3182_v21, %v704_v10  ;;  %v2672_v29 = vpop.f32.mrb[95].mxu0  ;;  %v3184_v30 = vpop.f32.mrb[95].mxu1 }
 0x1d6   : > { %v4457_v26 = vadd.f32 %v6730_v24, %v4194_v19  ;;  %v4067_v31 = vld [vmem:[#allocation2 + $0x168] sm:$0xff]  ;;  %v5591_v10 = vld [vmem:[%s5756_s30 + $0x354] ss:$8 sps:$4 sm:$0xff]   ;;  %v709_v29 = vld [vmem:[#allocation2 + $0x5a0] sm:$0xff] }
 0x1d7   : > { %v4195_v32 = vld [vmem:[#allocation2 + $0x568] sm:$0xff]  ;;  %4585 = vst.msk [vmem:[%s6464_s9 + $0x160] sm:$0xff] %vm272_vm0, %v4329_v25  ;;  %v4330_v33 = vadd.f32 %v6730_v24, %v4067_v31  ;;  %3810 = vst.msk [vmem:[#allocation2 + $0x178] sm:$0xff] %vm272_vm0, %v3553_v27  ;;  %2882 = vmatmul.mubr.bf16.gmra.mrb[200].mxu0 %v5577_v11  ;;  %3394 = vmatmul.mubr.bf16.gmra.mrb[200].mxu1 %v5578_v16 }
 0x1d8   : > { %4713 = vst.msk [vmem:[%s6464_s9 + $0x560] sm:$0xff] %vm272_vm0, %v4457_v26  ;;  %v4458_v34 = vadd.f32 %v6730_v24, %v4195_v32  ;;  %3938 = vst.msk [vmem:[#allocation2 + $0x578] sm:$0xff] %vm272_vm0, %v3681_v28  ;;  %2889 = vmatprep.mubr.bf16.mxu0 %v5579_v17  ;;  %3401 = vmatprep.mubr.bf16.mxu1 %v5581_v23  ;;  %v5590_v22 = vld [vmem:[%s5756_s30 + $0x740] ss:$8 sps:$4 sm:$0xff]  }
 0x1d9   : > { %4586 = vst.msk [vmem:[%s6464_s9 + $0x168] sm:$0xff] %vm272_vm0, %v4330_v33  ;;  %v581_v28 = vld [vmem:[#allocation2 + $0x1a0] sm:$0xff]  ;;  %v582_v32 = vld [vmem:[#allocation2 + $0x1a8] sm:$0xff] }
 0x1da   : > { %4714 = vst.msk [vmem:[%s6464_s9 + $0x568] sm:$0xff] %vm272_vm0, %v4458_v34  ;;  %v2675_v37 = vpop.f32.mrb[96].mxu0  ;;  %v3187_v38 = vpop.f32.mrb[96].mxu1  ;;  %v710_v33 = vld [vmem:[#allocation2 + $0x5a8] sm:$0xff]  ;;  %v5595_v34 = vld [vmem:[%s5756_s30 + $0x350] ss:$8 sps:$4 sm:$0xff]  }
 0x1db   : > { %v3554_v42 = vadd.f32 %v2675_v37, %v577_v35  ;;  %v3682_v43 = vadd.f32 %v3187_v38, %v705_v36  ;;  %v2677_v44 = vpop.f32.mrb[97].mxu0  ;;  %v3189_v45 = vpop.f32.mrb[97].mxu1 }
 0x1dc   : > { %v4068_v48 = vld [vmem:[#allocation2 + $0x170] sm:$0xff]  ;;  %v2678_v50 = vpop.f32.mrb[98].mxu0  ;;  %v3190_v51 = vpop.f32.mrb[98].mxu1  ;;  %v5599_v45 = vld [vmem:[%s5756_s30 + $0x764] ss:$8 sps:$4 sm:$0xff]  }
 0x1dd   : > { %v4196_v49 = vld [vmem:[#allocation2 + $0x570] sm:$0xff]  ;;  %v4331_v53 = vadd.f32 %v6730_v24, %v4068_v48  ;;  %3811 = vst.msk [vmem:[#allocation2 + $0x180] sm:$0xff] %vm272_vm0, %v3554_v42  ;;  %3939 = vst.msk [vmem:[#allocation2 + $0x580] sm:$0xff] %vm272_vm0, %v3682_v43  ;;  %v3555_v55 = vadd.f32 %v2678_v50, %v578_v39  ;;  %v3683_v56 = vadd.f32 %v3190_v51, %v706_v40  ;;  %v2680_v57 = vpop.f32.mrb[99].mxu0  ;;  %v3192_v58 = vpop.f32.mrb[99].mxu1 }
 0x1de   : > { %v4459_v54 = vadd.f32 %v6730_v24, %v4196_v49  ;;  %v4069_v59 = vld [vmem:[#allocation2 + $0x178] sm:$0xff]  ;;  %v5597_v40 = vld [vmem:[%s5756_s30 + $0x364] ss:$8 sps:$4 sm:$0xff]   ;;  %v711_v57 = vld [vmem:[#allocation2 + $0x5b0] sm:$0xff] }
 0x1df   : > { %v4197_v60 = vld [vmem:[#allocation2 + $0x578] sm:$0xff]  ;;  %4587 = vst.msk [vmem:[%s6464_s9 + $0x170] sm:$0xff] %vm272_vm0, %v4331_v53  ;;  %v4332_v61 = vadd.f32 %v6730_v24, %v4069_v59  ;;  %3812 = vst.msk [vmem:[#allocation2 + $0x188] sm:$0xff] %vm272_vm0, %v3555_v55  ;;  %2890 = vmatmul.mubr.bf16.gmra.mrb[204].mxu0 %v5583_v41  ;;  %3402 = vmatmul.mubr.bf16.gmra.mrb[204].mxu1 %v5584_v46 }
 0x1e0   : > { %4715 = vst.msk [vmem:[%s6464_s9 + $0x570] sm:$0xff] %vm272_vm0, %v4459_v54  ;;  %v4460_v62 = vadd.f32 %v6730_v24, %v4197_v60  ;;  %3940 = vst.msk [vmem:[#allocation2 + $0x588] sm:$0xff] %vm272_vm0, %v3683_v56  ;;  %2897 = vmatprep.mubr.bf16.mxu0 %v5585_v47  ;;  %3409 = vmatprep.mubr.bf16.mxu1 %v5587_v52  ;;  %v5596_v39 = vld [vmem:[%s5756_s30 + $0x750] ss:$8 sps:$4 sm:$0xff]  }
 0x1e1   : > { %4588 = vst.msk [vmem:[%s6464_s9 + $0x178] sm:$0xff] %vm272_vm0, %v4332_v61  ;;  %v583_v56 = vld [vmem:[#allocation2 + $0x1b0] sm:$0xff]  ;;  %v712_v60 = vld [vmem:[#allocation2 + $0x5b8] sm:$0xff]  ;;  %v5601_v61 = vld [vmem:[%s5756_s30 + $0x360] ss:$8 sps:$4 sm:$0xff]  }
 0x1e2   : > { %4716 = vst.msk [vmem:[%s6464_s9 + $0x578] sm:$0xff] %vm272_vm0, %v4460_v62  ;;  %v2683_v1 = vpop.f32.mrb[100].mxu0  ;;  %v3195_v2 = vpop.f32.mrb[100].mxu1 }
 0x1e3   : > { %v3556_v6 = vadd.f32 %v2683_v1, %v579_v63  ;;  %v3684_v7 = vadd.f32 %v3195_v2, %v707_v0  ;;  %v2685_v8 = vpop.f32.mrb[101].mxu0  ;;  %v3197_v9 = vpop.f32.mrb[101].mxu1  ;;  %v5602_v2 = vld [vmem:[%s5756_s30 + $0x760] ss:$8 sps:$4 sm:$0xff]  }
 0x1e4   : > { %v4070_v11 = vld [vmem:[#allocation2 + $0x180] sm:$0xff]  ;;  %v2686_v13 = vpop.f32.mrb[102].mxu0  ;;  %v3198_v14 = vpop.f32.mrb[102].mxu1  ;;  %v5605_v8 = vld [vmem:[%s5756_s30 + $0x774] ss:$8 sps:$4 sm:$0xff]  }
 0x1e5   : > { %v4198_v12 = vld [vmem:[#allocation2 + $0x580] sm:$0xff]  ;;  %v4333_v16 = vadd.f32 %v6730_v24, %v4070_v11  ;;  %3813 = vst.msk [vmem:[#allocation2 + $0x190] sm:$0xff] %vm272_vm0, %v3556_v6  ;;  %3941 = vst.msk [vmem:[#allocation2 + $0x590] sm:$0xff] %vm272_vm0, %v3684_v7  ;;  %v3557_v18 = vadd.f32 %v2686_v13, %v580_v3  ;;  %v3685_v19 = vadd.f32 %v3198_v14, %v708_v4  ;;  %v2688_v20 = vpop.f32.mrb[103].mxu0  ;;  %v3200_v21 = vpop.f32.mrb[103].mxu1 }
 0x1e6   : > { %v4461_v17 = vadd.f32 %v6730_v24, %v4198_v12  ;;  %v4071_v23 = vld [vmem:[#allocation2 + $0x188] sm:$0xff]  ;;  %v5603_v3 = vld [vmem:[%s5756_s30 + $0x374] ss:$8 sps:$4 sm:$0xff]   ;;  %v6995_v9 = vld [vmem:[%s7656_s2] ss:$0 sm:$0xff] }
 0x1e7   : > { %v4199_v25 = vld [vmem:[#allocation2 + $0x588] sm:$0xff]  ;;  %4589 = vst.msk [vmem:[%s6464_s9 + $0x180] sm:$0xff] %vm272_vm0, %v4333_v16  ;;  %v4334_v26 = vadd.f32 %v6730_v24, %v4071_v23  ;;  %3814 = vst.msk [vmem:[#allocation2 + $0x198] sm:$0xff] %vm272_vm0, %v3557_v18  ;;  %2898 = vmatmul.mubr.bf16.gmra.mrb[208].mxu0 %v5589_v5  ;;  %3410 = vmatmul.mubr.bf16.gmra.mrb[208].mxu1 %v5590_v22  ;;  %v713_v20 = vld [vmem:[#allocation2 + $0x5c0] sm:$0xff] }
 0x1e8   : > { %4717 = vst.msk [vmem:[%s6464_s9 + $0x580] sm:$0xff] %vm272_vm0, %v4461_v17  ;;  %v4462_v27 = vadd.f32 %v6730_v24, %v4199_v25  ;;  %3942 = vst.msk [vmem:[#allocation2 + $0x598] sm:$0xff] %vm272_vm0, %v3685_v19  ;;  %2905 = vmatprep.mubr.bf16.mxu0 %v5591_v10  ;;  %3417 = vmatprep.mubr.bf16.mxu1 %v5593_v15  ;;  %v585_v19 = vld [vmem:[#allocation2 + $0x1c0] sm:$0xff]  ;;  %v586_v25 = vld [vmem:[#allocation2 + $0x1c8] sm:$0xff] }
 0x1e9   : > { %4590 = vst.msk [vmem:[%s6464_s9 + $0x188] sm:$0xff] %vm272_vm0, %v4334_v26  ;;  %v714_v26 = vld [vmem:[#allocation2 + $0x5c8] sm:$0xff] }
 0x1ea   : > { %4718 = vst.msk [vmem:[%s6464_s9 + $0x588] sm:$0xff] %vm272_vm0, %v4462_v27  ;;  %v2691_v30 = vpop.f32.mrb[104].mxu0  ;;  %v3203_v31 = vpop.f32.mrb[104].mxu1  ;;  %v5607_v27 = vld [vmem:[%s5756_s30 + $0x370] ss:$8 sps:$4 sm:$0xff]  }
 0x1eb   : > { %v3558_v35 = vadd.f32 %v2691_v30, %v581_v28  ;;  %v3686_v36 = vadd.f32 %v3203_v31, %v709_v29  ;;  %v2693_v37 = vpop.f32.mrb[105].mxu0  ;;  %v3205_v38 = vpop.f32.mrb[105].mxu1 }
 0x1ec   : > { %v4072_v41 = vld [vmem:[#allocation2 + $0x190] sm:$0xff]  ;;  %v2694_v43 = vpop.f32.mrb[106].mxu0  ;;  %v3206_v44 = vpop.f32.mrb[106].mxu1  ;;  %v5611_v38 = vld [vmem:[%s5756_s30 + $0x784] ss:$8 sps:$4 sm:$0xff]  }
 0x1ed   : > { %v4200_v42 = vld [vmem:[#allocation2 + $0x590] sm:$0xff]  ;;  %v4335_v46 = vadd.f32 %v6730_v24, %v4072_v41  ;;  %3815 = vst.msk [vmem:[#allocation2 + $0x1a0] sm:$0xff] %vm272_vm0, %v3558_v35  ;;  %3943 = vst.msk [vmem:[#allocation2 + $0x5a0] sm:$0xff] %vm272_vm0, %v3686_v36  ;;  %v3559_v48 = vadd.f32 %v2694_v43, %v582_v32  ;;  %v3687_v49 = vadd.f32 %v3206_v44, %v710_v33  ;;  %v2696_v50 = vpop.f32.mrb[107].mxu0  ;;  %v3208_v51 = vpop.f32.mrb[107].mxu1 }
 0x1ee   : > { %v4463_v47 = vadd.f32 %v6730_v24, %v4200_v42  ;;  %v4073_v52 = vld [vmem:[#allocation2 + $0x198] sm:$0xff]  ;;  %v5609_v33 = vld [vmem:[%s5756_s30 + $0x384] ss:$8 sps:$4 sm:$0xff]   ;;  %v715_v50 = vld [vmem:[#allocation2 + $0x5d0] sm:$0xff] }
 0x1ef   : > { %v4201_v53 = vld [vmem:[#allocation2 + $0x598] sm:$0xff]  ;;  %4591 = vst.msk [vmem:[%s6464_s9 + $0x190] sm:$0xff] %vm272_vm0, %v4335_v46  ;;  %v4336_v54 = vadd.f32 %v6730_v24, %v4073_v52  ;;  %3816 = vst.msk [vmem:[#allocation2 + $0x1a8] sm:$0xff] %vm272_vm0, %v3559_v48  ;;  %2906 = vmatmul.mubr.bf16.gmra.mrb[212].mxu0 %v5595_v34  ;;  %3418 = vmatmul.mubr.bf16.gmra.mrb[212].mxu1 %v5596_v39 }
 0x1f0   : > { %4719 = vst.msk [vmem:[%s6464_s9 + $0x590] sm:$0xff] %vm272_vm0, %v4463_v47  ;;  %v4464_v55 = vadd.f32 %v6730_v24, %v4201_v53  ;;  %3944 = vst.msk [vmem:[#allocation2 + $0x5a8] sm:$0xff] %vm272_vm0, %v3687_v49  ;;  %2913 = vmatprep.mubr.bf16.mxu0 %v5597_v40  ;;  %3425 = vmatprep.mubr.bf16.mxu1 %v5599_v45  ;;  %v584_v24 = vld [vmem:[#allocation2 + $0x1b8] sm:$0xff]  ;;  %v587_v49 = vld [vmem:[#allocation2 + $0x1d0] sm:$0xff] }
 0x1f1   : > { %4592 = vst.msk [vmem:[%s6464_s9 + $0x198] sm:$0xff] %vm272_vm0, %v4336_v54  ;;  %v5608_v32 = vld [vmem:[%s5756_s30 + $0x770] ss:$8 sps:$4 sm:$0xff]  }
 0x1f2   : > { %4720 = vst.msk [vmem:[%s6464_s9 + $0x598] sm:$0xff] %vm272_vm0, %v4464_v55  ;;  %v2699_v58 = vpop.f32.mrb[108].mxu0  ;;  %v3211_v59 = vpop.f32.mrb[108].mxu1  ;;  %v588_v53 = vld [vmem:[#allocation2 + $0x1d8] sm:$0xff]  ;;  %v5613_v55 = vld [vmem:[%s5756_s30 + $0x380] ss:$8 sps:$4 sm:$0xff]  }
 0x1f3   : > { %v3560_v62 = vadd.f32 %v2699_v58, %v583_v56  ;;  %v3688_v63 = vadd.f32 %v3211_v59, %v711_v57  ;;  %v2701_v0 = vpop.f32.mrb[109].mxu0  ;;  %v3213_v1 = vpop.f32.mrb[109].mxu1  ;;  %v716_v54 = vld [vmem:[#allocation2 + $0x5d8] sm:$0xff] }
 0x1f4   : > { %v4074_v4 = vld [vmem:[#allocation2 + $0x1a0] sm:$0xff]  ;;  %v2702_v6 = vpop.f32.mrb[110].mxu0  ;;  %v3214_v7 = vpop.f32.mrb[110].mxu1  ;;  %v5617_v1 = vld [vmem:[%s5756_s30 + $0x794] ss:$8 sps:$4 sm:$0xff]  }
 0x1f5   : > { %v4202_v5 = vld [vmem:[#allocation2 + $0x5a0] sm:$0xff]  ;;  %v4337_v22 = vadd.f32 %v6995_v9, %v4074_v4  ;;  %3817 = vst.msk [vmem:[#allocation2 + $0x1b0] sm:$0xff] %vm272_vm0, %v3560_v62  ;;  %3945 = vst.msk [vmem:[#allocation2 + $0x5b0] sm:$0xff] %vm272_vm0, %v3688_v63  ;;  %v3561_v11 = vadd.f32 %v2702_v6, %v584_v24  ;;  %v3689_v12 = vadd.f32 %v3214_v7, %v712_v60  ;;  %v2704_v13 = vpop.f32.mrb[111].mxu0  ;;  %v3216_v14 = vpop.f32.mrb[111].mxu1 }
 0x1f6   : > { %v4465_v10 = vadd.f32 %v6995_v9, %v4202_v5  ;;  %v4075_v15 = vld [vmem:[#allocation2 + $0x1a8] sm:$0xff]  ;;  %v5615_v60 = vld [vmem:[%s5756_s30 + $0x394] ss:$8 sps:$4 sm:$0xff]   ;;  %v717_v13 = vld [vmem:[#allocation2 + $0x5e0] sm:$0xff] }
 0x1f7   : > { %v4203_v16 = vld [vmem:[#allocation2 + $0x5a8] sm:$0xff]  ;;  %4593 = vst.msk [vmem:[%s6464_s9 + $0x1a0] sm:$0xff] %vm272_vm0, %v4337_v22  ;;  %v4338_v17 = vadd.f32 %v6995_v9, %v4075_v15  ;;  %3818 = vst.msk [vmem:[#allocation2 + $0x1b8] sm:$0xff] %vm272_vm0, %v3561_v11  ;;  %2914 = vmatmul.mubr.bf16.gmra.mrb[216].mxu0 %v5601_v61  ;;  %3426 = vmatmul.mubr.bf16.gmra.mrb[216].mxu1 %v5602_v2 }
 0x1f8   : > { %4721 = vst.msk [vmem:[%s6464_s9 + $0x5a0] sm:$0xff] %vm272_vm0, %v4465_v10  ;;  %v4466_v18 = vadd.f32 %v6995_v9, %v4203_v16  ;;  %3946 = vst.msk [vmem:[#allocation2 + $0x5b8] sm:$0xff] %vm272_vm0, %v3689_v12  ;;  %2921 = vmatprep.mubr.bf16.mxu0 %v5603_v3  ;;  %3433 = vmatprep.mubr.bf16.mxu1 %v5605_v8  ;;  %v5614_v24 = vld [vmem:[%s5756_s30 + $0x780] ss:$8 sps:$4 sm:$0xff]  }
 0x1f9   : > { %4594 = vst.msk [vmem:[%s6464_s9 + $0x1a8] sm:$0xff] %vm272_vm0, %v4338_v17  ;;  %v589_v12 = vld [vmem:[#allocation2 + $0x1e0] sm:$0xff]  ;;  %v590_v16 = vld [vmem:[#allocation2 + $0x1e8] sm:$0xff] }
 0x1fa   : > { %4722 = vst.msk [vmem:[%s6464_s9 + $0x5a8] sm:$0xff] %vm272_vm0, %v4466_v18  ;;  %v2707_v21 = vpop.f32.mrb[112].mxu0  ;;  %v3219_v23 = vpop.f32.mrb[112].mxu1  ;;  %v718_v17 = vld [vmem:[#allocation2 + $0x5e8] sm:$0xff]  ;;  %v5619_v18 = vld [vmem:[%s5756_s30 + $0x390] ss:$8 sps:$4 sm:$0xff]  }
 0x1fb   : > { %v3562_v28 = vadd.f32 %v2707_v21, %v585_v19  ;;  %v3690_v29 = vadd.f32 %v3219_v23, %v713_v20  ;;  %v2709_v30 = vpop.f32.mrb[113].mxu0  ;;  %v3221_v31 = vpop.f32.mrb[113].mxu1 }
 0x1fc   : > { %v4076_v34 = vld [vmem:[#allocation2 + $0x1b0] sm:$0xff]  ;;  %v2710_v36 = vpop.f32.mrb[114].mxu0  ;;  %v3222_v37 = vpop.f32.mrb[114].mxu1  ;;  %v5623_v31 = vld [vmem:[%s5756_s30 + $0x7a4] ss:$8 sps:$4 sm:$0xff]  }
 0x1fd   : > { %v4204_v35 = vld [vmem:[#allocation2 + $0x5b0] sm:$0xff]  ;;  %v4339_v39 = vadd.f32 %v6995_v9, %v4076_v34  ;;  %3819 = vst.msk [vmem:[#allocation2 + $0x1c0] sm:$0xff] %vm272_vm0, %v3562_v28  ;;  %3947 = vst.msk [vmem:[#allocation2 + $0x5c0] sm:$0xff] %vm272_vm0, %v3690_v29  ;;  %v3563_v41 = vadd.f32 %v2710_v36, %v586_v25  ;;  %v3691_v42 = vadd.f32 %v3222_v37, %v714_v26  ;;  %v2712_v43 = vpop.f32.mrb[115].mxu0  ;;  %v3224_v44 = vpop.f32.mrb[115].mxu1 }
 0x1fe   : > { %v4467_v40 = vadd.f32 %v6995_v9, %v4204_v35  ;;  %v4077_v45 = vld [vmem:[#allocation2 + $0x1b8] sm:$0xff]  ;;  %v5621_v26 = vld [vmem:[%s5756_s30 + $0x3a4] ss:$8 sps:$4 sm:$0xff]   ;;  %v719_v43 = vld [vmem:[#allocation2 + $0x5f0] sm:$0xff] }
 0x1ff   : > { %v4205_v46 = vld [vmem:[#allocation2 + $0x5b8] sm:$0xff]  ;;  %4595 = vst.msk [vmem:[%s6464_s9 + $0x1b0] sm:$0xff] %vm272_vm0, %v4339_v39  ;;  %v4340_v47 = vadd.f32 %v6995_v9, %v4077_v45  ;;  %3820 = vst.msk [vmem:[#allocation2 + $0x1c8] sm:$0xff] %vm272_vm0, %v3563_v41  ;;  %2922 = vmatmul.mubr.bf16.gmra.mrb[220].mxu0 %v5607_v27  ;;  %3434 = vmatmul.mubr.bf16.gmra.mrb[220].mxu1 %v5608_v32 }
 0x200   : > { %4723 = vst.msk [vmem:[%s6464_s9 + $0x5b0] sm:$0xff] %vm272_vm0, %v4467_v40  ;;  %v4468_v48 = vadd.f32 %v6995_v9, %v4205_v46  ;;  %3948 = vst.msk [vmem:[#allocation2 + $0x5c8] sm:$0xff] %vm272_vm0, %v3691_v42  ;;  %2929 = vmatprep.mubr.bf16.mxu0 %v5609_v33  ;;  %3441 = vmatprep.mubr.bf16.mxu1 %v5611_v38  ;;  %v5620_v25 = vld [vmem:[%s5756_s30 + $0x790] ss:$8 sps:$4 sm:$0xff]  }
 0x201   : > { %4596 = vst.msk [vmem:[%s6464_s9 + $0x1b8] sm:$0xff] %vm272_vm0, %v4340_v47  ;;  %v591_v42 = vld [vmem:[#allocation2 + $0x1f0] sm:$0xff]  ;;  %v592_v46 = vld [vmem:[#allocation2 + $0x1f8] sm:$0xff] }
 0x202   : > { %4724 = vst.msk [vmem:[%s6464_s9 + $0x5b8] sm:$0xff] %vm272_vm0, %v4468_v48  ;;  %v2715_v51 = vpop.f32.mrb[116].mxu0  ;;  %v3227_v52 = vpop.f32.mrb[116].mxu1  ;;  %v720_v47 = vld [vmem:[#allocation2 + $0x5f8] sm:$0xff]  ;;  %v5625_v48 = vld [vmem:[%s5756_s30 + $0x3a0] ss:$8 sps:$4 sm:$0xff]  }
 0x203   : > { %v3564_v56 = vadd.f32 %v2715_v51, %v587_v49  ;;  %v3692_v57 = vadd.f32 %v3227_v52, %v715_v50  ;;  %v2717_v58 = vpop.f32.mrb[117].mxu0  ;;  %v3229_v59 = vpop.f32.mrb[117].mxu1 }
 0x204   : > { %v4078_v61 = vld [vmem:[#allocation2 + $0x1c0] sm:$0xff]  ;;  %v2718_v63 = vpop.f32.mrb[118].mxu0  ;;  %v3230_v0 = vpop.f32.mrb[118].mxu1  ;;  %v5629_v59 = vld [vmem:[%s5756_s30 + $0x7b4] ss:$8 sps:$4 sm:$0xff]  }
 0x205   : > { %v4206_v62 = vld [vmem:[#allocation2 + $0x5c0] sm:$0xff]  ;;  %v4341_v2 = vadd.f32 %v6995_v9, %v4078_v61  ;;  %3821 = vst.msk [vmem:[#allocation2 + $0x1d0] sm:$0xff] %vm272_vm0, %v3564_v56  ;;  %3949 = vst.msk [vmem:[#allocation2 + $0x5d0] sm:$0xff] %vm272_vm0, %v3692_v57  ;;  %v3565_v4 = vadd.f32 %v2718_v63, %v588_v53  ;;  %v3693_v5 = vadd.f32 %v3230_v0, %v716_v54  ;;  %v2720_v6 = vpop.f32.mrb[119].mxu0  ;;  %v3232_v7 = vpop.f32.mrb[119].mxu1 }
 0x206   : > { %v4469_v3 = vadd.f32 %v6995_v9, %v4206_v62  ;;  %v4079_v8 = vld [vmem:[#allocation2 + $0x1c8] sm:$0xff]  ;;  %v5627_v54 = vld [vmem:[%s5756_s30 + $0x3b4] ss:$8 sps:$4 sm:$0xff]   ;;  %v721_v6 = vld [vmem:[#allocation2 + $0x600] sm:$0xff] }
 0x207   : > { %v4207_v22 = vld [vmem:[#allocation2 + $0x5c8] sm:$0xff]  ;;  %4597 = vst.msk [vmem:[%s6464_s9 + $0x1c0] sm:$0xff] %vm272_vm0, %v4341_v2  ;;  %v4342_v10 = vadd.f32 %v6995_v9, %v4079_v8  ;;  %3822 = vst.msk [vmem:[#allocation2 + $0x1d8] sm:$0xff] %vm272_vm0, %v3565_v4  ;;  %2930 = vmatmul.mubr.bf16.gmra.mrb[224].mxu0 %v5613_v55  ;;  %3442 = vmatmul.mubr.bf16.gmra.mrb[224].mxu1 %v5614_v24 }
 0x208   : > { %4725 = vst.msk [vmem:[%s6464_s9 + $0x5c0] sm:$0xff] %vm272_vm0, %v4469_v3  ;;  %v4470_v11 = vadd.f32 %v6995_v9, %v4207_v22  ;;  %3950 = vst.msk [vmem:[#allocation2 + $0x5d8] sm:$0xff] %vm272_vm0, %v3693_v5  ;;  %2937 = vmatprep.mubr.bf16.mxu0 %v5615_v60  ;;  %3449 = vmatprep.mubr.bf16.mxu1 %v5617_v1  ;;  %v5626_v53 = vld [vmem:[%s5756_s30 + $0x7a0] ss:$8 sps:$4 sm:$0xff]  }
 0x209   : > { %4598 = vst.msk [vmem:[%s6464_s9 + $0x1c8] sm:$0xff] %vm272_vm0, %v4342_v10  ;;  %v593_v5 = vld [vmem:[#allocation2 + $0x200] sm:$0xff]  ;;  %v594_v22 = vld [vmem:[#allocation2 + $0x208] sm:$0xff] }
 0x20a   : > { %4726 = vst.msk [vmem:[%s6464_s9 + $0x5c8] sm:$0xff] %vm272_vm0, %v4470_v11  ;;  %v2723_v14 = vpop.f32.mrb[120].mxu0  ;;  %v3235_v15 = vpop.f32.mrb[120].mxu1  ;;  %v722_v10 = vld [vmem:[#allocation2 + $0x608] sm:$0xff]  ;;  %v5631_v11 = vld [vmem:[%s5756_s30 + $0x3b0] ss:$8 sps:$4 sm:$0xff]  }
 0x20b   : > { %v3566_v19 = vadd.f32 %v2723_v14, %v589_v12  ;;  %v3694_v20 = vadd.f32 %v3235_v15, %v717_v13  ;;  %v2725_v21 = vpop.f32.mrb[121].mxu0  ;;  %v3237_v23 = vpop.f32.mrb[121].mxu1 }
 0x20c   : > { %v4080_v27 = vld [vmem:[#allocation2 + $0x1d0] sm:$0xff]  ;;  %v2726_v29 = vpop.f32.mrb[122].mxu0  ;;  %v3238_v30 = vpop.f32.mrb[122].mxu1  ;;  %v5635_v23 = vld [vmem:[%s5756_s30 + $0x7c4] ss:$8 sps:$4 sm:$0xff]  }
 0x20d   : > { %v4208_v28 = vld [vmem:[#allocation2 + $0x5d0] sm:$0xff]  ;;  %v4343_v32 = vadd.f32 %v6995_v9, %v4080_v27  ;;  %3823 = vst.msk [vmem:[#allocation2 + $0x1e0] sm:$0xff] %vm272_vm0, %v3566_v19  ;;  %3951 = vst.msk [vmem:[#allocation2 + $0x5e0] sm:$0xff] %vm272_vm0, %v3694_v20  ;;  %v3567_v34 = vadd.f32 %v2726_v29, %v590_v16  ;;  %v3695_v35 = vadd.f32 %v3238_v30, %v718_v17  ;;  %v2728_v36 = vpop.f32.mrb[123].mxu0  ;;  %v3240_v37 = vpop.f32.mrb[123].mxu1 }
 0x20e   : > { %v4471_v33 = vadd.f32 %v6995_v9, %v4208_v28  ;;  %v4081_v38 = vld [vmem:[#allocation2 + $0x1d8] sm:$0xff]  ;;  %v5633_v17 = vld [vmem:[%s5756_s30 + $0x3c4] ss:$8 sps:$4 sm:$0xff]   ;;  %v723_v36 = vld [vmem:[#allocation2 + $0x610] sm:$0xff] }
 0x20f   : > { %v4209_v39 = vld [vmem:[#allocation2 + $0x5d8] sm:$0xff]  ;;  %4599 = vst.msk [vmem:[%s6464_s9 + $0x1d0] sm:$0xff] %vm272_vm0, %v4343_v32  ;;  %v4344_v40 = vadd.f32 %v6995_v9, %v4081_v38  ;;  %3824 = vst.msk [vmem:[#allocation2 + $0x1e8] sm:$0xff] %vm272_vm0, %v3567_v34  ;;  %2938 = vmatmul.mubr.bf16.gmra.mrb[228].mxu0 %v5619_v18  ;;  %3450 = vmatmul.mubr.bf16.gmra.mrb[228].mxu1 %v5620_v25 }
 0x210   : > { %4727 = vst.msk [vmem:[%s6464_s9 + $0x5d0] sm:$0xff] %vm272_vm0, %v4471_v33  ;;  %v4472_v41 = vadd.f32 %v6995_v9, %v4209_v39  ;;  %3952 = vst.msk [vmem:[#allocation2 + $0x5e8] sm:$0xff] %vm272_vm0, %v3695_v35  ;;  %2945 = vmatprep.mubr.bf16.mxu0 %v5621_v26  ;;  %3457 = vmatprep.mubr.bf16.mxu1 %v5623_v31  ;;  %v5632_v16 = vld [vmem:[%s5756_s30 + $0x7b0] ss:$8 sps:$4 sm:$0xff]  }
 0x211   : > { %4600 = vst.msk [vmem:[%s6464_s9 + $0x1d8] sm:$0xff] %vm272_vm0, %v4344_v40  ;;  %v595_v35 = vld [vmem:[#allocation2 + $0x210] sm:$0xff]  ;;  %v596_v39 = vld [vmem:[#allocation2 + $0x218] sm:$0xff] }
 0x212   : > { %4728 = vst.msk [vmem:[%s6464_s9 + $0x5d8] sm:$0xff] %vm272_vm0, %v4472_v41  ;;  %v2731_v44 = vpop.f32.mrb[124].mxu0  ;;  %v3243_v45 = vpop.f32.mrb[124].mxu1  ;;  %v724_v40 = vld [vmem:[#allocation2 + $0x618] sm:$0xff]  ;;  %v5637_v41 = vld [vmem:[%s5756_s30 + $0x3c0] ss:$8 sps:$4 sm:$0xff]  }
 0x213   : > { %v3568_v49 = vadd.f32 %v2731_v44, %v591_v42  ;;  %v3696_v50 = vadd.f32 %v3243_v45, %v719_v43  ;;  %v2733_v51 = vpop.f32.mrb[125].mxu0  ;;  %v3245_v52 = vpop.f32.mrb[125].mxu1 }
 0x214   : > { %v4082_v55 = vld [vmem:[#allocation2 + $0x1e0] sm:$0xff]  ;;  %v2734_v57 = vpop.f32.mrb[126].mxu0  ;;  %v3246_v58 = vpop.f32.mrb[126].mxu1  ;;  %v5641_v52 = vld [vmem:[%s5756_s30 + $0x7d4] ss:$8 sps:$4 sm:$0xff]  }
 0x215   : > { %v4210_v56 = vld [vmem:[#allocation2 + $0x5e0] sm:$0xff]  ;;  %v4345_v24 = vadd.f32 %v6995_v9, %v4082_v55  ;;  %3825 = vst.msk [vmem:[#allocation2 + $0x1f0] sm:$0xff] %vm272_vm0, %v3568_v49  ;;  %3953 = vst.msk [vmem:[#allocation2 + $0x5f0] sm:$0xff] %vm272_vm0, %v3696_v50  ;;  %v3569_v61 = vadd.f32 %v2734_v57, %v592_v46  ;;  %v3697_v62 = vadd.f32 %v3246_v58, %v720_v47  ;;  %v2736_v63 = vpop.f32.mrb[127].mxu0  ;;  %v3248_v0 = vpop.f32.mrb[127].mxu1 }
 0x216   : > { %v4473_v60 = vadd.f32 %v6995_v9, %v4210_v56  ;;  %v4083_v1 = vld [vmem:[#allocation2 + $0x1e8] sm:$0xff]  ;;  %v5639_v47 = vld [vmem:[%s5756_s30 + $0x3d4] ss:$8 sps:$4 sm:$0xff]   ;;  %v725_v63 = vld [vmem:[#allocation2 + $0x620] sm:$0xff] }
 0x217   : > { %v4211_v2 = vld [vmem:[#allocation2 + $0x5e8] sm:$0xff]  ;;  %4601 = vst.msk [vmem:[%s6464_s9 + $0x1e0] sm:$0xff] %vm272_vm0, %v4345_v24  ;;  %v4346_v3 = vadd.f32 %v6995_v9, %v4083_v1  ;;  %3826 = vst.msk [vmem:[#allocation2 + $0x1f8] sm:$0xff] %vm272_vm0, %v3569_v61  ;;  %2946 = vmatmul.mubr.bf16.gmra.mrb[232].mxu0 %v5625_v48  ;;  %3458 = vmatmul.mubr.bf16.gmra.mrb[232].mxu1 %v5626_v53 }
 0x218   : > { %4729 = vst.msk [vmem:[%s6464_s9 + $0x5e0] sm:$0xff] %vm272_vm0, %v4473_v60  ;;  %v4474_v4 = vadd.f32 %v6995_v9, %v4211_v2  ;;  %3954 = vst.msk [vmem:[#allocation2 + $0x5f8] sm:$0xff] %vm272_vm0, %v3697_v62  ;;  %2953 = vmatprep.mubr.bf16.mxu0 %v5627_v54  ;;  %3465 = vmatprep.mubr.bf16.mxu1 %v5629_v59  ;;  %v5638_v46 = vld [vmem:[%s5756_s30 + $0x7c0] ss:$8 sps:$4 sm:$0xff]  }
 0x219   : > { %4602 = vst.msk [vmem:[%s6464_s9 + $0x1e8] sm:$0xff] %vm272_vm0, %v4346_v3  ;;  %v597_v62 = vld [vmem:[#allocation2 + $0x220] sm:$0xff]  ;;  %v598_v2 = vld [vmem:[#allocation2 + $0x228] sm:$0xff] }
 0x21a   : > { %4730 = vst.msk [vmem:[%s6464_s9 + $0x5e8] sm:$0xff] %vm272_vm0, %v4474_v4  ;;  %v2739_v7 = vpop.f32.mrb[128].mxu0  ;;  %v3251_v8 = vpop.f32.mrb[128].mxu1  ;;  %v726_v3 = vld [vmem:[#allocation2 + $0x628] sm:$0xff]  ;;  %v5643_v4 = vld [vmem:[%s5756_s30 + $0x3d0] ss:$8 sps:$4 sm:$0xff]  }
 0x21b   : > { %v3570_v12 = vadd.f32 %v2739_v7, %v593_v5  ;;  %v3698_v13 = vadd.f32 %v3251_v8, %v721_v6  ;;  %v2741_v14 = vpop.f32.mrb[129].mxu0  ;;  %v3253_v15 = vpop.f32.mrb[129].mxu1 }
 0x21c   : > { %v4084_v18 = vld [vmem:[#allocation2 + $0x1f0] sm:$0xff]  ;;  %v2742_v20 = vpop.f32.mrb[130].mxu0  ;;  %v3254_v21 = vpop.f32.mrb[130].mxu1  ;;  %v5647_v15 = vld [vmem:[%s5756_s30 + $0x7e4] ss:$8 sps:$4 sm:$0xff]  }
 0x21d   : > { %v4212_v19 = vld [vmem:[#allocation2 + $0x5f0] sm:$0xff]  ;;  %v4347_v25 = vadd.f32 %v6995_v9, %v4084_v18  ;;  %3827 = vst.msk [vmem:[#allocation2 + $0x200] sm:$0xff] %vm272_vm0, %v3570_v12  ;;  %3955 = vst.msk [vmem:[#allocation2 + $0x600] sm:$0xff] %vm272_vm0, %v3698_v13  ;;  %v3571_v27 = vadd.f32 %v2742_v20, %v594_v22  ;;  %v3699_v28 = vadd.f32 %v3254_v21, %v722_v10  ;;  %v2744_v29 = vpop.f32.mrb[131].mxu0  ;;  %v3256_v30 = vpop.f32.mrb[131].mxu1 }
 0x21e   : > { %v4475_v26 = vadd.f32 %v6995_v9, %v4212_v19  ;;  %v4085_v31 = vld [vmem:[#allocation2 + $0x1f8] sm:$0xff]  ;;  %v5645_v10 = vld [vmem:[%s5756_s30 + $0x3e4] ss:$8 sps:$4 sm:$0xff]   ;;  %v727_v29 = vld [vmem:[#allocation2 + $0x630] sm:$0xff] }
 0x21f   : > { %v4213_v32 = vld [vmem:[#allocation2 + $0x5f8] sm:$0xff]  ;;  %4603 = vst.msk [vmem:[%s6464_s9 + $0x1f0] sm:$0xff] %vm272_vm0, %v4347_v25  ;;  %v4348_v33 = vadd.f32 %v6995_v9, %v4085_v31  ;;  %3828 = vst.msk [vmem:[#allocation2 + $0x208] sm:$0xff] %vm272_vm0, %v3571_v27  ;;  %2954 = vmatmul.mubr.bf16.gmra.mrb[236].mxu0 %v5631_v11  ;;  %3466 = vmatmul.mubr.bf16.gmra.mrb[236].mxu1 %v5632_v16 }
 0x220   : > { %4731 = vst.msk [vmem:[%s6464_s9 + $0x5f0] sm:$0xff] %vm272_vm0, %v4475_v26  ;;  %v4476_v34 = vadd.f32 %v6995_v9, %v4213_v32  ;;  %3956 = vst.msk [vmem:[#allocation2 + $0x608] sm:$0xff] %vm272_vm0, %v3699_v28  ;;  %2961 = vmatprep.mubr.bf16.mxu0 %v5633_v17  ;;  %3473 = vmatprep.mubr.bf16.mxu1 %v5635_v23  ;;  %v5644_v22 = vld [vmem:[%s5756_s30 + $0x7d0] ss:$8 sps:$4 sm:$0xff]  }
 0x221   : > { %4604 = vst.msk [vmem:[%s6464_s9 + $0x1f8] sm:$0xff] %vm272_vm0, %v4348_v33  ;;  %v599_v28 = vld [vmem:[#allocation2 + $0x230] sm:$0xff]  ;;  %v600_v32 = vld [vmem:[#allocation2 + $0x238] sm:$0xff] }
 0x222   : > { %4732 = vst.msk [vmem:[%s6464_s9 + $0x5f8] sm:$0xff] %vm272_vm0, %v4476_v34  ;;  %v2747_v37 = vpop.f32.mrb[132].mxu0  ;;  %v3259_v38 = vpop.f32.mrb[132].mxu1  ;;  %v728_v33 = vld [vmem:[#allocation2 + $0x638] sm:$0xff]  ;;  %v5649_v34 = vld [vmem:[%s5756_s30 + $0x3e0] ss:$8 sps:$4 sm:$0xff]  }
 0x223   : > { %v3572_v42 = vadd.f32 %v2747_v37, %v595_v35  ;;  %v3700_v43 = vadd.f32 %v3259_v38, %v723_v36  ;;  %v2749_v44 = vpop.f32.mrb[133].mxu0  ;;  %v3261_v45 = vpop.f32.mrb[133].mxu1 }
 0x224   : > { %v4086_v48 = vld [vmem:[#allocation2 + $0x200] sm:$0xff]  ;;  %v2750_v50 = vpop.f32.mrb[134].mxu0  ;;  %v3262_v51 = vpop.f32.mrb[134].mxu1  ;;  %v5653_v45 = vld [vmem:[%s5756_s30 + $0x7f4] ss:$8 sps:$4 sm:$0xff]  }
 0x225   : > { %v4214_v49 = vld [vmem:[#allocation2 + $0x600] sm:$0xff]  ;;  %v4349_v53 = vadd.f32 %v6995_v9, %v4086_v48  ;;  %3829 = vst.msk [vmem:[#allocation2 + $0x210] sm:$0xff] %vm272_vm0, %v3572_v42  ;;  %3957 = vst.msk [vmem:[#allocation2 + $0x610] sm:$0xff] %vm272_vm0, %v3700_v43  ;;  %v3573_v55 = vadd.f32 %v2750_v50, %v596_v39  ;;  %v3701_v56 = vadd.f32 %v3262_v51, %v724_v40  ;;  %v2752_v57 = vpop.f32.mrb[135].mxu0  ;;  %v3264_v58 = vpop.f32.mrb[135].mxu1 }
 0x226   : > { %v4477_v54 = vadd.f32 %v6995_v9, %v4214_v49  ;;  %v4087_v59 = vld [vmem:[#allocation2 + $0x208] sm:$0xff]  ;;  %v5651_v40 = vld [vmem:[%s5756_s30 + $0x3f4] ss:$8 sps:$4 sm:$0xff]   ;;  %v729_v57 = vld [vmem:[#allocation2 + $0x640] sm:$0xff] }
 0x227   : > { %v4215_v24 = vld [vmem:[#allocation2 + $0x608] sm:$0xff]  ;;  %4605 = vst.msk [vmem:[%s6464_s9 + $0x200] sm:$0xff] %vm272_vm0, %v4349_v53  ;;  %v4350_v60 = vadd.f32 %v6995_v9, %v4087_v59  ;;  %3830 = vst.msk [vmem:[#allocation2 + $0x218] sm:$0xff] %vm272_vm0, %v3573_v55  ;;  %2962 = vmatmul.mubr.bf16.gmra.mrb[240].mxu0 %v5637_v41  ;;  %3474 = vmatmul.mubr.bf16.gmra.mrb[240].mxu1 %v5638_v46 }
 0x228   : > { %4733 = vst.msk [vmem:[%s6464_s9 + $0x600] sm:$0xff] %vm272_vm0, %v4477_v54  ;;  %v4478_v61 = vadd.f32 %v6995_v9, %v4215_v24  ;;  %3958 = vst.msk [vmem:[#allocation2 + $0x618] sm:$0xff] %vm272_vm0, %v3701_v56  ;;  %2969 = vmatprep.mubr.bf16.mxu0 %v5639_v47  ;;  %3481 = vmatprep.mubr.bf16.mxu1 %v5641_v52  ;;  %v5650_v39 = vld [vmem:[%s5756_s30 + $0x7e0] ss:$8 sps:$4 sm:$0xff]  }
 0x229   : > { %4606 = vst.msk [vmem:[%s6464_s9 + $0x208] sm:$0xff] %vm272_vm0, %v4350_v60  ;;  %v601_v56 = vld [vmem:[#allocation2 + $0x240] sm:$0xff]  ;;  %v602_v24 = vld [vmem:[#allocation2 + $0x248] sm:$0xff] }
 0x22a   : > { %4734 = vst.msk [vmem:[%s6464_s9 + $0x608] sm:$0xff] %vm272_vm0, %v4478_v61  ;;  %v2755_v0 = vpop.f32.mrb[136].mxu0  ;;  %v3267_v1 = vpop.f32.mrb[136].mxu1  ;;  %v730_v60 = vld [vmem:[#allocation2 + $0x648] sm:$0xff] }
 0x22b   : > { %v3574_v5 = vadd.f32 %v2755_v0, %v597_v62  ;;  %v3702_v6 = vadd.f32 %v3267_v1, %v725_v63  ;;  %v2757_v7 = vpop.f32.mrb[137].mxu0  ;;  %v3269_v8 = vpop.f32.mrb[137].mxu1  ;;  %v5655_v1 = vld [vmem:[%s5756_s30 + $0x3f0] ss:$8 sps:$4 sm:$0xff]  }
 0x22c   : > { %v4088_v11 = vld [vmem:[#allocation2 + $0x210] sm:$0xff]  ;;  %v2758_v13 = vpop.f32.mrb[138].mxu0  ;;  %v3270_v14 = vpop.f32.mrb[138].mxu1 }
 0x22d   : > { %v4216_v12 = vld [vmem:[#allocation2 + $0x610] sm:$0xff]  ;;  %v4351_v16 = vadd.f32 %v6995_v9, %v4088_v11  ;;  %3831 = vst.msk [vmem:[#allocation2 + $0x220] sm:$0xff] %vm272_vm0, %v3574_v5  ;;  %3959 = vst.msk [vmem:[#allocation2 + $0x620] sm:$0xff] %vm272_vm0, %v3702_v6  ;;  %v3575_v18 = vadd.f32 %v2758_v13, %v598_v2  ;;  %v3703_v19 = vadd.f32 %v3270_v14, %v726_v3  ;;  %v2760_v20 = vpop.f32.mrb[139].mxu0  ;;  %v3272_v21 = vpop.f32.mrb[139].mxu1 }
 0x22e   : > { %v4479_v17 = vadd.f32 %v6995_v9, %v4216_v12  ;;  %v4089_v23 = vld [vmem:[#allocation2 + $0x218] sm:$0xff] }
 0x22f   : > { %v4217_v25 = vld [vmem:[#allocation2 + $0x618] sm:$0xff]  ;;  %4607 = vst.msk [vmem:[%s6464_s9 + $0x210] sm:$0xff] %vm272_vm0, %v4351_v16  ;;  %v4352_v26 = vadd.f32 %v6995_v9, %v4089_v23  ;;  %3832 = vst.msk [vmem:[#allocation2 + $0x228] sm:$0xff] %vm272_vm0, %v3575_v18  ;;  %2970 = vmatmul.mubr.bf16.gmra.mrb[244].mxu0 %v5643_v4  ;;  %3482 = vmatmul.mubr.bf16.gmra.mrb[244].mxu1 %v5644_v22  ;;  %v731_v18 = vld [vmem:[#allocation2 + $0x650] sm:$0xff] }
 0x230   : > { %4735 = vst.msk [vmem:[%s6464_s9 + $0x610] sm:$0xff] %vm272_vm0, %v4479_v17  ;;  %v4480_v27 = vadd.f32 %v6995_v9, %v4217_v25  ;;  %3960 = vst.msk [vmem:[#allocation2 + $0x628] sm:$0xff] %vm272_vm0, %v3703_v19  ;;  %2977 = vmatprep.mubr.bf16.mxu0 %v5645_v10  ;;  %3489 = vmatprep.mubr.bf16.mxu1 %v5647_v15  ;;  %v5656_v2 = vld [vmem:[%s5756_s30 + $0x7f0] ss:$8 sps:$4 sm:$0xff]  }
 0x231   : > { %4608 = vst.msk [vmem:[%s6464_s9 + $0x218] sm:$0xff] %vm272_vm0, %v4352_v26  ;;  %v603_v17 = vld [vmem:[#allocation2 + $0x250] sm:$0xff]  ;;  %v604_v21 = vld [vmem:[#allocation2 + $0x258] sm:$0xff] }
 0x232   : > { %4736 = vst.msk [vmem:[%s6464_s9 + $0x618] sm:$0xff] %vm272_vm0, %v4480_v27  ;;  %v2763_v30 = vpop.f32.mrb[140].mxu0  ;;  %v3275_v31 = vpop.f32.mrb[140].mxu1  ;;  %v732_v23 = vld [vmem:[#allocation2 + $0x658] sm:$0xff] }
 0x233   : > { %v3576_v35 = vadd.f32 %v2763_v30, %v599_v28  ;;  %v3704_v36 = vadd.f32 %v3275_v31, %v727_v29  ;;  %v2765_v37 = vpop.f32.mrb[141].mxu0  ;;  %v3277_v38 = vpop.f32.mrb[141].mxu1 }
 0x234   : > { %v4090_v41 = vld [vmem:[#allocation2 + $0x220] sm:$0xff]  ;;  %v2766_v43 = vpop.f32.mrb[142].mxu0  ;;  %v3278_v44 = vpop.f32.mrb[142].mxu1 }
 0x235   : > { %v4218_v42 = vld [vmem:[#allocation2 + $0x620] sm:$0xff]  ;;  %v4353_v46 = vadd.f32 %v6995_v9, %v4090_v41  ;;  %3833 = vst.msk [vmem:[#allocation2 + $0x230] sm:$0xff] %vm272_vm0, %v3576_v35  ;;  %3961 = vst.msk [vmem:[#allocation2 + $0x630] sm:$0xff] %vm272_vm0, %v3704_v36  ;;  %v3577_v48 = vadd.f32 %v2766_v43, %v600_v32  ;;  %v3705_v49 = vadd.f32 %v3278_v44, %v728_v33  ;;  %v2768_v50 = vpop.f32.mrb[143].mxu0  ;;  %v3280_v51 = vpop.f32.mrb[143].mxu1 }
 0x236   : > { %v4481_v47 = vadd.f32 %v6995_v9, %v4218_v42  ;;  %v4091_v52 = vld [vmem:[#allocation2 + $0x228] sm:$0xff]  ;;  %v605_v43 = vld [vmem:[#allocation2 + $0x260] sm:$0xff] }
 0x237   : > { %v4219_v53 = vld [vmem:[#allocation2 + $0x628] sm:$0xff]  ;;  %4609 = vst.msk [vmem:[%s6464_s9 + $0x220] sm:$0xff] %vm272_vm0, %v4353_v46  ;;  %v4354_v54 = vadd.f32 %v6995_v9, %v4091_v52  ;;  %3834 = vst.msk [vmem:[#allocation2 + $0x238] sm:$0xff] %vm272_vm0, %v3577_v48  ;;  %2978 = vmatmul.mubr.bf16.gmra.mrb[248].mxu0 %v5649_v34  ;;  %3490 = vmatmul.mubr.bf16.gmra.mrb[248].mxu1 %v5650_v39  ;;  %v733_v44 = vld [vmem:[#allocation2 + $0x660] sm:$0xff] }
 0x238   : > { %4737 = vst.msk [vmem:[%s6464_s9 + $0x620] sm:$0xff] %vm272_vm0, %v4481_v47  ;;  %v4482_v55 = vadd.f32 %v6995_v9, %v4219_v53  ;;  %3962 = vst.msk [vmem:[#allocation2 + $0x638] sm:$0xff] %vm272_vm0, %v3705_v49  ;;  %2985 = vmatprep.mubr.bf16.mxu0 %v5651_v40  ;;  %3497 = vmatprep.mubr.bf16.mxu1 %v5653_v45  ;;  %v606_v47 = vld [vmem:[#allocation2 + $0x268] sm:$0xff] }
 0x239   : > { %4610 = vst.msk [vmem:[%s6464_s9 + $0x228] sm:$0xff] %vm272_vm0, %v4354_v54  ;;  %v734_v48 = vld [vmem:[#allocation2 + $0x668] sm:$0xff] }
 0x23a   : > { %4738 = vst.msk [vmem:[%s6464_s9 + $0x628] sm:$0xff] %vm272_vm0, %v4482_v55  ;;  %v2771_v58 = vpop.f32.mrb[144].mxu0  ;;  %v3283_v59 = vpop.f32.mrb[144].mxu1 }
 0x23b   : > { %v3578_v61 = vadd.f32 %v2771_v58, %v601_v56  ;;  %v3706_v62 = vadd.f32 %v3283_v59, %v729_v57  ;;  %v2773_v63 = vpop.f32.mrb[145].mxu0  ;;  %v3285_v0 = vpop.f32.mrb[145].mxu1 }
 0x23c   : > { %v4092_v3 = vld [vmem:[#allocation2 + $0x230] sm:$0xff]  ;;  %v2774_v5 = vpop.f32.mrb[146].mxu0  ;;  %v3286_v6 = vpop.f32.mrb[146].mxu1 }
 0x23d   : > { %v4220_v4 = vld [vmem:[#allocation2 + $0x630] sm:$0xff]  ;;  %v4355_v7 = vadd.f32 %v6995_v9, %v4092_v3  ;;  %3835 = vst.msk [vmem:[#allocation2 + $0x240] sm:$0xff] %vm272_vm0, %v3578_v61  ;;  %3963 = vst.msk [vmem:[#allocation2 + $0x640] sm:$0xff] %vm272_vm0, %v3706_v62  ;;  %v3579_v22 = vadd.f32 %v2774_v5, %v602_v24  ;;  %v3707_v10 = vadd.f32 %v3286_v6, %v730_v60  ;;  %v2776_v11 = vpop.f32.mrb[147].mxu0  ;;  %v3288_v12 = vpop.f32.mrb[147].mxu1  ;;  %v608_v6 = vld [vmem:[#allocation2 + $0x278] sm:$0xff] }
 0x23e   : > { %v4483_v8 = vadd.f32 %v6995_v9, %v4220_v4  ;;  %v4093_v13 = vld [vmem:[#allocation2 + $0x238] sm:$0xff]  ;;  %v735_v3 = vld [vmem:[#allocation2 + $0x670] sm:$0xff] }
 0x23f   : > { %v4221_v14 = vld [vmem:[#allocation2 + $0x638] sm:$0xff]  ;;  %4611 = vst.msk [vmem:[%s6464_s9 + $0x230] sm:$0xff] %vm272_vm0, %v4355_v7  ;;  %v4356_v15 = vadd.f32 %v6995_v9, %v4093_v13  ;;  %3836 = vst.msk [vmem:[#allocation2 + $0x248] sm:$0xff] %vm272_vm0, %v3579_v22  ;;  %2986 = vmatmul.mubr.bf16.gmra.mrb[252].mxu0 %v5655_v1  ;;  %3498 = vmatmul.mubr.bf16.gmra.mrb[252].mxu1 %v5656_v2  ;;  %v607_v2 = vld [vmem:[#allocation2 + $0x270] sm:$0xff] }
 0x240   : > { %4739 = vst.msk [vmem:[%s6464_s9 + $0x630] sm:$0xff] %vm272_vm0, %v4483_v8  ;;  %v4484_v16 = vadd.f32 %v6995_v9, %v4221_v14  ;;  %3964 = vst.msk [vmem:[#allocation2 + $0x648] sm:$0xff] %vm272_vm0, %v3707_v10  ;;  %v736_v7 = vld [vmem:[#allocation2 + $0x678] sm:$0xff] }
 0x241   : > { %4612 = vst.msk [vmem:[%s6464_s9 + $0x238] sm:$0xff] %vm272_vm0, %v4356_v15 }
 0x242   : > { %4740 = vst.msk [vmem:[%s6464_s9 + $0x638] sm:$0xff] %vm272_vm0, %v4484_v16  ;;  %v2779_v19 = vpop.f32.mrb[148].mxu0  ;;  %v3291_v20 = vpop.f32.mrb[148].mxu1 }
 0x243   : > { %v3580_v25 = vadd.f32 %v2779_v19, %v603_v17  ;;  %v3708_v26 = vadd.f32 %v3291_v20, %v731_v18  ;;  %v2781_v27 = vpop.f32.mrb[149].mxu0  ;;  %v3293_v28 = vpop.f32.mrb[149].mxu1 }
 0x244   : > { %v4094_v29 = vld [vmem:[#allocation2 + $0x240] sm:$0xff]  ;;  %v2782_v31 = vpop.f32.mrb[150].mxu0  ;;  %v3294_v32 = vpop.f32.mrb[150].mxu1 }
 0x245   : > { %v4222_v30 = vld [vmem:[#allocation2 + $0x640] sm:$0xff]  ;;  %v4357_v33 = vadd.f32 %v6995_v9, %v4094_v29  ;;  %3837 = vst.msk [vmem:[#allocation2 + $0x250] sm:$0xff] %vm272_vm0, %v3580_v25  ;;  %3965 = vst.msk [vmem:[#allocation2 + $0x650] sm:$0xff] %vm272_vm0, %v3708_v26  ;;  %v3581_v35 = vadd.f32 %v2782_v31, %v604_v21  ;;  %v3709_v36 = vadd.f32 %v3294_v32, %v732_v23  ;;  %v2784_v37 = vpop.f32.mrb[151].mxu0  ;;  %v3296_v38 = vpop.f32.mrb[151].mxu1  ;;  %v610_v32 = vld [vmem:[#allocation2 + $0x288] sm:$0xff] }
 0x246   : > { %v4485_v34 = vadd.f32 %v6995_v9, %v4222_v30  ;;  %v4095_v39 = vld [vmem:[#allocation2 + $0x248] sm:$0xff]  ;;  %v609_v28 = vld [vmem:[#allocation2 + $0x280] sm:$0xff] }
 0x247   : > { %v4223_v40 = vld [vmem:[#allocation2 + $0x648] sm:$0xff]  ;;  %4613 = vst.msk [vmem:[%s6464_s9 + $0x240] sm:$0xff] %vm272_vm0, %v4357_v33  ;;  %v4358_v41 = vadd.f32 %v6995_v9, %v4095_v39  ;;  %3838 = vst.msk [vmem:[#allocation2 + $0x258] sm:$0xff] %vm272_vm0, %v3581_v35  ;;  %v737_v29 = vld [vmem:[#allocation2 + $0x680] sm:$0xff] }
 0x248   : > { %4741 = vst.msk [vmem:[%s6464_s9 + $0x640] sm:$0xff] %vm272_vm0, %v4485_v34  ;;  %v4486_v42 = vadd.f32 %v6995_v9, %v4223_v40  ;;  %3966 = vst.msk [vmem:[#allocation2 + $0x658] sm:$0xff] %vm272_vm0, %v3709_v36  ;;  %v738_v33 = vld [vmem:[#allocation2 + $0x688] sm:$0xff] }
 0x249   : > { %4614 = vst.msk [vmem:[%s6464_s9 + $0x248] sm:$0xff] %vm272_vm0, %v4358_v41 }
 0x24a   : > { %4742 = vst.msk [vmem:[%s6464_s9 + $0x648] sm:$0xff] %vm272_vm0, %v4486_v42  ;;  %v2787_v45 = vpop.f32.mrb[152].mxu0  ;;  %v3299_v46 = vpop.f32.mrb[152].mxu1 }
 0x24b   : > { %v3582_v49 = vadd.f32 %v2787_v45, %v605_v43  ;;  %v3710_v50 = vadd.f32 %v3299_v46, %v733_v44  ;;  %v2789_v51 = vpop.f32.mrb[153].mxu0  ;;  %v3301_v52 = vpop.f32.mrb[153].mxu1 }
 0x24c   : > { %v4096_v53 = vld [vmem:[#allocation2 + $0x250] sm:$0xff]  ;;  %v2790_v55 = vpop.f32.mrb[154].mxu0  ;;  %v3302_v56 = vpop.f32.mrb[154].mxu1 }
 0x24d   : > { %v4224_v54 = vld [vmem:[#allocation2 + $0x650] sm:$0xff]  ;;  %v4359_v57 = vadd.f32 %v6995_v9, %v4096_v53  ;;  %3839 = vst.msk [vmem:[#allocation2 + $0x260] sm:$0xff] %vm272_vm0, %v3582_v49  ;;  %3967 = vst.msk [vmem:[#allocation2 + $0x660] sm:$0xff] %vm272_vm0, %v3710_v50  ;;  %v3583_v59 = vadd.f32 %v2790_v55, %v606_v47  ;;  %v3711_v24 = vadd.f32 %v3302_v56, %v734_v48  ;;  %v2792_v60 = vpop.f32.mrb[155].mxu0  ;;  %v3304_v61 = vpop.f32.mrb[155].mxu1  ;;  %v612_v56 = vld [vmem:[#allocation2 + $0x298] sm:$0xff] }
 0x24e   : > { %v4487_v58 = vadd.f32 %v6995_v9, %v4224_v54  ;;  %v4097_v62 = vld [vmem:[#allocation2 + $0x258] sm:$0xff]  ;;  %v611_v52 = vld [vmem:[#allocation2 + $0x290] sm:$0xff] }
 0x24f   : > { %v4225_v63 = vld [vmem:[#allocation2 + $0x658] sm:$0xff]  ;;  %4615 = vst.msk [vmem:[%s6464_s9 + $0x250] sm:$0xff] %vm272_vm0, %v4359_v57  ;;  %v4360_v0 = vadd.f32 %v6995_v9, %v4097_v62  ;;  %3840 = vst.msk [vmem:[#allocation2 + $0x268] sm:$0xff] %vm272_vm0, %v3583_v59  ;;  %v739_v53 = vld [vmem:[#allocation2 + $0x690] sm:$0xff] }
 0x250   : > { %4743 = vst.msk [vmem:[%s6464_s9 + $0x650] sm:$0xff] %vm272_vm0, %v4487_v58  ;;  %v4488_v1 = vadd.f32 %v6995_v9, %v4225_v63  ;;  %3968 = vst.msk [vmem:[#allocation2 + $0x668] sm:$0xff] %vm272_vm0, %v3711_v24  ;;  %v740_v57 = vld [vmem:[#allocation2 + $0x698] sm:$0xff] }
 0x251   : > { %4616 = vst.msk [vmem:[%s6464_s9 + $0x258] sm:$0xff] %vm272_vm0, %v4360_v0  ;;  %v7258_v0 = vld [vmem:[%s7656_s2] ss:$0 sm:$0xff] }
 0x252   : > { %4744 = vst.msk [vmem:[%s6464_s9 + $0x658] sm:$0xff] %vm272_vm0, %v4488_v1  ;;  %v2795_v4 = vpop.f32.mrb[156].mxu0  ;;  %v3307_v5 = vpop.f32.mrb[156].mxu1 }
 0x253   : > { %v3584_v8 = vadd.f32 %v2795_v4, %v607_v2  ;;  %v3712_v22 = vadd.f32 %v3307_v5, %v735_v3  ;;  %v2797_v10 = vpop.f32.mrb[157].mxu0  ;;  %v3309_v11 = vpop.f32.mrb[157].mxu1 }
 0x254   : > { %v4098_v12 = vld [vmem:[#allocation2 + $0x260] sm:$0xff]  ;;  %v2798_v14 = vpop.f32.mrb[158].mxu0  ;;  %v3310_v15 = vpop.f32.mrb[158].mxu1 }
 0x255   : > { %v4226_v13 = vld [vmem:[#allocation2 + $0x660] sm:$0xff]  ;;  %v4361_v16 = vadd.f32 %v6995_v9, %v4098_v12  ;;  %3841 = vst.msk [vmem:[#allocation2 + $0x270] sm:$0xff] %vm272_vm0, %v3584_v8  ;;  %3969 = vst.msk [vmem:[#allocation2 + $0x670] sm:$0xff] %vm272_vm0, %v3712_v22  ;;  %v3585_v18 = vadd.f32 %v2798_v14, %v608_v6  ;;  %v3713_v19 = vadd.f32 %v3310_v15, %v736_v7  ;;  %v2800_v20 = vpop.f32.mrb[159].mxu0  ;;  %v3312_v21 = vpop.f32.mrb[159].mxu1  ;;  %v614_v15 = vld [vmem:[#allocation2 + $0x2a8] sm:$0xff] }
 0x256   : > { %v4489_v17 = vadd.f32 %v6995_v9, %v4226_v13  ;;  %v4099_v23 = vld [vmem:[#allocation2 + $0x268] sm:$0xff]  ;;  %v613_v11 = vld [vmem:[#allocation2 + $0x2a0] sm:$0xff] }
 0x257   : > { %v4227_v25 = vld [vmem:[#allocation2 + $0x668] sm:$0xff]  ;;  %4617 = vst.msk [vmem:[%s6464_s9 + $0x260] sm:$0xff] %vm272_vm0, %v4361_v16  ;;  %v4362_v26 = vadd.f32 %v6995_v9, %v4099_v23  ;;  %3842 = vst.msk [vmem:[#allocation2 + $0x278] sm:$0xff] %vm272_vm0, %v3585_v18  ;;  %v741_v12 = vld [vmem:[#allocation2 + $0x6a0] sm:$0xff] }
 0x258   : > { %4745 = vst.msk [vmem:[%s6464_s9 + $0x660] sm:$0xff] %vm272_vm0, %v4489_v17  ;;  %v4490_v27 = vadd.f32 %v6995_v9, %v4227_v25  ;;  %3970 = vst.msk [vmem:[#allocation2 + $0x678] sm:$0xff] %vm272_vm0, %v3713_v19  ;;  %v742_v16 = vld [vmem:[#allocation2 + $0x6a8] sm:$0xff] }
 0x259   : > { %4618 = vst.msk [vmem:[%s6464_s9 + $0x268] sm:$0xff] %vm272_vm0, %v4362_v26 }
 0x25a   : > { %4746 = vst.msk [vmem:[%s6464_s9 + $0x668] sm:$0xff] %vm272_vm0, %v4490_v27  ;;  %v2803_v30 = vpop.f32.mrb[160].mxu0  ;;  %v3315_v31 = vpop.f32.mrb[160].mxu1 }
 0x25b   : > { %v3586_v34 = vadd.f32 %v2803_v30, %v609_v28  ;;  %v3714_v35 = vadd.f32 %v3315_v31, %v737_v29  ;;  %v2805_v36 = vpop.f32.mrb[161].mxu0  ;;  %v3317_v37 = vpop.f32.mrb[161].mxu1 }
 0x25c   : > { %v4100_v38 = vld [vmem:[#allocation2 + $0x270] sm:$0xff]  ;;  %v2806_v40 = vpop.f32.mrb[162].mxu0  ;;  %v3318_v41 = vpop.f32.mrb[162].mxu1 }
 0x25d   : > { %v4228_v39 = vld [vmem:[#allocation2 + $0x670] sm:$0xff]  ;;  %v4363_v42 = vadd.f32 %v6995_v9, %v4100_v38  ;;  %3843 = vst.msk [vmem:[#allocation2 + $0x280] sm:$0xff] %vm272_vm0, %v3586_v34  ;;  %3971 = vst.msk [vmem:[#allocation2 + $0x680] sm:$0xff] %vm272_vm0, %v3714_v35  ;;  %v3587_v44 = vadd.f32 %v2806_v40, %v610_v32  ;;  %v3715_v45 = vadd.f32 %v3318_v41, %v738_v33  ;;  %v2808_v46 = vpop.f32.mrb[163].mxu0  ;;  %v3320_v47 = vpop.f32.mrb[163].mxu1  ;;  %v616_v41 = vld [vmem:[#allocation2 + $0x2b8] sm:$0xff] }
 0x25e   : > { %v4491_v43 = vadd.f32 %v6995_v9, %v4228_v39  ;;  %v4101_v48 = vld [vmem:[#allocation2 + $0x278] sm:$0xff]  ;;  %v615_v37 = vld [vmem:[#allocation2 + $0x2b0] sm:$0xff] }
 0x25f   : > { %v4229_v49 = vld [vmem:[#allocation2 + $0x678] sm:$0xff]  ;;  %4619 = vst.msk [vmem:[%s6464_s9 + $0x270] sm:$0xff] %vm272_vm0, %v4363_v42  ;;  %v4364_v50 = vadd.f32 %v6995_v9, %v4101_v48  ;;  %3844 = vst.msk [vmem:[#allocation2 + $0x288] sm:$0xff] %vm272_vm0, %v3587_v44  ;;  %v743_v38 = vld [vmem:[#allocation2 + $0x6b0] sm:$0xff] }
 0x260   : > { %4747 = vst.msk [vmem:[%s6464_s9 + $0x670] sm:$0xff] %vm272_vm0, %v4491_v43  ;;  %v4492_v51 = vadd.f32 %v6995_v9, %v4229_v49  ;;  %3972 = vst.msk [vmem:[#allocation2 + $0x688] sm:$0xff] %vm272_vm0, %v3715_v45  ;;  %v744_v42 = vld [vmem:[#allocation2 + $0x6b8] sm:$0xff] }
 0x261   : > { %4620 = vst.msk [vmem:[%s6464_s9 + $0x278] sm:$0xff] %vm272_vm0, %v4364_v50 }
 0x262   : > { %4748 = vst.msk [vmem:[%s6464_s9 + $0x678] sm:$0xff] %vm272_vm0, %v4492_v51  ;;  %v2811_v54 = vpop.f32.mrb[164].mxu0  ;;  %v3323_v55 = vpop.f32.mrb[164].mxu1 }
 0x263   : > { %v3588_v58 = vadd.f32 %v2811_v54, %v611_v52  ;;  %v3716_v59 = vadd.f32 %v3323_v55, %v739_v53  ;;  %v2813_v24 = vpop.f32.mrb[165].mxu0  ;;  %v3325_v60 = vpop.f32.mrb[165].mxu1 }
 0x264   : > { %v4102_v9 = vld [vmem:[#allocation2 + $0x280] sm:$0xff]  ;;  %v2814_v62 = vpop.f32.mrb[166].mxu0  ;;  %v3326_v63 = vpop.f32.mrb[166].mxu1 }
 0x265   : > { %v4230_v61 = vld [vmem:[#allocation2 + $0x680] sm:$0xff]  ;;  %v4365_v1 = vadd.f32 %v7258_v0, %v4102_v9  ;;  %3845 = vst.msk [vmem:[#allocation2 + $0x290] sm:$0xff] %vm272_vm0, %v3588_v58  ;;  %3973 = vst.msk [vmem:[#allocation2 + $0x690] sm:$0xff] %vm272_vm0, %v3716_v59  ;;  %v3589_v3 = vadd.f32 %v2814_v62, %v612_v56  ;;  %v3717_v4 = vadd.f32 %v3326_v63, %v740_v57  ;;  %v2816_v5 = vpop.f32.mrb[167].mxu0  ;;  %v3328_v6 = vpop.f32.mrb[167].mxu1  ;;  %v618_v63 = vld [vmem:[#allocation2 + $0x2c8] sm:$0xff] }
 0x266   : > { %v4493_v2 = vadd.f32 %v7258_v0, %v4230_v61  ;;  %v4103_v7 = vld [vmem:[#allocation2 + $0x288] sm:$0xff]  ;;  %v617_v60 = vld [vmem:[#allocation2 + $0x2c0] sm:$0xff] }
 0x267   : > { %v4231_v8 = vld [vmem:[#allocation2 + $0x688] sm:$0xff]  ;;  %4621 = vst.msk [vmem:[%s6464_s9 + $0x280] sm:$0xff] %vm272_vm0, %v4365_v1  ;;  %v4366_v22 = vadd.f32 %v7258_v0, %v4103_v7  ;;  %3846 = vst.msk [vmem:[#allocation2 + $0x298] sm:$0xff] %vm272_vm0, %v3589_v3  ;;  %v745_v9 = vld [vmem:[#allocation2 + $0x6c0] sm:$0xff] }
 0x268   : > { %4749 = vst.msk [vmem:[%s6464_s9 + $0x680] sm:$0xff] %vm272_vm0, %v4493_v2  ;;  %v4494_v10 = vadd.f32 %v7258_v0, %v4231_v8  ;;  %3974 = vst.msk [vmem:[#allocation2 + $0x698] sm:$0xff] %vm272_vm0, %v3717_v4  ;;  %v746_v1 = vld [vmem:[#allocation2 + $0x6c8] sm:$0xff] }
 0x269   : > { %4622 = vst.msk [vmem:[%s6464_s9 + $0x288] sm:$0xff] %vm272_vm0, %v4366_v22 }
 0x26a   : > { %4750 = vst.msk [vmem:[%s6464_s9 + $0x688] sm:$0xff] %vm272_vm0, %v4494_v10  ;;  %v2819_v13 = vpop.f32.mrb[168].mxu0  ;;  %v3331_v14 = vpop.f32.mrb[168].mxu1 }
 0x26b   : > { %v3590_v17 = vadd.f32 %v2819_v13, %v613_v11  ;;  %v3718_v18 = vadd.f32 %v3331_v14, %v741_v12  ;;  %v2821_v19 = vpop.f32.mrb[169].mxu0  ;;  %v3333_v20 = vpop.f32.mrb[169].mxu1 }
 0x26c   : > { %v4104_v21 = vld [vmem:[#allocation2 + $0x290] sm:$0xff]  ;;  %v2822_v25 = vpop.f32.mrb[170].mxu0  ;;  %v3334_v26 = vpop.f32.mrb[170].mxu1 }
 0x26d   : > { %v4232_v23 = vld [vmem:[#allocation2 + $0x690] sm:$0xff]  ;;  %v4367_v27 = vadd.f32 %v7258_v0, %v4104_v21  ;;  %3847 = vst.msk [vmem:[#allocation2 + $0x2a0] sm:$0xff] %vm272_vm0, %v3590_v17  ;;  %3975 = vst.msk [vmem:[#allocation2 + $0x6a0] sm:$0xff] %vm272_vm0, %v3718_v18  ;;  %v3591_v29 = vadd.f32 %v2822_v25, %v614_v15  ;;  %v3719_v30 = vadd.f32 %v3334_v26, %v742_v16  ;;  %v2824_v31 = vpop.f32.mrb[171].mxu0  ;;  %v3336_v32 = vpop.f32.mrb[171].mxu1  ;;  %v620_v26 = vld [vmem:[#allocation2 + $0x2d8] sm:$0xff] }
 0x26e   : > { %v4495_v28 = vadd.f32 %v7258_v0, %v4232_v23  ;;  %v4105_v33 = vld [vmem:[#allocation2 + $0x298] sm:$0xff]  ;;  %v619_v20 = vld [vmem:[#allocation2 + $0x2d0] sm:$0xff] }
 0x26f   : > { %v4233_v34 = vld [vmem:[#allocation2 + $0x698] sm:$0xff]  ;;  %4623 = vst.msk [vmem:[%s6464_s9 + $0x290] sm:$0xff] %vm272_vm0, %v4367_v27  ;;  %v4368_v35 = vadd.f32 %v7258_v0, %v4105_v33  ;;  %3848 = vst.msk [vmem:[#allocation2 + $0x2a8] sm:$0xff] %vm272_vm0, %v3591_v29  ;;  %v747_v21 = vld [vmem:[#allocation2 + $0x6d0] sm:$0xff] }
 0x270   : > { %4751 = vst.msk [vmem:[%s6464_s9 + $0x690] sm:$0xff] %vm272_vm0, %v4495_v28  ;;  %v4496_v36 = vadd.f32 %v7258_v0, %v4233_v34  ;;  %3976 = vst.msk [vmem:[#allocation2 + $0x6a8] sm:$0xff] %vm272_vm0, %v3719_v30  ;;  %v748_v27 = vld [vmem:[#allocation2 + $0x6d8] sm:$0xff] }
 0x271   : > { %4624 = vst.msk [vmem:[%s6464_s9 + $0x298] sm:$0xff] %vm272_vm0, %v4368_v35 }
 0x272   : > { %4752 = vst.msk [vmem:[%s6464_s9 + $0x698] sm:$0xff] %vm272_vm0, %v4496_v36  ;;  %v2827_v39 = vpop.f32.mrb[172].mxu0  ;;  %v3339_v40 = vpop.f32.mrb[172].mxu1 }
 0x273   : > { %v3592_v43 = vadd.f32 %v2827_v39, %v615_v37  ;;  %v3720_v44 = vadd.f32 %v3339_v40, %v743_v38  ;;  %v2829_v45 = vpop.f32.mrb[173].mxu0  ;;  %v3341_v46 = vpop.f32.mrb[173].mxu1 }
 0x274   : > { %v4106_v47 = vld [vmem:[#allocation2 + $0x2a0] sm:$0xff]  ;;  %v2830_v49 = vpop.f32.mrb[174].mxu0  ;;  %v3342_v50 = vpop.f32.mrb[174].mxu1 }
 0x275   : > { %v4234_v48 = vld [vmem:[#allocation2 + $0x6a0] sm:$0xff]  ;;  %v4369_v51 = vadd.f32 %v7258_v0, %v4106_v47  ;;  %3849 = vst.msk [vmem:[#allocation2 + $0x2b0] sm:$0xff] %vm272_vm0, %v3592_v43  ;;  %3977 = vst.msk [vmem:[#allocation2 + $0x6b0] sm:$0xff] %vm272_vm0, %v3720_v44  ;;  %v3593_v53 = vadd.f32 %v2830_v49, %v616_v41  ;;  %v3721_v54 = vadd.f32 %v3342_v50, %v744_v42  ;;  %v2832_v55 = vpop.f32.mrb[175].mxu0  ;;  %v3344_v56 = vpop.f32.mrb[175].mxu1  ;;  %v622_v50 = vld [vmem:[#allocation2 + $0x2e8] sm:$0xff] }
 0x276   : > { %v4497_v52 = vadd.f32 %v7258_v0, %v4234_v48  ;;  %v4107_v57 = vld [vmem:[#allocation2 + $0x2a8] sm:$0xff]  ;;  %v621_v46 = vld [vmem:[#allocation2 + $0x2e0] sm:$0xff] }
 0x277   : > { %v4235_v58 = vld [vmem:[#allocation2 + $0x6a8] sm:$0xff]  ;;  %4625 = vst.msk [vmem:[%s6464_s9 + $0x2a0] sm:$0xff] %vm272_vm0, %v4369_v51  ;;  %v4370_v59 = vadd.f32 %v7258_v0, %v4107_v57  ;;  %3850 = vst.msk [vmem:[#allocation2 + $0x2b8] sm:$0xff] %vm272_vm0, %v3593_v53  ;;  %v749_v47 = vld [vmem:[#allocation2 + $0x6e0] sm:$0xff] }
 0x278   : > { %4753 = vst.msk [vmem:[%s6464_s9 + $0x6a0] sm:$0xff] %vm272_vm0, %v4497_v52  ;;  %v4498_v24 = vadd.f32 %v7258_v0, %v4235_v58  ;;  %3978 = vst.msk [vmem:[#allocation2 + $0x6b8] sm:$0xff] %vm272_vm0, %v3721_v54  ;;  %v750_v51 = vld [vmem:[#allocation2 + $0x6e8] sm:$0xff] }
 0x279   : > { %4626 = vst.msk [vmem:[%s6464_s9 + $0x2a8] sm:$0xff] %vm272_vm0, %v4370_v59 }
 0x27a   : > { %4754 = vst.msk [vmem:[%s6464_s9 + $0x6a8] sm:$0xff] %vm272_vm0, %v4498_v24  ;;  %v2835_v61 = vpop.f32.mrb[176].mxu0  ;;  %v3347_v62 = vpop.f32.mrb[176].mxu1 }
 0x27b   : > { %v3594_v2 = vadd.f32 %v2835_v61, %v617_v60  ;;  %v3722_v3 = vadd.f32 %v3347_v62, %v745_v9  ;;  %v2837_v4 = vpop.f32.mrb[177].mxu0  ;;  %v3349_v5 = vpop.f32.mrb[177].mxu1 }
 0x27c   : > { %v4108_v6 = vld [vmem:[#allocation2 + $0x2b0] sm:$0xff]  ;;  %v2838_v8 = vpop.f32.mrb[178].mxu0  ;;  %v3350_v22 = vpop.f32.mrb[178].mxu1 }
 0x27d   : > { %v4236_v7 = vld [vmem:[#allocation2 + $0x6b0] sm:$0xff]  ;;  %v4371_v10 = vadd.f32 %v7258_v0, %v4108_v6  ;;  %3851 = vst.msk [vmem:[#allocation2 + $0x2c0] sm:$0xff] %vm272_vm0, %v3594_v2  ;;  %3979 = vst.msk [vmem:[#allocation2 + $0x6c0] sm:$0xff] %vm272_vm0, %v3722_v3  ;;  %v3595_v12 = vadd.f32 %v2838_v8, %v618_v63  ;;  %v3723_v13 = vadd.f32 %v3350_v22, %v746_v1  ;;  %v2840_v14 = vpop.f32.mrb[179].mxu0  ;;  %v3352_v15 = vpop.f32.mrb[179].mxu1  ;;  %v624_v22 = vld [vmem:[#allocation2 + $0x2f8] sm:$0xff] }
 0x27e   : > { %v4499_v11 = vadd.f32 %v7258_v0, %v4236_v7  ;;  %v4109_v16 = vld [vmem:[#allocation2 + $0x2b8] sm:$0xff]  ;;  %v623_v5 = vld [vmem:[#allocation2 + $0x2f0] sm:$0xff] }
 0x27f   : > { %v4237_v17 = vld [vmem:[#allocation2 + $0x6b8] sm:$0xff]  ;;  %4627 = vst.msk [vmem:[%s6464_s9 + $0x2b0] sm:$0xff] %vm272_vm0, %v4371_v10  ;;  %v4372_v18 = vadd.f32 %v7258_v0, %v4109_v16  ;;  %3852 = vst.msk [vmem:[#allocation2 + $0x2c8] sm:$0xff] %vm272_vm0, %v3595_v12  ;;  %v751_v6 = vld [vmem:[#allocation2 + $0x6f0] sm:$0xff] }
 0x280   : > { %4755 = vst.msk [vmem:[%s6464_s9 + $0x6b0] sm:$0xff] %vm272_vm0, %v4499_v11  ;;  %v4500_v19 = vadd.f32 %v7258_v0, %v4237_v17  ;;  %3980 = vst.msk [vmem:[#allocation2 + $0x6c8] sm:$0xff] %vm272_vm0, %v3723_v13  ;;  %v752_v10 = vld [vmem:[#allocation2 + $0x6f8] sm:$0xff] }
 0x281   : > { %4628 = vst.msk [vmem:[%s6464_s9 + $0x2b8] sm:$0xff] %vm272_vm0, %v4372_v18 }
 0x282   : > { %4756 = vst.msk [vmem:[%s6464_s9 + $0x6b8] sm:$0xff] %vm272_vm0, %v4500_v19  ;;  %v2843_v23 = vpop.f32.mrb[180].mxu0  ;;  %v3355_v25 = vpop.f32.mrb[180].mxu1 }
 0x283   : > { %v3596_v28 = vadd.f32 %v2843_v23, %v619_v20  ;;  %v3724_v29 = vadd.f32 %v3355_v25, %v747_v21  ;;  %v2845_v30 = vpop.f32.mrb[181].mxu0  ;;  %v3357_v31 = vpop.f32.mrb[181].mxu1 }
 0x284   : > { %v4110_v32 = vld [vmem:[#allocation2 + $0x2c0] sm:$0xff]  ;;  %v2846_v34 = vpop.f32.mrb[182].mxu0  ;;  %v3358_v35 = vpop.f32.mrb[182].mxu1 }
 0x285   : > { %v4238_v33 = vld [vmem:[#allocation2 + $0x6c0] sm:$0xff]  ;;  %v4373_v36 = vadd.f32 %v7258_v0, %v4110_v32  ;;  %3853 = vst.msk [vmem:[#allocation2 + $0x2d0] sm:$0xff] %vm272_vm0, %v3596_v28  ;;  %3981 = vst.msk [vmem:[#allocation2 + $0x6d0] sm:$0xff] %vm272_vm0, %v3724_v29  ;;  %v3597_v38 = vadd.f32 %v2846_v34, %v620_v26  ;;  %v3725_v39 = vadd.f32 %v3358_v35, %v748_v27  ;;  %v2848_v40 = vpop.f32.mrb[183].mxu0  ;;  %v3360_v41 = vpop.f32.mrb[183].mxu1  ;;  %v626_v35 = vld [vmem:[#allocation2 + $0x308] sm:$0xff] }
 0x286   : > { %v4501_v37 = vadd.f32 %v7258_v0, %v4238_v33  ;;  %v4111_v42 = vld [vmem:[#allocation2 + $0x2c8] sm:$0xff]  ;;  %v625_v31 = vld [vmem:[#allocation2 + $0x300] sm:$0xff] }
 0x287   : > { %v4239_v43 = vld [vmem:[#allocation2 + $0x6c8] sm:$0xff]  ;;  %4629 = vst.msk [vmem:[%s6464_s9 + $0x2c0] sm:$0xff] %vm272_vm0, %v4373_v36  ;;  %v4374_v44 = vadd.f32 %v7258_v0, %v4111_v42  ;;  %3854 = vst.msk [vmem:[#allocation2 + $0x2d8] sm:$0xff] %vm272_vm0, %v3597_v38  ;;  %v753_v32 = vld [vmem:[#allocation2 + $0x700] sm:$0xff] }
 0x288   : > { %4757 = vst.msk [vmem:[%s6464_s9 + $0x6c0] sm:$0xff] %vm272_vm0, %v4501_v37  ;;  %v4502_v45 = vadd.f32 %v7258_v0, %v4239_v43  ;;  %3982 = vst.msk [vmem:[#allocation2 + $0x6d8] sm:$0xff] %vm272_vm0, %v3725_v39  ;;  %v754_v36 = vld [vmem:[#allocation2 + $0x708] sm:$0xff] }
 0x289   : > { %4630 = vst.msk [vmem:[%s6464_s9 + $0x2c8] sm:$0xff] %vm272_vm0, %v4374_v44 }
 0x28a   : > { %4758 = vst.msk [vmem:[%s6464_s9 + $0x6c8] sm:$0xff] %vm272_vm0, %v4502_v45  ;;  %v2851_v48 = vpop.f32.mrb[184].mxu0  ;;  %v3363_v49 = vpop.f32.mrb[184].mxu1 }
 0x28b   : > { %v3598_v52 = vadd.f32 %v2851_v48, %v621_v46  ;;  %v3726_v53 = vadd.f32 %v3363_v49, %v749_v47  ;;  %v2853_v54 = vpop.f32.mrb[185].mxu0  ;;  %v3365_v55 = vpop.f32.mrb[185].mxu1 }
 0x28c   : > { %v4112_v56 = vld [vmem:[#allocation2 + $0x2d0] sm:$0xff]  ;;  %v2854_v58 = vpop.f32.mrb[186].mxu0  ;;  %v3366_v59 = vpop.f32.mrb[186].mxu1 }
 0x28d   : > { %v4240_v57 = vld [vmem:[#allocation2 + $0x6d0] sm:$0xff]  ;;  %v4375_v24 = vadd.f32 %v7258_v0, %v4112_v56  ;;  %3855 = vst.msk [vmem:[#allocation2 + $0x2e0] sm:$0xff] %vm272_vm0, %v3598_v52  ;;  %3983 = vst.msk [vmem:[#allocation2 + $0x6e0] sm:$0xff] %vm272_vm0, %v3726_v53  ;;  %v3599_v9 = vadd.f32 %v2854_v58, %v622_v50  ;;  %v3727_v61 = vadd.f32 %v3366_v59, %v750_v51  ;;  %v2856_v62 = vpop.f32.mrb[187].mxu0  ;;  %v3368_v63 = vpop.f32.mrb[187].mxu1  ;;  %v628_v59 = vld [vmem:[#allocation2 + $0x318] sm:$0xff] }
 0x28e   : > { %v4503_v60 = vadd.f32 %v7258_v0, %v4240_v57  ;;  %v4113_v1 = vld [vmem:[#allocation2 + $0x2d8] sm:$0xff]  ;;  %v627_v55 = vld [vmem:[#allocation2 + $0x310] sm:$0xff] }
 0x28f   : > { %v4241_v2 = vld [vmem:[#allocation2 + $0x6d8] sm:$0xff]  ;;  %4631 = vst.msk [vmem:[%s6464_s9 + $0x2d0] sm:$0xff] %vm272_vm0, %v4375_v24  ;;  %v4376_v3 = vadd.f32 %v7258_v0, %v4113_v1  ;;  %3856 = vst.msk [vmem:[#allocation2 + $0x2e8] sm:$0xff] %vm272_vm0, %v3599_v9  ;;  %v755_v56 = vld [vmem:[#allocation2 + $0x710] sm:$0xff] }
 0x290   : > { %4759 = vst.msk [vmem:[%s6464_s9 + $0x6d0] sm:$0xff] %vm272_vm0, %v4503_v60  ;;  %v4504_v4 = vadd.f32 %v7258_v0, %v4241_v2  ;;  %3984 = vst.msk [vmem:[#allocation2 + $0x6e8] sm:$0xff] %vm272_vm0, %v3727_v61  ;;  %v756_v24 = vld [vmem:[#allocation2 + $0x718] sm:$0xff] }
 0x291   : > { %4632 = vst.msk [vmem:[%s6464_s9 + $0x2d8] sm:$0xff] %vm272_vm0, %v4376_v3 }
 0x292   : > { %4760 = vst.msk [vmem:[%s6464_s9 + $0x6d8] sm:$0xff] %vm272_vm0, %v4504_v4  ;;  %v2859_v7 = vpop.f32.mrb[188].mxu0  ;;  %v3371_v8 = vpop.f32.mrb[188].mxu1 }
 0x293   : > { %v3600_v11 = vadd.f32 %v2859_v7, %v623_v5  ;;  %v3728_v12 = vadd.f32 %v3371_v8, %v751_v6  ;;  %v2861_v13 = vpop.f32.mrb[189].mxu0  ;;  %v3373_v14 = vpop.f32.mrb[189].mxu1 }
 0x294   : > { %v4114_v15 = vld [vmem:[#allocation2 + $0x2e0] sm:$0xff]  ;;  %v2862_v17 = vpop.f32.mrb[190].mxu0  ;;  %v3374_v18 = vpop.f32.mrb[190].mxu1 }
 0x295   : > { %v4242_v16 = vld [vmem:[#allocation2 + $0x6e0] sm:$0xff]  ;;  %v4377_v19 = vadd.f32 %v7258_v0, %v4114_v15  ;;  %3857 = vst.msk [vmem:[#allocation2 + $0x2f0] sm:$0xff] %vm272_vm0, %v3600_v11  ;;  %3985 = vst.msk [vmem:[#allocation2 + $0x6f0] sm:$0xff] %vm272_vm0, %v3728_v12  ;;  %v3601_v21 = vadd.f32 %v2862_v17, %v624_v22  ;;  %v3729_v23 = vadd.f32 %v3374_v18, %v752_v10  ;;  %v2864_v25 = vpop.f32.mrb[191].mxu0  ;;  %v3376_v26 = vpop.f32.mrb[191].mxu1  ;;  %v630_v18 = vld [vmem:[#allocation2 + $0x328] sm:$0xff] }
 0x296   : > { %v4505_v20 = vadd.f32 %v7258_v0, %v4242_v16  ;;  %v4115_v27 = vld [vmem:[#allocation2 + $0x2e8] sm:$0xff]  ;;  %v629_v14 = vld [vmem:[#allocation2 + $0x320] sm:$0xff] }
 0x297   : > { %v4243_v28 = vld [vmem:[#allocation2 + $0x6e8] sm:$0xff]  ;;  %4633 = vst.msk [vmem:[%s6464_s9 + $0x2e0] sm:$0xff] %vm272_vm0, %v4377_v19  ;;  %v4378_v29 = vadd.f32 %v7258_v0, %v4115_v27  ;;  %3858 = vst.msk [vmem:[#allocation2 + $0x2f8] sm:$0xff] %vm272_vm0, %v3601_v21  ;;  %v757_v15 = vld [vmem:[#allocation2 + $0x720] sm:$0xff] }
 0x298   : > { %4761 = vst.msk [vmem:[%s6464_s9 + $0x6e0] sm:$0xff] %vm272_vm0, %v4505_v20  ;;  %v4506_v30 = vadd.f32 %v7258_v0, %v4243_v28  ;;  %3986 = vst.msk [vmem:[#allocation2 + $0x6f8] sm:$0xff] %vm272_vm0, %v3729_v23  ;;  %v758_v19 = vld [vmem:[#allocation2 + $0x728] sm:$0xff] }
 0x299   : > { %4634 = vst.msk [vmem:[%s6464_s9 + $0x2e8] sm:$0xff] %vm272_vm0, %v4378_v29 }
 0x29a   : > { %4762 = vst.msk [vmem:[%s6464_s9 + $0x6e8] sm:$0xff] %vm272_vm0, %v4506_v30  ;;  %v2867_v33 = vpop.f32.mrb[192].mxu0  ;;  %v3379_v34 = vpop.f32.mrb[192].mxu1 }
 0x29b   : > { %v3602_v37 = vadd.f32 %v2867_v33, %v625_v31  ;;  %v3730_v38 = vadd.f32 %v3379_v34, %v753_v32  ;;  %v2869_v39 = vpop.f32.mrb[193].mxu0  ;;  %v3381_v40 = vpop.f32.mrb[193].mxu1 }
 0x29c   : > { %v4116_v41 = vld [vmem:[#allocation2 + $0x2f0] sm:$0xff]  ;;  %v2870_v43 = vpop.f32.mrb[194].mxu0  ;;  %v3382_v44 = vpop.f32.mrb[194].mxu1 }
 0x29d   : > { %v4244_v42 = vld [vmem:[#allocation2 + $0x6f0] sm:$0xff]  ;;  %v4379_v45 = vadd.f32 %v7258_v0, %v4116_v41  ;;  %3859 = vst.msk [vmem:[#allocation2 + $0x300] sm:$0xff] %vm272_vm0, %v3602_v37  ;;  %3987 = vst.msk [vmem:[#allocation2 + $0x700] sm:$0xff] %vm272_vm0, %v3730_v38  ;;  %v3603_v47 = vadd.f32 %v2870_v43, %v626_v35  ;;  %v3731_v48 = vadd.f32 %v3382_v44, %v754_v36  ;;  %v2872_v49 = vpop.f32.mrb[195].mxu0  ;;  %v3384_v50 = vpop.f32.mrb[195].mxu1  ;;  %v632_v44 = vld [vmem:[#allocation2 + $0x338] sm:$0xff] }
 0x29e   : > { %v4507_v46 = vadd.f32 %v7258_v0, %v4244_v42  ;;  %v4117_v51 = vld [vmem:[#allocation2 + $0x2f8] sm:$0xff]  ;;  %v631_v40 = vld [vmem:[#allocation2 + $0x330] sm:$0xff] }
 0x29f   : > { %v4245_v52 = vld [vmem:[#allocation2 + $0x6f8] sm:$0xff]  ;;  %4635 = vst.msk [vmem:[%s6464_s9 + $0x2f0] sm:$0xff] %vm272_vm0, %v4379_v45  ;;  %v4380_v53 = vadd.f32 %v7258_v0, %v4117_v51  ;;  %3860 = vst.msk [vmem:[#allocation2 + $0x308] sm:$0xff] %vm272_vm0, %v3603_v47  ;;  %v759_v41 = vld [vmem:[#allocation2 + $0x730] sm:$0xff] }
 0x2a0   : > { %4763 = vst.msk [vmem:[%s6464_s9 + $0x6f0] sm:$0xff] %vm272_vm0, %v4507_v46  ;;  %v4508_v54 = vadd.f32 %v7258_v0, %v4245_v52  ;;  %3988 = vst.msk [vmem:[#allocation2 + $0x708] sm:$0xff] %vm272_vm0, %v3731_v48  ;;  %v760_v45 = vld [vmem:[#allocation2 + $0x738] sm:$0xff] }
 0x2a1   : > { %4636 = vst.msk [vmem:[%s6464_s9 + $0x2f8] sm:$0xff] %vm272_vm0, %v4380_v53 }
 0x2a2   : > { %4764 = vst.msk [vmem:[%s6464_s9 + $0x6f8] sm:$0xff] %vm272_vm0, %v4508_v54  ;;  %v2875_v57 = vpop.f32.mrb[196].mxu0  ;;  %v3387_v58 = vpop.f32.mrb[196].mxu1 }
 0x2a3   : > { %v3604_v60 = vadd.f32 %v2875_v57, %v627_v55  ;;  %v3732_v9 = vadd.f32 %v3387_v58, %v755_v56  ;;  %v2877_v61 = vpop.f32.mrb[197].mxu0  ;;  %v3389_v62 = vpop.f32.mrb[197].mxu1 }
 0x2a4   : > { %v4118_v63 = vld [vmem:[#allocation2 + $0x300] sm:$0xff]  ;;  %v2878_v2 = vpop.f32.mrb[198].mxu0  ;;  %v3390_v3 = vpop.f32.mrb[198].mxu1 }
 0x2a5   : > { %v4246_v1 = vld [vmem:[#allocation2 + $0x700] sm:$0xff]  ;;  %v4381_v4 = vadd.f32 %v7258_v0, %v4118_v63  ;;  %3861 = vst.msk [vmem:[#allocation2 + $0x310] sm:$0xff] %vm272_vm0, %v3604_v60  ;;  %3989 = vst.msk [vmem:[#allocation2 + $0x710] sm:$0xff] %vm272_vm0, %v3732_v9  ;;  %v3605_v6 = vadd.f32 %v2878_v2, %v628_v59  ;;  %v3733_v7 = vadd.f32 %v3390_v3, %v756_v24  ;;  %v2880_v8 = vpop.f32.mrb[199].mxu0  ;;  %v3392_v22 = vpop.f32.mrb[199].mxu1  ;;  %v634_v3 = vld [vmem:[#allocation2 + $0x348] sm:$0xff] }
 0x2a6   : > { %v4509_v5 = vadd.f32 %v7258_v0, %v4246_v1  ;;  %v4119_v10 = vld [vmem:[#allocation2 + $0x308] sm:$0xff]  ;;  %v633_v62 = vld [vmem:[#allocation2 + $0x340] sm:$0xff] }
 0x2a7   : > { %v4247_v11 = vld [vmem:[#allocation2 + $0x708] sm:$0xff]  ;;  %4637 = vst.msk [vmem:[%s6464_s9 + $0x300] sm:$0xff] %vm272_vm0, %v4381_v4  ;;  %v4382_v12 = vadd.f32 %v7258_v0, %v4119_v10  ;;  %3862 = vst.msk [vmem:[#allocation2 + $0x318] sm:$0xff] %vm272_vm0, %v3605_v6  ;;  %v761_v63 = vld [vmem:[#allocation2 + $0x740] sm:$0xff] }
 0x2a8   : > { %4765 = vst.msk [vmem:[%s6464_s9 + $0x700] sm:$0xff] %vm272_vm0, %v4509_v5  ;;  %v4510_v13 = vadd.f32 %v7258_v0, %v4247_v11  ;;  %3990 = vst.msk [vmem:[#allocation2 + $0x718] sm:$0xff] %vm272_vm0, %v3733_v7  ;;  %v762_v4 = vld [vmem:[#allocation2 + $0x748] sm:$0xff] }
 0x2a9   : > { %4638 = vst.msk [vmem:[%s6464_s9 + $0x308] sm:$0xff] %vm272_vm0, %v4382_v12 }
 0x2aa   : > { %4766 = vst.msk [vmem:[%s6464_s9 + $0x708] sm:$0xff] %vm272_vm0, %v4510_v13  ;;  %v2883_v16 = vpop.f32.mrb[200].mxu0  ;;  %v3395_v17 = vpop.f32.mrb[200].mxu1 }
 0x2ab   : > { %v3606_v20 = vadd.f32 %v2883_v16, %v629_v14  ;;  %v3734_v21 = vadd.f32 %v3395_v17, %v757_v15  ;;  %v2885_v23 = vpop.f32.mrb[201].mxu0  ;;  %v3397_v25 = vpop.f32.mrb[201].mxu1 }
 0x2ac   : > { %v4120_v26 = vld [vmem:[#allocation2 + $0x310] sm:$0xff]  ;;  %v2886_v28 = vpop.f32.mrb[202].mxu0  ;;  %v3398_v29 = vpop.f32.mrb[202].mxu1 }
 0x2ad   : > { %v4248_v27 = vld [vmem:[#allocation2 + $0x710] sm:$0xff]  ;;  %v4383_v30 = vadd.f32 %v7258_v0, %v4120_v26  ;;  %3863 = vst.msk [vmem:[#allocation2 + $0x320] sm:$0xff] %vm272_vm0, %v3606_v20  ;;  %3991 = vst.msk [vmem:[#allocation2 + $0x720] sm:$0xff] %vm272_vm0, %v3734_v21  ;;  %v3607_v32 = vadd.f32 %v2886_v28, %v630_v18  ;;  %v3735_v33 = vadd.f32 %v3398_v29, %v758_v19  ;;  %v2888_v34 = vpop.f32.mrb[203].mxu0  ;;  %v3400_v35 = vpop.f32.mrb[203].mxu1  ;;  %v636_v29 = vld [vmem:[#allocation2 + $0x358] sm:$0xff] }
 0x2ae   : > { %v4511_v31 = vadd.f32 %v7258_v0, %v4248_v27  ;;  %v4121_v36 = vld [vmem:[#allocation2 + $0x318] sm:$0xff]  ;;  %v635_v25 = vld [vmem:[#allocation2 + $0x350] sm:$0xff] }
 0x2af   : > { %v4249_v37 = vld [vmem:[#allocation2 + $0x718] sm:$0xff]  ;;  %4639 = vst.msk [vmem:[%s6464_s9 + $0x310] sm:$0xff] %vm272_vm0, %v4383_v30  ;;  %v4384_v38 = vadd.f32 %v7258_v0, %v4121_v36  ;;  %3864 = vst.msk [vmem:[#allocation2 + $0x328] sm:$0xff] %vm272_vm0, %v3607_v32  ;;  %v763_v26 = vld [vmem:[#allocation2 + $0x750] sm:$0xff] }
 0x2b0   : > { %4767 = vst.msk [vmem:[%s6464_s9 + $0x710] sm:$0xff] %vm272_vm0, %v4511_v31  ;;  %v4512_v39 = vadd.f32 %v7258_v0, %v4249_v37  ;;  %3992 = vst.msk [vmem:[#allocation2 + $0x728] sm:$0xff] %vm272_vm0, %v3735_v33  ;;  %v764_v30 = vld [vmem:[#allocation2 + $0x758] sm:$0xff] }
 0x2b1   : > { %4640 = vst.msk [vmem:[%s6464_s9 + $0x318] sm:$0xff] %vm272_vm0, %v4384_v38 }
 0x2b2   : > { %4768 = vst.msk [vmem:[%s6464_s9 + $0x718] sm:$0xff] %vm272_vm0, %v4512_v39  ;;  %v2891_v42 = vpop.f32.mrb[204].mxu0  ;;  %v3403_v43 = vpop.f32.mrb[204].mxu1 }
 0x2b3   : > { %v3608_v46 = vadd.f32 %v2891_v42, %v631_v40  ;;  %v3736_v47 = vadd.f32 %v3403_v43, %v759_v41  ;;  %v2893_v48 = vpop.f32.mrb[205].mxu0  ;;  %v3405_v49 = vpop.f32.mrb[205].mxu1 }
 0x2b4   : > { %v4122_v50 = vld [vmem:[#allocation2 + $0x320] sm:$0xff]  ;;  %v2894_v52 = vpop.f32.mrb[206].mxu0  ;;  %v3406_v53 = vpop.f32.mrb[206].mxu1 }
 0x2b5   : > { %v4250_v51 = vld [vmem:[#allocation2 + $0x720] sm:$0xff]  ;;  %v4385_v54 = vadd.f32 %v7258_v0, %v4122_v50  ;;  %3865 = vst.msk [vmem:[#allocation2 + $0x330] sm:$0xff] %vm272_vm0, %v3608_v46  ;;  %3993 = vst.msk [vmem:[#allocation2 + $0x730] sm:$0xff] %vm272_vm0, %v3736_v47  ;;  %v3609_v56 = vadd.f32 %v2894_v52, %v632_v44  ;;  %v3737_v57 = vadd.f32 %v3406_v53, %v760_v45  ;;  %v2896_v58 = vpop.f32.mrb[207].mxu0  ;;  %v3408_v59 = vpop.f32.mrb[207].mxu1  ;;  %v638_v53 = vld [vmem:[#allocation2 + $0x368] sm:$0xff] }
 0x2b6   : > { %v4513_v55 = vadd.f32 %v7258_v0, %v4250_v51  ;;  %v4123_v24 = vld [vmem:[#allocation2 + $0x328] sm:$0xff]  ;;  %v637_v49 = vld [vmem:[#allocation2 + $0x360] sm:$0xff] }
 0x2b7   : > { %v4251_v60 = vld [vmem:[#allocation2 + $0x728] sm:$0xff]  ;;  %4641 = vst.msk [vmem:[%s6464_s9 + $0x320] sm:$0xff] %vm272_vm0, %v4385_v54  ;;  %v4386_v9 = vadd.f32 %v7258_v0, %v4123_v24  ;;  %3866 = vst.msk [vmem:[#allocation2 + $0x338] sm:$0xff] %vm272_vm0, %v3609_v56  ;;  %v765_v50 = vld [vmem:[#allocation2 + $0x760] sm:$0xff] }
 0x2b8   : > { %4769 = vst.msk [vmem:[%s6464_s9 + $0x720] sm:$0xff] %vm272_vm0, %v4513_v55  ;;  %v4514_v61 = vadd.f32 %v7258_v0, %v4251_v60  ;;  %3994 = vst.msk [vmem:[#allocation2 + $0x738] sm:$0xff] %vm272_vm0, %v3737_v57  ;;  %v766_v54 = vld [vmem:[#allocation2 + $0x768] sm:$0xff] }
 0x2b9   : > { %4642 = vst.msk [vmem:[%s6464_s9 + $0x328] sm:$0xff] %vm272_vm0, %v4386_v9 }
 0x2ba   : > { %4770 = vst.msk [vmem:[%s6464_s9 + $0x728] sm:$0xff] %vm272_vm0, %v4514_v61  ;;  %v2899_v1 = vpop.f32.mrb[208].mxu0  ;;  %v3411_v2 = vpop.f32.mrb[208].mxu1 }
 0x2bb   : > { %v3610_v5 = vadd.f32 %v2899_v1, %v633_v62  ;;  %v3738_v6 = vadd.f32 %v3411_v2, %v761_v63  ;;  %v2901_v7 = vpop.f32.mrb[209].mxu0  ;;  %v3413_v8 = vpop.f32.mrb[209].mxu1 }
 0x2bc   : > { %v4124_v22 = vld [vmem:[#allocation2 + $0x330] sm:$0xff]  ;;  %v2902_v11 = vpop.f32.mrb[210].mxu0  ;;  %v3414_v12 = vpop.f32.mrb[210].mxu1 }
 0x2bd   : > { %v4252_v10 = vld [vmem:[#allocation2 + $0x730] sm:$0xff]  ;;  %v4387_v13 = vadd.f32 %v7258_v0, %v4124_v22  ;;  %3867 = vst.msk [vmem:[#allocation2 + $0x340] sm:$0xff] %vm272_vm0, %v3610_v5  ;;  %3995 = vst.msk [vmem:[#allocation2 + $0x740] sm:$0xff] %vm272_vm0, %v3738_v6  ;;  %v3611_v15 = vadd.f32 %v2902_v11, %v634_v3  ;;  %v3739_v16 = vadd.f32 %v3414_v12, %v762_v4  ;;  %v2904_v17 = vpop.f32.mrb[211].mxu0  ;;  %v3416_v18 = vpop.f32.mrb[211].mxu1  ;;  %v640_v12 = vld [vmem:[#allocation2 + $0x378] sm:$0xff] }
 0x2be   : > { %v4515_v14 = vadd.f32 %v7258_v0, %v4252_v10  ;;  %v4125_v19 = vld [vmem:[#allocation2 + $0x338] sm:$0xff]  ;;  %v639_v8 = vld [vmem:[#allocation2 + $0x370] sm:$0xff] }
 0x2bf   : > { %v4253_v20 = vld [vmem:[#allocation2 + $0x738] sm:$0xff]  ;;  %4643 = vst.msk [vmem:[%s6464_s9 + $0x330] sm:$0xff] %vm272_vm0, %v4387_v13  ;;  %v4388_v21 = vadd.f32 %v7258_v0, %v4125_v19  ;;  %3868 = vst.msk [vmem:[#allocation2 + $0x348] sm:$0xff] %vm272_vm0, %v3611_v15  ;;  %v767_v22 = vld [vmem:[#allocation2 + $0x770] sm:$0xff] }
 0x2c0   : > { %4771 = vst.msk [vmem:[%s6464_s9 + $0x730] sm:$0xff] %vm272_vm0, %v4515_v14  ;;  %v4516_v23 = vadd.f32 %v7258_v0, %v4253_v20  ;;  %3996 = vst.msk [vmem:[#allocation2 + $0x748] sm:$0xff] %vm272_vm0, %v3739_v16  ;;  %v768_v13 = vld [vmem:[#allocation2 + $0x778] sm:$0xff] }
 0x2c1   : > { %4644 = vst.msk [vmem:[%s6464_s9 + $0x338] sm:$0xff] %vm272_vm0, %v4388_v21 }
 0x2c2   : > { %4772 = vst.msk [vmem:[%s6464_s9 + $0x738] sm:$0xff] %vm272_vm0, %v4516_v23  ;;  %v2907_v27 = vpop.f32.mrb[212].mxu0  ;;  %v3419_v28 = vpop.f32.mrb[212].mxu1 }
 0x2c3   : > { %v3612_v31 = vadd.f32 %v2907_v27, %v635_v25  ;;  %v3740_v32 = vadd.f32 %v3419_v28, %v763_v26  ;;  %v2909_v33 = vpop.f32.mrb[213].mxu0  ;;  %v3421_v34 = vpop.f32.mrb[213].mxu1 }
 0x2c4   : > { %v4126_v35 = vld [vmem:[#allocation2 + $0x340] sm:$0xff]  ;;  %v2910_v37 = vpop.f32.mrb[214].mxu0  ;;  %v3422_v38 = vpop.f32.mrb[214].mxu1 }
 0x2c5   : > { %v4254_v36 = vld [vmem:[#allocation2 + $0x740] sm:$0xff]  ;;  %v4389_v39 = vadd.f32 %v7258_v0, %v4126_v35  ;;  %3869 = vst.msk [vmem:[#allocation2 + $0x350] sm:$0xff] %vm272_vm0, %v3612_v31  ;;  %3997 = vst.msk [vmem:[#allocation2 + $0x750] sm:$0xff] %vm272_vm0, %v3740_v32  ;;  %v3613_v41 = vadd.f32 %v2910_v37, %v636_v29  ;;  %v3741_v42 = vadd.f32 %v3422_v38, %v764_v30  ;;  %v2912_v43 = vpop.f32.mrb[215].mxu0  ;;  %v3424_v44 = vpop.f32.mrb[215].mxu1  ;;  %v642_v38 = vld [vmem:[#allocation2 + $0x388] sm:$0xff] }
 0x2c6   : > { %v4517_v40 = vadd.f32 %v7258_v0, %v4254_v36  ;;  %v4127_v45 = vld [vmem:[#allocation2 + $0x348] sm:$0xff]  ;;  %v641_v34 = vld [vmem:[#allocation2 + $0x380] sm:$0xff] }
 0x2c7   : > { %v4255_v46 = vld [vmem:[#allocation2 + $0x748] sm:$0xff]  ;;  %4645 = vst.msk [vmem:[%s6464_s9 + $0x340] sm:$0xff] %vm272_vm0, %v4389_v39  ;;  %v4390_v47 = vadd.f32 %v7258_v0, %v4127_v45  ;;  %3870 = vst.msk [vmem:[#allocation2 + $0x358] sm:$0xff] %vm272_vm0, %v3613_v41  ;;  %v769_v35 = vld [vmem:[#allocation2 + $0x780] sm:$0xff] }
 0x2c8   : > { %4773 = vst.msk [vmem:[%s6464_s9 + $0x740] sm:$0xff] %vm272_vm0, %v4517_v40  ;;  %v4518_v48 = vadd.f32 %v7258_v0, %v4255_v46  ;;  %3998 = vst.msk [vmem:[#allocation2 + $0x758] sm:$0xff] %vm272_vm0, %v3741_v42  ;;  %v770_v39 = vld [vmem:[#allocation2 + $0x788] sm:$0xff] }
 0x2c9   : > { %4646 = vst.msk [vmem:[%s6464_s9 + $0x348] sm:$0xff] %vm272_vm0, %v4390_v47 }
 0x2ca   : > { %4774 = vst.msk [vmem:[%s6464_s9 + $0x748] sm:$0xff] %vm272_vm0, %v4518_v48  ;;  %v2915_v51 = vpop.f32.mrb[216].mxu0  ;;  %v3427_v52 = vpop.f32.mrb[216].mxu1 }
 0x2cb   : > { %v3614_v55 = vadd.f32 %v2915_v51, %v637_v49  ;;  %v3742_v56 = vadd.f32 %v3427_v52, %v765_v50  ;;  %v2917_v57 = vpop.f32.mrb[217].mxu0  ;;  %v3429_v58 = vpop.f32.mrb[217].mxu1 }
 0x2cc   : > { %v4128_v59 = vld [vmem:[#allocation2 + $0x350] sm:$0xff]  ;;  %v2918_v60 = vpop.f32.mrb[218].mxu0  ;;  %v3430_v9 = vpop.f32.mrb[218].mxu1 }
 0x2cd   : > { %v4256_v24 = vld [vmem:[#allocation2 + $0x750] sm:$0xff]  ;;  %v4391_v61 = vadd.f32 %v7258_v0, %v4128_v59  ;;  %3871 = vst.msk [vmem:[#allocation2 + $0x360] sm:$0xff] %vm272_vm0, %v3614_v55  ;;  %3999 = vst.msk [vmem:[#allocation2 + $0x760] sm:$0xff] %vm272_vm0, %v3742_v56  ;;  %v3615_v63 = vadd.f32 %v2918_v60, %v638_v53  ;;  %v3743_v1 = vadd.f32 %v3430_v9, %v766_v54  ;;  %v2920_v2 = vpop.f32.mrb[219].mxu0  ;;  %v3432_v3 = vpop.f32.mrb[219].mxu1  ;;  %v644_v9 = vld [vmem:[#allocation2 + $0x398] sm:$0xff] }
 0x2ce   : > { %v4519_v62 = vadd.f32 %v7258_v0, %v4256_v24  ;;  %v4129_v4 = vld [vmem:[#allocation2 + $0x358] sm:$0xff]  ;;  %v643_v58 = vld [vmem:[#allocation2 + $0x390] sm:$0xff] }
 0x2cf   : > { %v4257_v5 = vld [vmem:[#allocation2 + $0x758] sm:$0xff]  ;;  %4647 = vst.msk [vmem:[%s6464_s9 + $0x350] sm:$0xff] %vm272_vm0, %v4391_v61  ;;  %v4392_v6 = vadd.f32 %v7258_v0, %v4129_v4  ;;  %3872 = vst.msk [vmem:[#allocation2 + $0x368] sm:$0xff] %vm272_vm0, %v3615_v63  ;;  %v771_v59 = vld [vmem:[#allocation2 + $0x790] sm:$0xff] }
 0x2d0   : > { %4775 = vst.msk [vmem:[%s6464_s9 + $0x750] sm:$0xff] %vm272_vm0, %v4519_v62  ;;  %v4520_v7 = vadd.f32 %v7258_v0, %v4257_v5  ;;  %4000 = vst.msk [vmem:[#allocation2 + $0x768] sm:$0xff] %vm272_vm0, %v3743_v1  ;;  %v772_v61 = vld [vmem:[#allocation2 + $0x798] sm:$0xff] }
 0x2d1   : > { %4648 = vst.msk [vmem:[%s6464_s9 + $0x358] sm:$0xff] %vm272_vm0, %v4392_v6  ;;  %v7519_v6 = vld [vmem:[%s7656_s2] ss:$0 sm:$0xff] }
 0x2d2   : > { %4776 = vst.msk [vmem:[%s6464_s9 + $0x758] sm:$0xff] %vm272_vm0, %v4520_v7  ;;  %v2923_v10 = vpop.f32.mrb[220].mxu0  ;;  %v3435_v11 = vpop.f32.mrb[220].mxu1 }
 0x2d3   : > { %v3616_v14 = vadd.f32 %v2923_v10, %v639_v8  ;;  %v3744_v15 = vadd.f32 %v3435_v11, %v767_v22  ;;  %v2925_v16 = vpop.f32.mrb[221].mxu0  ;;  %v3437_v17 = vpop.f32.mrb[221].mxu1 }
 0x2d4   : > { %v4130_v18 = vld [vmem:[#allocation2 + $0x360] sm:$0xff]  ;;  %v2926_v20 = vpop.f32.mrb[222].mxu0  ;;  %v3438_v21 = vpop.f32.mrb[222].mxu1 }
 0x2d5   : > { %v4258_v19 = vld [vmem:[#allocation2 + $0x760] sm:$0xff]  ;;  %v4393_v23 = vadd.f32 %v7258_v0, %v4130_v18  ;;  %3873 = vst.msk [vmem:[#allocation2 + $0x370] sm:$0xff] %vm272_vm0, %v3616_v14  ;;  %4001 = vst.msk [vmem:[#allocation2 + $0x770] sm:$0xff] %vm272_vm0, %v3744_v15  ;;  %v3617_v26 = vadd.f32 %v2926_v20, %v640_v12  ;;  %v3745_v27 = vadd.f32 %v3438_v21, %v768_v13  ;;  %v2928_v28 = vpop.f32.mrb[223].mxu0  ;;  %v3440_v29 = vpop.f32.mrb[223].mxu1  ;;  %v646_v21 = vld [vmem:[#allocation2 + $0x3a8] sm:$0xff] }
 0x2d6   : > { %v4521_v25 = vadd.f32 %v7258_v0, %v4258_v19  ;;  %v4131_v30 = vld [vmem:[#allocation2 + $0x368] sm:$0xff]  ;;  %v645_v17 = vld [vmem:[#allocation2 + $0x3a0] sm:$0xff] }
 0x2d7   : > { %v4259_v31 = vld [vmem:[#allocation2 + $0x768] sm:$0xff]  ;;  %4649 = vst.msk [vmem:[%s6464_s9 + $0x360] sm:$0xff] %vm272_vm0, %v4393_v23  ;;  %v4394_v32 = vadd.f32 %v7258_v0, %v4131_v30  ;;  %3874 = vst.msk [vmem:[#allocation2 + $0x378] sm:$0xff] %vm272_vm0, %v3617_v26  ;;  %v773_v18 = vld [vmem:[#allocation2 + $0x7a0] sm:$0xff] }
 0x2d8   : > { %4777 = vst.msk [vmem:[%s6464_s9 + $0x760] sm:$0xff] %vm272_vm0, %v4521_v25  ;;  %v4522_v33 = vadd.f32 %v7258_v0, %v4259_v31  ;;  %4002 = vst.msk [vmem:[#allocation2 + $0x778] sm:$0xff] %vm272_vm0, %v3745_v27  ;;  %v774_v23 = vld [vmem:[#allocation2 + $0x7a8] sm:$0xff] }
 0x2d9   : > { %4650 = vst.msk [vmem:[%s6464_s9 + $0x368] sm:$0xff] %vm272_vm0, %v4394_v32 }
 0x2da   : > { %4778 = vst.msk [vmem:[%s6464_s9 + $0x768] sm:$0xff] %vm272_vm0, %v4522_v33  ;;  %v2931_v36 = vpop.f32.mrb[224].mxu0  ;;  %v3443_v37 = vpop.f32.mrb[224].mxu1 }
 0x2db   : > { %v3618_v40 = vadd.f32 %v2931_v36, %v641_v34  ;;  %v3746_v41 = vadd.f32 %v3443_v37, %v769_v35  ;;  %v2933_v42 = vpop.f32.mrb[225].mxu0  ;;  %v3445_v43 = vpop.f32.mrb[225].mxu1 }
 0x2dc   : > { %v4132_v44 = vld [vmem:[#allocation2 + $0x370] sm:$0xff]  ;;  %v2934_v46 = vpop.f32.mrb[226].mxu0  ;;  %v3446_v47 = vpop.f32.mrb[226].mxu1 }
 0x2dd   : > { %v4260_v45 = vld [vmem:[#allocation2 + $0x770] sm:$0xff]  ;;  %v4395_v48 = vadd.f32 %v7258_v0, %v4132_v44  ;;  %3875 = vst.msk [vmem:[#allocation2 + $0x380] sm:$0xff] %vm272_vm0, %v3618_v40  ;;  %4003 = vst.msk [vmem:[#allocation2 + $0x780] sm:$0xff] %vm272_vm0, %v3746_v41  ;;  %v3619_v50 = vadd.f32 %v2934_v46, %v642_v38  ;;  %v3747_v51 = vadd.f32 %v3446_v47, %v770_v39  ;;  %v2936_v52 = vpop.f32.mrb[227].mxu0  ;;  %v3448_v53 = vpop.f32.mrb[227].mxu1  ;;  %v648_v47 = vld [vmem:[#allocation2 + $0x3b8] sm:$0xff] }
 0x2de   : > { %v4523_v49 = vadd.f32 %v7258_v0, %v4260_v45  ;;  %v4133_v54 = vld [vmem:[#allocation2 + $0x378] sm:$0xff]  ;;  %v647_v43 = vld [vmem:[#allocation2 + $0x3b0] sm:$0xff] }
 0x2df   : > { %v4261_v55 = vld [vmem:[#allocation2 + $0x778] sm:$0xff]  ;;  %4651 = vst.msk [vmem:[%s6464_s9 + $0x370] sm:$0xff] %vm272_vm0, %v4395_v48  ;;  %v4396_v56 = vadd.f32 %v7258_v0, %v4133_v54  ;;  %3876 = vst.msk [vmem:[#allocation2 + $0x388] sm:$0xff] %vm272_vm0, %v3619_v50  ;;  %v775_v44 = vld [vmem:[#allocation2 + $0x7b0] sm:$0xff] }
 0x2e0   : > { %4779 = vst.msk [vmem:[%s6464_s9 + $0x770] sm:$0xff] %vm272_vm0, %v4523_v49  ;;  %v4524_v57 = vadd.f32 %v7258_v0, %v4261_v55  ;;  %4004 = vst.msk [vmem:[#allocation2 + $0x788] sm:$0xff] %vm272_vm0, %v3747_v51  ;;  %v776_v48 = vld [vmem:[#allocation2 + $0x7b8] sm:$0xff] }
 0x2e1   : > { %4652 = vst.msk [vmem:[%s6464_s9 + $0x378] sm:$0xff] %vm272_vm0, %v4396_v56 }
 0x2e2   : > { %4780 = vst.msk [vmem:[%s6464_s9 + $0x778] sm:$0xff] %vm272_vm0, %v4524_v57  ;;  %v2939_v24 = vpop.f32.mrb[228].mxu0  ;;  %v3451_v60 = vpop.f32.mrb[228].mxu1 }
 0x2e3   : > { %v3620_v62 = vadd.f32 %v2939_v24, %v643_v58  ;;  %v3748_v63 = vadd.f32 %v3451_v60, %v771_v59  ;;  %v2941_v1 = vpop.f32.mrb[229].mxu0  ;;  %v3453_v2 = vpop.f32.mrb[229].mxu1 }
 0x2e4   : > { %v4134_v0 = vld [vmem:[#allocation2 + $0x380] sm:$0xff]  ;;  %v2942_v4 = vpop.f32.mrb[230].mxu0  ;;  %v3454_v5 = vpop.f32.mrb[230].mxu1 }
 0x2e5   : > { %v4262_v3 = vld [vmem:[#allocation2 + $0x780] sm:$0xff]  ;;  %v4397_v7 = vadd.f32 %v7519_v6, %v4134_v0  ;;  %3877 = vst.msk [vmem:[#allocation2 + $0x390] sm:$0xff] %vm272_vm0, %v3620_v62  ;;  %4005 = vst.msk [vmem:[#allocation2 + $0x790] sm:$0xff] %vm272_vm0, %v3748_v63  ;;  %v3621_v22 = vadd.f32 %v2942_v4, %v644_v9  ;;  %v3749_v10 = vadd.f32 %v3454_v5, %v772_v61  ;;  %v2944_v11 = vpop.f32.mrb[231].mxu0  ;;  %v3456_v12 = vpop.f32.mrb[231].mxu1  ;;  %v650_v5 = vld [vmem:[#allocation2 + $0x3c8] sm:$0xff] }
 0x2e6   : > { %v4525_v8 = vadd.f32 %v7519_v6, %v4262_v3  ;;  %v4135_v13 = vld [vmem:[#allocation2 + $0x388] sm:$0xff]  ;;  %v649_v2 = vld [vmem:[#allocation2 + $0x3c0] sm:$0xff] }
 0x2e7   : > { %v4263_v14 = vld [vmem:[#allocation2 + $0x788] sm:$0xff]  ;;  %4653 = vst.msk [vmem:[%s6464_s9 + $0x380] sm:$0xff] %vm272_vm0, %v4397_v7  ;;  %v4398_v15 = vadd.f32 %v7519_v6, %v4135_v13  ;;  %3878 = vst.msk [vmem:[#allocation2 + $0x398] sm:$0xff] %vm272_vm0, %v3621_v22  ;;  %v777_v0 = vld [vmem:[#allocation2 + $0x7c0] sm:$0xff] }
 0x2e8   : > { %4781 = vst.msk [vmem:[%s6464_s9 + $0x780] sm:$0xff] %vm272_vm0, %v4525_v8  ;;  %v4526_v16 = vadd.f32 %v7519_v6, %v4263_v14  ;;  %4006 = vst.msk [vmem:[#allocation2 + $0x798] sm:$0xff] %vm272_vm0, %v3749_v10  ;;  %v778_v7 = vld [vmem:[#allocation2 + $0x7c8] sm:$0xff] }
 0x2e9   : > { %4654 = vst.msk [vmem:[%s6464_s9 + $0x388] sm:$0xff] %vm272_vm0, %v4398_v15 }
 0x2ea   : > { %4782 = vst.msk [vmem:[%s6464_s9 + $0x788] sm:$0xff] %vm272_vm0, %v4526_v16  ;;  %v2947_v19 = vpop.f32.mrb[232].mxu0  ;;  %v3459_v20 = vpop.f32.mrb[232].mxu1 }
 0x2eb   : > { %v3622_v25 = vadd.f32 %v2947_v19, %v645_v17  ;;  %v3750_v26 = vadd.f32 %v3459_v20, %v773_v18  ;;  %v2949_v27 = vpop.f32.mrb[233].mxu0  ;;  %v3461_v28 = vpop.f32.mrb[233].mxu1 }
 0x2ec   : > { %v4136_v29 = vld [vmem:[#allocation2 + $0x390] sm:$0xff]  ;;  %v2950_v31 = vpop.f32.mrb[234].mxu0  ;;  %v3462_v32 = vpop.f32.mrb[234].mxu1 }
 0x2ed   : > { %v4264_v30 = vld [vmem:[#allocation2 + $0x790] sm:$0xff]  ;;  %v4399_v33 = vadd.f32 %v7519_v6, %v4136_v29  ;;  %3879 = vst.msk [vmem:[#allocation2 + $0x3a0] sm:$0xff] %vm272_vm0, %v3622_v25  ;;  %4007 = vst.msk [vmem:[#allocation2 + $0x7a0] sm:$0xff] %vm272_vm0, %v3750_v26  ;;  %v3623_v35 = vadd.f32 %v2950_v31, %v646_v21  ;;  %v3751_v36 = vadd.f32 %v3462_v32, %v774_v23  ;;  %v2952_v37 = vpop.f32.mrb[235].mxu0  ;;  %v3464_v38 = vpop.f32.mrb[235].mxu1  ;;  %v652_v32 = vld [vmem:[#allocation2 + $0x3d8] sm:$0xff] }
 0x2ee   : > { %v4527_v34 = vadd.f32 %v7519_v6, %v4264_v30  ;;  %v4137_v39 = vld [vmem:[#allocation2 + $0x398] sm:$0xff]  ;;  %v651_v28 = vld [vmem:[#allocation2 + $0x3d0] sm:$0xff] }
 0x2ef   : > { %v4265_v40 = vld [vmem:[#allocation2 + $0x798] sm:$0xff]  ;;  %4655 = vst.msk [vmem:[%s6464_s9 + $0x390] sm:$0xff] %vm272_vm0, %v4399_v33  ;;  %v4400_v41 = vadd.f32 %v7519_v6, %v4137_v39  ;;  %3880 = vst.msk [vmem:[#allocation2 + $0x3a8] sm:$0xff] %vm272_vm0, %v3623_v35  ;;  %v779_v29 = vld [vmem:[#allocation2 + $0x7d0] sm:$0xff] }
 0x2f0   : > { %4783 = vst.msk [vmem:[%s6464_s9 + $0x790] sm:$0xff] %vm272_vm0, %v4527_v34  ;;  %v4528_v42 = vadd.f32 %v7519_v6, %v4265_v40  ;;  %4008 = vst.msk [vmem:[#allocation2 + $0x7a8] sm:$0xff] %vm272_vm0, %v3751_v36  ;;  %v780_v33 = vld [vmem:[#allocation2 + $0x7d8] sm:$0xff] }
 0x2f1   : > { %4656 = vst.msk [vmem:[%s6464_s9 + $0x398] sm:$0xff] %vm272_vm0, %v4400_v41 }
 0x2f2   : > { %4784 = vst.msk [vmem:[%s6464_s9 + $0x798] sm:$0xff] %vm272_vm0, %v4528_v42  ;;  %v2955_v45 = vpop.f32.mrb[236].mxu0  ;;  %v3467_v46 = vpop.f32.mrb[236].mxu1 }
 0x2f3   : > { %v3624_v49 = vadd.f32 %v2955_v45, %v647_v43  ;;  %v3752_v50 = vadd.f32 %v3467_v46, %v775_v44  ;;  %v2957_v51 = vpop.f32.mrb[237].mxu0  ;;  %v3469_v52 = vpop.f32.mrb[237].mxu1 }
 0x2f4   : > { %v4138_v53 = vld [vmem:[#allocation2 + $0x3a0] sm:$0xff]  ;;  %v2958_v55 = vpop.f32.mrb[238].mxu0  ;;  %v3470_v56 = vpop.f32.mrb[238].mxu1 }
 0x2f5   : > { %v4266_v54 = vld [vmem:[#allocation2 + $0x7a0] sm:$0xff]  ;;  %v4401_v57 = vadd.f32 %v7519_v6, %v4138_v53  ;;  %3881 = vst.msk [vmem:[#allocation2 + $0x3b0] sm:$0xff] %vm272_vm0, %v3624_v49  ;;  %4009 = vst.msk [vmem:[#allocation2 + $0x7b0] sm:$0xff] %vm272_vm0, %v3752_v50  ;;  %v3625_v59 = vadd.f32 %v2958_v55, %v648_v47  ;;  %v3753_v24 = vadd.f32 %v3470_v56, %v776_v48  ;;  %v2960_v60 = vpop.f32.mrb[239].mxu0  ;;  %v3472_v9 = vpop.f32.mrb[239].mxu1  ;;  %v654_v56 = vld [vmem:[#allocation2 + $0x3e8] sm:$0xff] }
 0x2f6   : > { %v4529_v58 = vadd.f32 %v7519_v6, %v4266_v54  ;;  %v4139_v61 = vld [vmem:[#allocation2 + $0x3a8] sm:$0xff]  ;;  %v653_v52 = vld [vmem:[#allocation2 + $0x3e0] sm:$0xff] }
 0x2f7   : > { %v4267_v62 = vld [vmem:[#allocation2 + $0x7a8] sm:$0xff]  ;;  %4657 = vst.msk [vmem:[%s6464_s9 + $0x3a0] sm:$0xff] %vm272_vm0, %v4401_v57  ;;  %v4402_v63 = vadd.f32 %v7519_v6, %v4139_v61  ;;  %3882 = vst.msk [vmem:[#allocation2 + $0x3b8] sm:$0xff] %vm272_vm0, %v3625_v59  ;;  %v781_v53 = vld [vmem:[#allocation2 + $0x7e0] sm:$0xff] }
 0x2f8   : > { %4785 = vst.msk [vmem:[%s6464_s9 + $0x7a0] sm:$0xff] %vm272_vm0, %v4529_v58  ;;  %v4530_v1 = vadd.f32 %v7519_v6, %v4267_v62  ;;  %4010 = vst.msk [vmem:[#allocation2 + $0x7b8] sm:$0xff] %vm272_vm0, %v3753_v24  ;;  %v782_v57 = vld [vmem:[#allocation2 + $0x7e8] sm:$0xff] }
 0x2f9   : > { %4658 = vst.msk [vmem:[%s6464_s9 + $0x3a8] sm:$0xff] %vm272_vm0, %v4402_v63 }
 0x2fa   : > { %4786 = vst.msk [vmem:[%s6464_s9 + $0x7a8] sm:$0xff] %vm272_vm0, %v4530_v1  ;;  %v2963_v3 = vpop.f32.mrb[240].mxu0  ;;  %v3475_v4 = vpop.f32.mrb[240].mxu1 }
 0x2fb   : > { %v3626_v8 = vadd.f32 %v2963_v3, %v649_v2  ;;  %v3754_v22 = vadd.f32 %v3475_v4, %v777_v0  ;;  %v2965_v10 = vpop.f32.mrb[241].mxu0  ;;  %v3477_v11 = vpop.f32.mrb[241].mxu1 }
 0x2fc   : > { %v4140_v12 = vld [vmem:[#allocation2 + $0x3b0] sm:$0xff]  ;;  %v2966_v14 = vpop.f32.mrb[242].mxu0  ;;  %v3478_v15 = vpop.f32.mrb[242].mxu1 }
 0x2fd   : > { %v4268_v13 = vld [vmem:[#allocation2 + $0x7b0] sm:$0xff]  ;;  %v4403_v16 = vadd.f32 %v7519_v6, %v4140_v12  ;;  %3883 = vst.msk [vmem:[#allocation2 + $0x3c0] sm:$0xff] %vm272_vm0, %v3626_v8  ;;  %4011 = vst.msk [vmem:[#allocation2 + $0x7c0] sm:$0xff] %vm272_vm0, %v3754_v22  ;;  %v3627_v18 = vadd.f32 %v2966_v14, %v650_v5  ;;  %v3755_v19 = vadd.f32 %v3478_v15, %v778_v7  ;;  %v2968_v20 = vpop.f32.mrb[243].mxu0  ;;  %v3480_v21 = vpop.f32.mrb[243].mxu1  ;;  %v656_v15 = vld [vmem:[#allocation2 + $0x3f8] sm:$0xff] }
 0x2fe   : > { %v4531_v17 = vadd.f32 %v7519_v6, %v4268_v13  ;;  %v4141_v23 = vld [vmem:[#allocation2 + $0x3b8] sm:$0xff]  ;;  %v655_v11 = vld [vmem:[#allocation2 + $0x3f0] sm:$0xff] }
 0x2ff   : > { %v4269_v25 = vld [vmem:[#allocation2 + $0x7b8] sm:$0xff]  ;;  %4659 = vst.msk [vmem:[%s6464_s9 + $0x3b0] sm:$0xff] %vm272_vm0, %v4403_v16  ;;  %v4404_v26 = vadd.f32 %v7519_v6, %v4141_v23  ;;  %3884 = vst.msk [vmem:[#allocation2 + $0x3c8] sm:$0xff] %vm272_vm0, %v3627_v18  ;;  %v783_v12 = vld [vmem:[#allocation2 + $0x7f0] sm:$0xff] }
 0x300   : > { %4787 = vst.msk [vmem:[%s6464_s9 + $0x7b0] sm:$0xff] %vm272_vm0, %v4531_v17  ;;  %v4532_v27 = vadd.f32 %v7519_v6, %v4269_v25  ;;  %4012 = vst.msk [vmem:[#allocation2 + $0x7c8] sm:$0xff] %vm272_vm0, %v3755_v19  ;;  %v784_v16 = vld [vmem:[#allocation2 + $0x7f8] sm:$0xff] }
 0x301   : > { %4660 = vst.msk [vmem:[%s6464_s9 + $0x3b8] sm:$0xff] %vm272_vm0, %v4404_v26 }
 0x302   : > { %4788 = vst.msk [vmem:[%s6464_s9 + $0x7b8] sm:$0xff] %vm272_vm0, %v4532_v27  ;;  %v2971_v30 = vpop.f32.mrb[244].mxu0  ;;  %v3483_v31 = vpop.f32.mrb[244].mxu1 }
 0x303   : > { %v3628_v34 = vadd.f32 %v2971_v30, %v651_v28  ;;  %v3756_v35 = vadd.f32 %v3483_v31, %v779_v29  ;;  %v2973_v36 = vpop.f32.mrb[245].mxu0  ;;  %v3485_v37 = vpop.f32.mrb[245].mxu1 }
 0x304   : > { %v4142_v38 = vld [vmem:[#allocation2 + $0x3c0] sm:$0xff]  ;;  %v2974_v40 = vpop.f32.mrb[246].mxu0  ;;  %v3486_v41 = vpop.f32.mrb[246].mxu1 }
 0x305   : > { %v4270_v39 = vld [vmem:[#allocation2 + $0x7c0] sm:$0xff]  ;;  %v4405_v42 = vadd.f32 %v7519_v6, %v4142_v38  ;;  %3885 = vst.msk [vmem:[#allocation2 + $0x3d0] sm:$0xff] %vm272_vm0, %v3628_v34  ;;  %4013 = vst.msk [vmem:[#allocation2 + $0x7d0] sm:$0xff] %vm272_vm0, %v3756_v35  ;;  %v3629_v44 = vadd.f32 %v2974_v40, %v652_v32  ;;  %v3757_v45 = vadd.f32 %v3486_v41, %v780_v33  ;;  %v2976_v46 = vpop.f32.mrb[247].mxu0  ;;  %v3488_v47 = vpop.f32.mrb[247].mxu1 }
 0x306   : > { %v4533_v43 = vadd.f32 %v7519_v6, %v4270_v39  ;;  %v4143_v48 = vld [vmem:[#allocation2 + $0x3c8] sm:$0xff] }
 0x307   : > { %v4271_v49 = vld [vmem:[#allocation2 + $0x7c8] sm:$0xff]  ;;  %4661 = vst.msk [vmem:[%s6464_s9 + $0x3c0] sm:$0xff] %vm272_vm0, %v4405_v42  ;;  %v4406_v50 = vadd.f32 %v7519_v6, %v4143_v48  ;;  %3886 = vst.msk [vmem:[#allocation2 + $0x3d8] sm:$0xff] %vm272_vm0, %v3629_v44 }
 0x308   : > { %4789 = vst.msk [vmem:[%s6464_s9 + $0x7c0] sm:$0xff] %vm272_vm0, %v4533_v43  ;;  %v4534_v51 = vadd.f32 %v7519_v6, %v4271_v49  ;;  %4014 = vst.msk [vmem:[#allocation2 + $0x7d8] sm:$0xff] %vm272_vm0, %v3757_v45 }
 0x309   : > { %4662 = vst.msk [vmem:[%s6464_s9 + $0x3c8] sm:$0xff] %vm272_vm0, %v4406_v50 }
 0x30a   : > { %4790 = vst.msk [vmem:[%s6464_s9 + $0x7c8] sm:$0xff] %vm272_vm0, %v4534_v51  ;;  %v2979_v54 = vpop.f32.mrb[248].mxu0  ;;  %v3491_v55 = vpop.f32.mrb[248].mxu1 }
 0x30b   : > { %v3630_v58 = vadd.f32 %v2979_v54, %v653_v52  ;;  %v3758_v59 = vadd.f32 %v3491_v55, %v781_v53  ;;  %v2981_v24 = vpop.f32.mrb[249].mxu0  ;;  %v3493_v60 = vpop.f32.mrb[249].mxu1 }
 0x30c   : > { %v4144_v9 = vld [vmem:[#allocation2 + $0x3d0] sm:$0xff]  ;;  %v2982_v62 = vpop.f32.mrb[250].mxu0  ;;  %v3494_v63 = vpop.f32.mrb[250].mxu1 }
 0x30d   : > { %v4272_v61 = vld [vmem:[#allocation2 + $0x7d0] sm:$0xff]  ;;  %v4407_v1 = vadd.f32 %v7519_v6, %v4144_v9  ;;  %3887 = vst.msk [vmem:[#allocation2 + $0x3e0] sm:$0xff] %vm272_vm0, %v3630_v58  ;;  %4015 = vst.msk [vmem:[#allocation2 + $0x7e0] sm:$0xff] %vm272_vm0, %v3758_v59  ;;  %v3631_v0 = vadd.f32 %v2982_v62, %v654_v56  ;;  %v3759_v3 = vadd.f32 %v3494_v63, %v782_v57  ;;  %v2984_v4 = vpop.f32.mrb[251].mxu0  ;;  %v3496_v5 = vpop.f32.mrb[251].mxu1 }
 0x30e   : > { %v4535_v2 = vadd.f32 %v7519_v6, %v4272_v61  ;;  %v4145_v7 = vld [vmem:[#allocation2 + $0x3d8] sm:$0xff] }
 0x30f   : > { %v4273_v8 = vld [vmem:[#allocation2 + $0x7d8] sm:$0xff]  ;;  %4663 = vst.msk [vmem:[%s6464_s9 + $0x3d0] sm:$0xff] %vm272_vm0, %v4407_v1  ;;  %v4408_v22 = vadd.f32 %v7519_v6, %v4145_v7  ;;  %3888 = vst.msk [vmem:[#allocation2 + $0x3e8] sm:$0xff] %vm272_vm0, %v3631_v0 }
 0x310   : > { %4791 = vst.msk [vmem:[%s6464_s9 + $0x7d0] sm:$0xff] %vm272_vm0, %v4535_v2  ;;  %v4536_v10 = vadd.f32 %v7519_v6, %v4273_v8  ;;  %4016 = vst.msk [vmem:[#allocation2 + $0x7e8] sm:$0xff] %vm272_vm0, %v3759_v3 }
 0x311   : > { %4664 = vst.msk [vmem:[%s6464_s9 + $0x3d8] sm:$0xff] %vm272_vm0, %v4408_v22 }
 0x312   : > { %4792 = vst.msk [vmem:[%s6464_s9 + $0x7d8] sm:$0xff] %vm272_vm0, %v4536_v10  ;;  %v2987_v13 = vpop.f32.mrb[252].mxu0  ;;  %v3499_v14 = vpop.f32.mrb[252].mxu1 }
 0x313   : > { %v3632_v17 = vadd.f32 %v2987_v13, %v655_v11  ;;  %v3760_v18 = vadd.f32 %v3499_v14, %v783_v12  ;;  %v2989_v19 = vpop.f32.mrb[253].mxu0  ;;  %v3501_v20 = vpop.f32.mrb[253].mxu1 }
 0x314   : > { %v4146_v21 = vld [vmem:[#allocation2 + $0x3e0] sm:$0xff]  ;;  %v2990_v25 = vpop.f32.mrb[254].mxu0  ;;  %v3502_v26 = vpop.f32.mrb[254].mxu1 }
 0x315   : > { %v4274_v23 = vld [vmem:[#allocation2 + $0x7e0] sm:$0xff]  ;;  %v4409_v27 = vadd.f32 %v7519_v6, %v4146_v21  ;;  %3889 = vst.msk [vmem:[#allocation2 + $0x3f0] sm:$0xff] %vm272_vm0, %v3632_v17  ;;  %4017 = vst.msk [vmem:[#allocation2 + $0x7f0] sm:$0xff] %vm272_vm0, %v3760_v18  ;;  %v3633_v29 = vadd.f32 %v2990_v25, %v656_v15  ;;  %v3761_v30 = vadd.f32 %v3502_v26, %v784_v16  ;;  %v2992_v31 = vpop.f32.mrb[255].mxu0  ;;  %v3504_v32 = vpop.f32.mrb[255].mxu1 }
 0x316   : > { %v4537_v28 = vadd.f32 %v7519_v6, %v4274_v23  ;;  %v4147_v33 = vld [vmem:[#allocation2 + $0x3e8] sm:$0xff] }
 0x317   : > { %v4275_v34 = vld [vmem:[#allocation2 + $0x7e8] sm:$0xff]  ;;  %4665 = vst.msk [vmem:[%s6464_s9 + $0x3e0] sm:$0xff] %vm272_vm0, %v4409_v27  ;;  %v4410_v35 = vadd.f32 %v7519_v6, %v4147_v33  ;;  %3890 = vst.msk [vmem:[#allocation2 + $0x3f8] sm:$0xff] %vm272_vm0, %v3633_v29 }
 0x318   : > { %4793 = vst.msk [vmem:[%s6464_s9 + $0x7e0] sm:$0xff] %vm272_vm0, %v4537_v28  ;;  %v4538_v36 = vadd.f32 %v7519_v6, %v4275_v34  ;;  %4018 = vst.msk [vmem:[#allocation2 + $0x7f8] sm:$0xff] %vm272_vm0, %v3761_v30 }
 0x319   : > { %4666 = vst.msk [vmem:[%s6464_s9 + $0x3e8] sm:$0xff] %vm272_vm0, %v4410_v35 }
 0x31a   : > { %4794 = vst.msk [vmem:[%s6464_s9 + $0x7e8] sm:$0xff] %vm272_vm0, %v4538_v36 }
 0x31c   : > { %v4148_v37 = vld [vmem:[#allocation2 + $0x3f0] sm:$0xff] }
 0x31d   : > { %v4276_v38 = vld [vmem:[#allocation2 + $0x7f0] sm:$0xff]  ;;  %v4411_v39 = vadd.f32 %v7519_v6, %v4148_v37 }
 0x31e   : > { %v4539_v40 = vadd.f32 %v7519_v6, %v4276_v38  ;;  %v4149_v41 = vld [vmem:[#allocation2 + $0x3f8] sm:$0xff] }
 0x31f   : > { %v4277_v42 = vld [vmem:[#allocation2 + $0x7f8] sm:$0xff]  ;;  %4667 = vst.msk [vmem:[%s6464_s9 + $0x3f0] sm:$0xff] %vm272_vm0, %v4411_v39  ;;  %v4412_v43 = vadd.f32 %v7519_v6, %v4149_v41 }
 0x320   : > { %4795 = vst.msk [vmem:[%s6464_s9 + $0x7f0] sm:$0xff] %vm272_vm0, %v4539_v40  ;;  %v4540_v44 = vadd.f32 %v7519_v6, %v4277_v42 }
 0x321   : > { %4668 = vst.msk [vmem:[%s6464_s9 + $0x3f8] sm:$0xff] %vm272_vm0, %v4412_v43 }
 0x322   : > { %4796 = vst.msk [vmem:[%s6464_s9 + $0x7f8] sm:$0xff] %vm272_vm0, %v4540_v44 }
 0x323 PF: > { %s13_s14 = sadd.s32 1, %s5683_s14   ;;  %s7658_s12 = smov %s5679_s13 }
 0x324   : > { %p10_p5 = scmp.ge.s32.totalorder %s13_s14, 10   ;;  %s7659_s13 = smov %s7661_s15 }
 0x326   :  { %12 = sbr.rel (!%p10_p5) target bundleno = 2 (0x2), region = 76 }

</bundles_post_ra>
